<compile_context>
chip_gen: v7x
topology: tpu7x:2x2x1
jax: 0.10.0
libtpu: 0.0.40
codegen_flags: <defaults>
</compile_context>

<pallas_src>
import math

import jax
import jax.numpy as jnp
from jax.experimental import pallas as pl
from jax.experimental.pallas import tpu as pltpu


# ----------------------------------------------------------------------------
# Per-generation tiling / VMEM budget
# ----------------------------------------------------------------------------
def _tile_config():
    try:
        vmem = pltpu.get_tpu_info().vmem_capacity_bytes
    except Exception:
        vmem = 64 * 1024 * 1024          # conservative fallback
    if vmem >= 96 * 1024 * 1024:         # v5e / v6e: 128 MiB VMEM per core
        return 128, 128, 100 * 1024 * 1024
    # v7x: 64 MiB per TensorCore -> smaller sender tile, modest scoped limit
    return 128, 64, 52 * 1024 * 1024


_TILE_I, _TILE_J, _VMEM_LIMIT = _tile_config()


# ----------------------------------------------------------------------------
# PointConv layer (local_nn = Lin -> ReLU -> Lin, max aggregation) + F.relu
# ----------------------------------------------------------------------------
def point_conv(pos, x, r, w1x, w1p, b1, w2, b2):
    """pos: (B, N, 3) f32; x: (B, N, Cx) f32 or None. Returns (B, N, H2) f32."""
    B, N, _ = pos.shape
    H1 = w1p.shape[1]
    H2 = w2.shape[1]

    if N <= _TILE_I:
        ti = tj = N
        n_pad = N
    else:
        ti, tj = _TILE_I, _TILE_J          # tj divides ti divides n_pad
        n_pad = ((N + ti - 1) // ti) * ti

    if n_pad != N:
        pad = n_pad - N
        # Park padded points far away so they fall outside every radius ball;
        # padded receiver rows are sliced off below.
        pos = jnp.concatenate(
            [pos, jnp.full((B, pad, 3), 1e6, pos.dtype)], axis=1)
        if x is not None:
            x = jnp.concatenate(
                [x, jnp.zeros((B, pad, x.shape[-1]), x.dtype)], axis=1)

    # --- O(N) per-point precompute (plain JAX; fuses into the XLA program) ---
    sq = jnp.sum(pos * pos, axis=-1, keepdims=True)               # (B,n,1)
    ones = jnp.ones_like(sq)
    recv_aug = jnp.concatenate([pos, sq, ones], axis=-1)          # (B,n,5) f32
    send_aug = jnp.concatenate([-2.0 * pos, ones, sq], axis=-1)   # (B,n,5) f32

    pw = jnp.dot(pos, w1p)                                        # (B,n,H1)
    a = pw + b1
    if x is not None:
        a = a + jnp.dot(x, w1x)
    a = a.astype(jnp.bfloat16)          # sender term   A[j]
    bi = pw.astype(jnp.bfloat16)        # receiver term Bi[i]
    w2b = w2.astype(jnp.bfloat16)

    r2 = float(r) * float(r)
    n_ti = n_pad // ti
    n_tj = n_pad // tj

    def kernel(recv_ref, bi_ref, send_ref, a_ref, w2_ref, b2_ref,
               out_ref, acc_ref):
        jt = pl.program_id(2)

        @pl.when(jt == 0)
        def _():
            acc_ref[...] = jnp.full(acc_ref.shape, -jnp.inf, acc_ref.dtype)

        j0 = jt * tj
        if tj % 8 == 0:
            j0 = pl.multiple_of(j0, tj)

        # Radius mask via one (ti,5)x(tj,5) MXU contraction -> lane-dense (ti,tj).
        ra = recv_ref[...]                                   # (ti, 5) f32
        sa = send_ref[pl.ds(j0, tj), :]                      # (tj, 5) f32
        d2 = jax.lax.dot_general(ra, sa, (((1,), (1,)), ((), ())),
                                 preferred_element_type=jnp.float32)
        bias = jnp.where(d2 <= r2, jnp.float32(0.0), jnp.float32(-1e30))

        # h1[i,j,:] = relu(concat([x_j, pos_j - pos_i]) @ W1 + b1) = relu(A_j - Bi_i)
        aj = a_ref[pl.ds(j0, tj), :]                         # (tj, H1) bf16
        bij = bi_ref[...]                                    # (ti, H1) bf16
        h1 = jnp.maximum(aj[None, :, :] - bij[:, None, :], 0)    # (ti,tj,H1) bf16
        h2 = jnp.dot(h1.reshape(ti * tj, H1), w2_ref[...],
                     preferred_element_type=jnp.float32)     # (ti*tj, H2) f32
        h2 = h2.reshape(ti, tj, H2) + bias[:, :, None]       # masked messages
        acc_ref[...] = jnp.maximum(acc_ref[...], jnp.max(h2, axis=1))

        @pl.when(jt == pl.num_programs(2) - 1)
        def _():
            # +b2 commutes with the masked max; F.relu(conv(...)) fused here.
            out_ref[...] = jnp.maximum(acc_ref[...] + b2_ref[...], 0.0)

    def _const(shape):
        return pl.BlockSpec(shape, lambda b, i, j: (0,) * len(shape))

    out = pl.pallas_call(
        kernel,
        grid=(B, n_ti, n_tj),
        in_specs=[
            pl.BlockSpec((None, ti, 5), lambda b, i, j: (b, i, 0)),      # recv_aug
            pl.BlockSpec((None, ti, H1), lambda b, i, j: (b, i, 0)),     # Bi
            pl.BlockSpec((None, n_pad, 5), lambda b, i, j: (b, 0, 0)),   # send_aug (graph-resident)
            pl.BlockSpec((None, n_pad, H1), lambda b, i, j: (b, 0, 0)),  # A (graph-resident)
            _const(w2b.shape),
            _const(b2.shape),
        ],
        out_specs=pl.BlockSpec((None, ti, H2), lambda b, i, j: (b, i, 0)),
        out_shape=jax.ShapeDtypeStruct((B, n_pad, H2), jnp.float32),
        scratch_shapes=[pltpu.VMEM((ti, H2), jnp.float32)],
        compiler_params=pltpu.CompilerParams(
            dimension_semantics=("parallel", "parallel", "arbitrary"),
            vmem_limit_bytes=_VMEM_LIMIT),
    )(recv_aug, bi, send_aug, a, w2b, b2)

    return out if n_pad == N else out[:, :N, :]


# ----------------------------------------------------------------------------
# Head: global_max_pool + lin1/relu + lin2/relu + (dropout=id) + lin3 + log_softmax
# ----------------------------------------------------------------------------
def _head_kernel(x_ref, w1_ref, b1_ref, w2_ref, b2_ref, w3_ref, b3_ref,
                 out_ref):
    x = x_ref[...]                         # (B, n, 256), graph-major
    pooled = jnp.max(x, axis=1)            # global max pool per graph

    h = jnp.maximum(
        jnp.dot(pooled, w1_ref[...],
                preferred_element_type=jnp.float32) + b1_ref[...], 0.0)
    h = jnp.maximum(
        jnp.dot(h, w2_ref[...],
                preferred_element_type=jnp.float32) + b2_ref[...], 0.0)
    # TODO(synk): F.dropout(p=0.5) is identity in eval mode; training-mode RNG
    # is not reproduced.
    logits = jnp.dot(h, w3_ref[...],
                     preferred_element_type=jnp.float32) + b3_ref[...]

    mx = jnp.max(logits, axis=-1, keepdims=True)
    sh = logits - mx
    out_ref[...] = sh - jnp.log(jnp.sum(jnp.exp(sh), axis=-1, keepdims=True))


def _full_spec(shape):
    return pl.BlockSpec(shape, lambda i: (0,) * len(shape))


def head(x, w1, b1, w2, b2, w3, b3):
    B = x.shape[0]
    nc = w3.shape[1]
    args = (x, w1, b1, w2, b2, w3, b3)
    return pl.pallas_call(
        _head_kernel,
        grid=(1,),
        in_specs=[_full_spec(a.shape) for a in args],
        out_specs=_full_spec((B, nc)),
        out_shape=jax.ShapeDtypeStruct((B, nc), jnp.float32),
        compiler_params=pltpu.CompilerParams(
            dimension_semantics=("arbitrary",),
            vmem_limit_bytes=_VMEM_LIMIT),
    )(*args)


# ----------------------------------------------------------------------------
# Plain-JAX glue: farthest point sampling (per graph), params, forward
# ----------------------------------------------------------------------------
def _fps_graph(pos_g, n_sample):
    # TODO(synk): PyG fps uses random_start=True; here we deterministically
    # start at the first point of each graph.
    n = pos_g.shape[0]

    def body(k, state):
        sel, dmin = state
        last = pos_g[sel[k - 1]]
        d = jnp.sum((pos_g - last[None, :]) ** 2, axis=-1)
        dmin = jnp.minimum(dmin, d)
        nxt = jnp.argmax(dmin).astype(jnp.int32)
        sel = sel.at[k].set(nxt)
        return sel, dmin

    sel0 = jnp.zeros((n_sample,), dtype=jnp.int32)
    dmin0 = jnp.full((n,), jnp.inf, dtype=jnp.float32)
    sel, _ = jax.lax.fori_loop(1, n_sample, body, (sel0, dmin0))
    return sel


def _init_linear(key, fan_in, fan_out):
    kw, kb = jax.random.split(key)
    bound = 1.0 / math.sqrt(fan_in)
    w = jax.random.uniform(kw, (fan_in, fan_out), minval=-bound, maxval=bound,
                           dtype=jnp.float32)
    b = jax.random.uniform(kb, (1, fan_out), minval=-bound, maxval=bound,
                           dtype=jnp.float32)
    return w, b


def init_params(key, num_classes):
    ks = jax.random.split(key, 9)
    # conv1: local_nn = Lin(3, 64) -> ReLU -> Lin(64, 64); x is None
    w1, b1 = _init_linear(ks[0], 3, 64)
    w2, b2 = _init_linear(ks[1], 64, 64)
    conv1 = (w1, b1, w2, b2)
    # conv2: Lin(67,128) -> ReLU -> Lin(128,128); concat order = [x(64), dpos(3)]
    wa, ba = _init_linear(ks[2], 67, 128)
    wb, bb = _init_linear(ks[3], 128, 128)
    conv2 = (wa[:64], wa[64:], ba, wb, bb)
    # conv3: Lin(131,256) -> ReLU -> Lin(256,256); concat order = [x(128), dpos(3)]
    wc, bc = _init_linear(ks[4], 131, 256)
    wd, bd = _init_linear(ks[5], 256, 256)
    conv3 = (wc[:128], wc[128:], bc, wd, bd)
    l1 = _init_linear(ks[6], 256, 256)
    l2 = _init_linear(ks[7], 256, 256)
    l3 = _init_linear(ks[8], 256, num_classes)
    return {"conv1": conv1, "conv2": conv2, "conv3": conv3,
            "head": (*l1, *l2, *l3)}


def forward(pos, batch, params, num_graphs, points_per_graph):
    # Graph-major dense layout; uniform graph sizes assumed (matches driver).
    # TODO(synk): ragged batches would need per-graph offsets via scalar
    # prefetch instead of a plain reshape.
    del batch
    B = num_graphs
    n1 = points_per_graph
    pos = pos.reshape(B, n1, 3)

    # layer 1 (x = None): radius 0.2, local_nn only sees pos_j - pos_i
    x = point_conv(pos, None, 0.2, None, *params["conv1"])

    # fps ratio 0.5 per graph, then gather x/pos
    n2 = int(math.ceil(0.5 * n1))
    idx = jax.vmap(lambda p: _fps_graph(p, n2))(pos)
    pos = jnp.take_along_axis(pos, idx[:, :, None], axis=1)
    x = jnp.take_along_axis(x, idx[:, :, None], axis=1)

    x = point_conv(pos, x, 0.4, *params["conv2"])

    # fps ratio 0.25 per graph
    n3 = int(math.ceil(0.25 * n2))
    idx = jax.vmap(lambda p: _fps_graph(p, n3))(pos)
    pos = jnp.take_along_axis(pos, idx[:, :, None], axis=1)
    x = jnp.take_along_axis(x, idx[:, :, None], axis=1)

    x = point_conv(pos, x, 1.0, *params["conv3"])

    # TODO(synk): radius_graph's max_num_neighbors=32 cap is not applied
    # (all in-radius neighbors contribute to the max).
    return head(x, *params["head"])


if __name__ == "__main__":
    key = jax.random.PRNGKey(0)
    num_graphs = 2
    points_per_graph = 32
    num_classes = 10

    kpos, kparams = jax.random.split(key)
    pos = jax.random.uniform(kpos, (num_graphs * points_per_graph, 3),
                             dtype=jnp.float32)
    batch = jnp.repeat(jnp.arange(num_graphs, dtype=jnp.int32),
                       points_per_graph)

    params = init_params(kparams, num_classes)
    fwd = jax.jit(forward, static_argnums=(3, 4))
    out = fwd(pos, batch, params, num_graphs, points_per_graph)
    out = jax.block_until_ready(out)
    assert out.shape == (num_graphs, num_classes)
    assert bool(jnp.all(jnp.isfinite(out)))
    print("KERNEL_OK")
</pallas_src>

<mosaic_0001>
module attributes {stable_mosaic.version = 11 : i64} {
  func.func @kernel(%arg0: i32, %arg1: i32, %arg2: i32, %arg3: memref<1x32x5xf32, #tpu.memory_space<vmem>>, %arg4: memref<1x32x64xbf16, #tpu.memory_space<vmem>>, %arg5: memref<1x32x5xf32, #tpu.memory_space<vmem>>, %arg6: memref<1x32x64xbf16, #tpu.memory_space<vmem>>, %arg7: memref<64x64xbf16, #tpu.memory_space<vmem>>, %arg8: memref<1x64xf32, #tpu.memory_space<vmem>>, %arg9: memref<1x32x64xf32, #tpu.memory_space<vmem>>, %arg10: memref<32x64xf32, #tpu.memory_space<vmem>>) attributes {dimension_semantics = [#tpu.dimension_semantics<parallel>, #tpu.dimension_semantics<parallel>, #tpu.dimension_semantics<arbitrary>], iteration_bounds = array<i64: 2, 1, 1>, scalar_prefetch = 0 : i64, scratch_operands = 1 : i64, tpu.core_type = #tpu.core_type<tc>, window_params = [{transform_indices = @transform_0, window_bounds = array<i64: 1, 32, 5>}, {transform_indices = @transform_1, window_bounds = array<i64: 1, 32, 64>}, {transform_indices = @transform_2, window_bounds = array<i64: 1, 32, 5>}, {transform_indices = @transform_3, window_bounds = array<i64: 1, 32, 64>}, {pipeline_mode = #tpu.pipeline_mode<synchronous>, transform_indices = @transform_4, window_bounds = array<i64: 64, 64>}, {pipeline_mode = #tpu.pipeline_mode<synchronous>, transform_indices = @transform_5, window_bounds = array<i64: 1, 64>}, {transform_indices = @transform_6, window_bounds = array<i64: 1, 32, 64>}]} {
    %c0_i32 = arith.constant 0 : i32
    %0 = arith.cmpi eq, %arg2, %c0_i32 : i32
    %1 = arith.extui %0 : i1 to i32
    %c0_i32_0 = arith.constant 0 : i32
    %2 = arith.cmpi ne, %1, %c0_i32_0 : i32
    scf.if %2 {
      %cst_24 = arith.constant 0xFF800000 : f32
      %42 = vector.broadcast %cst_24 : f32 to vector<32x64xf32>
      %c0_25 = arith.constant 0 : index
      %c0_26 = arith.constant 0 : index
      %43 = vector.load %arg10[%c0_25, %c0_26] : memref<32x64xf32, #tpu.memory_space<vmem>>, vector<32x64xf32>
      tpu.vector_store %arg10[%c0_25, %c0_26], %42 {strides = array<i32>} : memref<32x64xf32, #tpu.memory_space<vmem>>, vector<32x64xf32>,
    } else {
    }
    %c32_i32 = arith.constant 32 : i32
    %3 = arith.muli %arg2, %c32_i32 : i32
    %4 = tpu.assume_multiple %3, 32 : i32
    %c0 = arith.constant 0 : index
    %c0_1 = arith.constant 0 : index
    %c0_2 = arith.constant 0 : index
    %5 = vector.load %arg3[%c0, %c0_1, %c0_2] : memref<1x32x5xf32, #tpu.memory_space<vmem>>, vector<1x32x5xf32>
    %6 = vector.shape_cast %5 : vector<1x32x5xf32> to vector<32x5xf32>
    %c0_3 = arith.constant 0 : index
    %7 = arith.index_cast %4 : i32 to index
    %c0_4 = arith.constant 0 : index
    %8 = vector.load %arg5[%c0_3, %7, %c0_4] : memref<1x32x5xf32, #tpu.memory_space<vmem>>, vector<1x32x5xf32>
    %9 = vector.shape_cast %8 : vector<1x32x5xf32> to vector<32x5xf32>
    %cst = arith.constant dense<0.000000e+00> : vector<32x32xf32>
    %10 = tpu.matmul %6, %9, %cst {dimension_numbers = #tpu.dot_dimension_numbers<[1], [1], [0], [0], [0, 0, 1, 0], [], []>} : vector<32x5xf32>, vector<32x5xf32>, vector<32x32xf32> -> vector<32x32xf32>
    %cst_5 = arith.constant 4.000000e-02 : f32
    %11 = vector.broadcast %cst_5 : f32 to vector<32x32xf32>
    %12 = arith.cmpf ole, %10, %11 : vector<32x32xf32>
    %cst_6 = arith.constant 0.000000e+00 : f32
    %cst_7 = arith.constant -1.000000e+30 : f32
    %13 = vector.broadcast %cst_6 : f32 to vector<32x32xf32>
    %14 = vector.broadcast %cst_7 : f32 to vector<32x32xf32>
    %15 = arith.select %12, %13, %14 : vector<32x32xi1>, vector<32x32xf32>
    %c0_8 = arith.constant 0 : index
    %16 = arith.index_cast %4 : i32 to index
    %c0_9 = arith.constant 0 : index
    %17 = vector.load %arg6[%c0_8, %16, %c0_9] : memref<1x32x64xbf16, #tpu.memory_space<vmem>>, vector<1x32x64xbf16>
    %18 = vector.shape_cast %17 : vector<1x32x64xbf16> to vector<32x64xbf16>
    %c0_10 = arith.constant 0 : index
    %c0_11 = arith.constant 0 : index
    %c0_12 = arith.constant 0 : index
    %19 = vector.load %arg4[%c0_10, %c0_11, %c0_12] : memref<1x32x64xbf16, #tpu.memory_space<vmem>>, vector<1x32x64xbf16>
    %20 = vector.shape_cast %19 : vector<1x32x64xbf16> to vector<32x64xbf16>
    %21 = vector.shape_cast %18 : vector<32x64xbf16> to vector<1x32x64xbf16>
    %22 = vector.shape_cast %20 : vector<32x64xbf16> to vector<32x1x64xbf16>
    %23 = vector.broadcast %21 : vector<1x32x64xbf16> to vector<32x32x64xbf16>
    %24 = vector.broadcast %22 : vector<32x1x64xbf16> to vector<32x32x64xbf16>
    %25 = arith.subf %23, %24 : vector<32x32x64xbf16>
    %cst_13 = arith.constant 0.000000e+00 : bf16
    %26 = vector.broadcast %cst_13 : bf16 to vector<32x32x64xbf16>
    %27 = arith.maximumf %25, %26 : vector<32x32x64xbf16>
    %28 = vector.shape_cast %27 : vector<32x32x64xbf16> to vector<1024x64xbf16>
    %c0_14 = arith.constant 0 : index
    %c0_15 = arith.constant 0 : index
    %29 = vector.load %arg7[%c0_14, %c0_15] : memref<64x64xbf16, #tpu.memory_space<vmem>>, vector<64x64xbf16>
    %cst_16 = arith.constant dense<0.000000e+00> : vector<1024x64xf32>
    %30 = tpu.matmul %28, %29, %cst_16 {dimension_numbers = #tpu.dot_dimension_numbers<[1], [0], [0], [1], [0, 0, 1, 1], [], []>} : vector<1024x64xbf16>, vector<64x64xbf16>, vector<1024x64xf32> -> vector<1024x64xf32>
    %31 = vector.shape_cast %30 : vector<1024x64xf32> to vector<32x32x64xf32>
    %32 = vector.shape_cast %15 : vector<32x32xf32> to vector<32x32x1xf32>
    %33 = vector.broadcast %32 : vector<32x32x1xf32> to vector<32x32x64xf32>
    %34 = arith.addf %31, %33 : vector<32x32x64xf32>
    %c0_17 = arith.constant 0 : index
    %c0_18 = arith.constant 0 : index
    %35 = vector.load %arg10[%c0_17, %c0_18] : memref<32x64xf32, #tpu.memory_space<vmem>>, vector<32x64xf32>
    %cst_19 = arith.constant dense<0xFF800000> : vector<32x64xf32>
    %36 = vector.multi_reduction <maximumf>, %34, %cst_19 [1] : vector<32x32x64xf32> to vector<32x64xf32>
    %37 = arith.maximumf %35, %36 : vector<32x64xf32>
    %c0_20 = arith.constant 0 : index
    %c0_21 = arith.constant 0 : index
    %38 = vector.load %arg10[%c0_20, %c0_21] : memref<32x64xf32, #tpu.memory_space<vmem>>, vector<32x64xf32>
    tpu.vector_store %arg10[%c0_20, %c0_21], %37 {strides = array<i32>} : memref<32x64xf32, #tpu.memory_space<vmem>>, vector<32x64xf32>,
    %c0_i32_22 = arith.constant 0 : i32
    %39 = arith.cmpi eq, %arg2, %c0_i32_22 : i32
    %40 = arith.extui %39 : i1 to i32
    %c0_i32_23 = arith.constant 0 : i32
    %41 = arith.cmpi ne, %40, %c0_i32_23 : i32
    scf.if %41 {
      %c0_24 = arith.constant 0 : index
      %c0_25 = arith.constant 0 : index
      %42 = vector.load %arg10[%c0_24, %c0_25] : memref<32x64xf32, #tpu.memory_space<vmem>>, vector<32x64xf32>
      %c0_26 = arith.constant 0 : index
      %c0_27 = arith.constant 0 : index
      %43 = vector.load %arg8[%c0_26, %c0_27] : memref<1x64xf32, #tpu.memory_space<vmem>>, vector<1x64xf32>
      %44 = vector.broadcast %43 : vector<1x64xf32> to vector<32x64xf32>
      %45 = arith.addf %42, %44 : vector<32x64xf32>
      %cst_28 = arith.constant 0.000000e+00 : f32
      %46 = vector.broadcast %cst_28 : f32 to vector<32x64xf32>
      %47 = arith.maximumf %45, %46 : vector<32x64xf32>
      %c0_29 = arith.constant 0 : index
      %c0_30 = arith.constant 0 : index
      %c0_31 = arith.constant 0 : index
      %48 = vector.load %arg9[%c0_29, %c0_30, %c0_31] : memref<1x32x64xf32, #tpu.memory_space<vmem>>, vector<1x32x64xf32>
      %49 = vector.shape_cast %48 : vector<1x32x64xf32> to vector<32x64xf32>
      %50 = vector.shape_cast %47 : vector<32x64xf32> to vector<1x32x64xf32>
      tpu.vector_store %arg9[%c0_29, %c0_30, %c0_31], %50 {strides = array<i32>} : memref<1x32x64xf32, #tpu.memory_space<vmem>>, vector<1x32x64xf32>,
    } else {
    }
    return
  }
  func.func @transform_0(%arg0: i32, %arg1: i32, %arg2: i32) -> (i32, i32, i32) {
    %c0_i32 = arith.constant 0 : i32
    %c0_i32_0 = arith.constant 0 : i32
    return %arg0, %arg1, %c0_i32 : i32, i32, i32
  }
  func.func @transform_1(%arg0: i32, %arg1: i32, %arg2: i32) -> (i32, i32, i32) {
    %c0_i32 = arith.constant 0 : i32
    %c0_i32_0 = arith.constant 0 : i32
    return %arg0, %arg1, %c0_i32 : i32, i32, i32
  }
  func.func @transform_2(%arg0: i32, %arg1: i32, %arg2: i32) -> (i32, i32, i32) {
    %c0_i32 = arith.constant 0 : i32
    %c0_i32_0 = arith.constant 0 : i32
    %c0_i32_1 = arith.constant 0 : i32
    return %arg0, %c0_i32, %c0_i32_0 : i32, i32, i32
  }
  func.func @transform_3(%arg0: i32, %arg1: i32, %arg2: i32) -> (i32, i32, i32) {
    %c0_i32 = arith.constant 0 : i32
    %c0_i32_0 = arith.constant 0 : i32
    %c0_i32_1 = arith.constant 0 : i32
    return %arg0, %c0_i32, %c0_i32_0 : i32, i32, i32
  }
  func.func @transform_4(%arg0: i32, %arg1: i32, %arg2: i32) -> (i32, i32) {
    %c0_i32 = arith.constant 0 : i32
    %c0_i32_0 = arith.constant 0 : i32
    %c0_i32_1 = arith.constant 0 : i32
    return %c0_i32, %c0_i32_0 : i32, i32
  }
  func.func @transform_5(%arg0: i32, %arg1: i32, %arg2: i32) -> (i32, i32) {
    %c0_i32 = arith.constant 0 : i32
    %c0_i32_0 = arith.constant 0 : i32
    %c0_i32_1 = arith.constant 0 : i32
    return %c0_i32, %c0_i32_0 : i32, i32
  }
  func.func @transform_6(%arg0: i32, %arg1: i32, %arg2: i32) -> (i32, i32, i32) {
    %c0_i32 = arith.constant 0 : i32
    %c0_i32_0 = arith.constant 0 : i32
    return %arg0, %arg1, %c0_i32 : i32, i32, i32
  }
}

module attributes {stable_mosaic.version = 11 : i64} {
  func.func @kernel(%arg0: i32, %arg1: i32, %arg2: i32, %arg3: memref<1x16x5xf32, #tpu.memory_space<vmem>>, %arg4: memref<1x16x128xbf16, #tpu.memory_space<vmem>>, %arg5: memref<1x16x5xf32, #tpu.memory_space<vmem>>, %arg6: memref<1x16x128xbf16, #tpu.memory_space<vmem>>, %arg7: memref<128x128xbf16, #tpu.memory_space<vmem>>, %arg8: memref<1x128xf32, #tpu.memory_space<vmem>>, %arg9: memref<1x16x128xf32, #tpu.memory_space<vmem>>, %arg10: memref<16x128xf32, #tpu.memory_space<vmem>>) attributes {dimension_semantics = [#tpu.dimension_semantics<parallel>, #tpu.dimension_semantics<parallel>, #tpu.dimension_semantics<arbitrary>], iteration_bounds = array<i64: 2, 1, 1>, scalar_prefetch = 0 : i64, scratch_operands = 1 : i64, tpu.core_type = #tpu.core_type<tc>, window_params = [{transform_indices = @transform_0, window_bounds = array<i64: 1, 16, 5>}, {transform_indices = @transform_1, window_bounds = array<i64: 1, 16, 128>}, {transform_indices = @transform_2, window_bounds = array<i64: 1, 16, 5>}, {transform_indices = @transform_3, window_bounds = array<i64: 1, 16, 128>}, {pipeline_mode = #tpu.pipeline_mode<synchronous>, transform_indices = @transform_4, window_bounds = array<i64: 128, 128>}, {pipeline_mode = #tpu.pipeline_mode<synchronous>, transform_indices = @transform_5, window_bounds = array<i64: 1, 128>}, {transform_indices = @transform_6, window_bounds = array<i64: 1, 16, 128>}]} {
    %c0_i32 = arith.constant 0 : i32
    %0 = arith.cmpi eq, %arg2, %c0_i32 : i32
    %1 = arith.extui %0 : i1 to i32
    %c0_i32_0 = arith.constant 0 : i32
    %2 = arith.cmpi ne, %1, %c0_i32_0 : i32
    scf.if %2 {
      %cst_24 = arith.constant 0xFF800000 : f32
      %42 = vector.broadcast %cst_24 : f32 to vector<16x128xf32>
      %c0_25 = arith.constant 0 : index
      %c0_26 = arith.constant 0 : index
      %43 = vector.load %arg10[%c0_25, %c0_26] : memref<16x128xf32, #tpu.memory_space<vmem>>, vector<16x128xf32>
      tpu.vector_store %arg10[%c0_25, %c0_26], %42 {strides = array<i32>} : memref<16x128xf32, #tpu.memory_space<vmem>>, vector<16x128xf32>,
    } else {
    }
    %c16_i32 = arith.constant 16 : i32
    %3 = arith.muli %arg2, %c16_i32 : i32
    %4 = tpu.assume_multiple %3, 16 : i32
    %c0 = arith.constant 0 : index
    %c0_1 = arith.constant 0 : index
    %c0_2 = arith.constant 0 : index
    %5 = vector.load %arg3[%c0, %c0_1, %c0_2] : memref<1x16x5xf32, #tpu.memory_space<vmem>>, vector<1x16x5xf32>
    %6 = vector.shape_cast %5 : vector<1x16x5xf32> to vector<16x5xf32>
    %c0_3 = arith.constant 0 : index
    %7 = arith.index_cast %4 : i32 to index
    %c0_4 = arith.constant 0 : index
    %8 = vector.load %arg5[%c0_3, %7, %c0_4] : memref<1x16x5xf32, #tpu.memory_space<vmem>>, vector<1x16x5xf32>
    %9 = vector.shape_cast %8 : vector<1x16x5xf32> to vector<16x5xf32>
    %cst = arith.constant dense<0.000000e+00> : vector<16x16xf32>
    %10 = tpu.matmul %6, %9, %cst {dimension_numbers = #tpu.dot_dimension_numbers<[1], [1], [0], [0], [0, 0, 1, 0], [], []>} : vector<16x5xf32>, vector<16x5xf32>, vector<16x16xf32> -> vector<16x16xf32>
    %cst_5 = arith.constant 1.600000e-01 : f32
    %11 = vector.broadcast %cst_5 : f32 to vector<16x16xf32>
    %12 = arith.cmpf ole, %10, %11 : vector<16x16xf32>
    %cst_6 = arith.constant 0.000000e+00 : f32
    %cst_7 = arith.constant -1.000000e+30 : f32
    %13 = vector.broadcast %cst_6 : f32 to vector<16x16xf32>
    %14 = vector.broadcast %cst_7 : f32 to vector<16x16xf32>
    %15 = arith.select %12, %13, %14 : vector<16x16xi1>, vector<16x16xf32>
    %c0_8 = arith.constant 0 : index
    %16 = arith.index_cast %4 : i32 to index
    %c0_9 = arith.constant 0 : index
    %17 = vector.load %arg6[%c0_8, %16, %c0_9] : memref<1x16x128xbf16, #tpu.memory_space<vmem>>, vector<1x16x128xbf16>
    %18 = vector.shape_cast %17 : vector<1x16x128xbf16> to vector<16x128xbf16>
    %c0_10 = arith.constant 0 : index
    %c0_11 = arith.constant 0 : index
    %c0_12 = arith.constant 0 : index
    %19 = vector.load %arg4[%c0_10, %c0_11, %c0_12] : memref<1x16x128xbf16, #tpu.memory_space<vmem>>, vector<1x16x128xbf16>
    %20 = vector.shape_cast %19 : vector<1x16x128xbf16> to vector<16x128xbf16>
    %21 = vector.shape_cast %18 : vector<16x128xbf16> to vector<1x16x128xbf16>
    %22 = vector.shape_cast %20 : vector<16x128xbf16> to vector<16x1x128xbf16>
    %23 = vector.broadcast %21 : vector<1x16x128xbf16> to vector<16x16x128xbf16>
    %24 = vector.broadcast %22 : vector<16x1x128xbf16> to vector<16x16x128xbf16>
    %25 = arith.subf %23, %24 : vector<16x16x128xbf16>
    %cst_13 = arith.constant 0.000000e+00 : bf16
    %26 = vector.broadcast %cst_13 : bf16 to vector<16x16x128xbf16>
    %27 = arith.maximumf %25, %26 : vector<16x16x128xbf16>
    %28 = vector.shape_cast %27 : vector<16x16x128xbf16> to vector<256x128xbf16>
    %c0_14 = arith.constant 0 : index
    %c0_15 = arith.constant 0 : index
    %29 = vector.load %arg7[%c0_14, %c0_15] : memref<128x128xbf16, #tpu.memory_space<vmem>>, vector<128x128xbf16>
    %cst_16 = arith.constant dense<0.000000e+00> : vector<256x128xf32>
    %30 = tpu.matmul %28, %29, %cst_16 {dimension_numbers = #tpu.dot_dimension_numbers<[1], [0], [0], [1], [0, 0, 1, 1], [], []>} : vector<256x128xbf16>, vector<128x128xbf16>, vector<256x128xf32> -> vector<256x128xf32>
    %31 = vector.shape_cast %30 : vector<256x128xf32> to vector<16x16x128xf32>
    %32 = vector.shape_cast %15 : vector<16x16xf32> to vector<16x16x1xf32>
    %33 = vector.broadcast %32 : vector<16x16x1xf32> to vector<16x16x128xf32>
    %34 = arith.addf %31, %33 : vector<16x16x128xf32>
    %c0_17 = arith.constant 0 : index
    %c0_18 = arith.constant 0 : index
    %35 = vector.load %arg10[%c0_17, %c0_18] : memref<16x128xf32, #tpu.memory_space<vmem>>, vector<16x128xf32>
    %cst_19 = arith.constant dense<0xFF800000> : vector<16x128xf32>
    %36 = vector.multi_reduction <maximumf>, %34, %cst_19 [1] : vector<16x16x128xf32> to vector<16x128xf32>
    %37 = arith.maximumf %35, %36 : vector<16x128xf32>
    %c0_20 = arith.constant 0 : index
    %c0_21 = arith.constant 0 : index
    %38 = vector.load %arg10[%c0_20, %c0_21] : memref<16x128xf32, #tpu.memory_space<vmem>>, vector<16x128xf32>
    tpu.vector_store %arg10[%c0_20, %c0_21], %37 {strides = array<i32>} : memref<16x128xf32, #tpu.memory_space<vmem>>, vector<16x128xf32>,
    %c0_i32_22 = arith.constant 0 : i32
    %39 = arith.cmpi eq, %arg2, %c0_i32_22 : i32
    %40 = arith.extui %39 : i1 to i32
    %c0_i32_23 = arith.constant 0 : i32
    %41 = arith.cmpi ne, %40, %c0_i32_23 : i32
    scf.if %41 {
      %c0_24 = arith.constant 0 : index
      %c0_25 = arith.constant 0 : index
      %42 = vector.load %arg10[%c0_24, %c0_25] : memref<16x128xf32, #tpu.memory_space<vmem>>, vector<16x128xf32>
      %c0_26 = arith.constant 0 : index
      %c0_27 = arith.constant 0 : index
      %43 = vector.load %arg8[%c0_26, %c0_27] : memref<1x128xf32, #tpu.memory_space<vmem>>, vector<1x128xf32>
      %44 = vector.broadcast %43 : vector<1x128xf32> to vector<16x128xf32>
      %45 = arith.addf %42, %44 : vector<16x128xf32>
      %cst_28 = arith.constant 0.000000e+00 : f32
      %46 = vector.broadcast %cst_28 : f32 to vector<16x128xf32>
      %47 = arith.maximumf %45, %46 : vector<16x128xf32>
      %c0_29 = arith.constant 0 : index
      %c0_30 = arith.constant 0 : index
      %c0_31 = arith.constant 0 : index
      %48 = vector.load %arg9[%c0_29, %c0_30, %c0_31] : memref<1x16x128xf32, #tpu.memory_space<vmem>>, vector<1x16x128xf32>
      %49 = vector.shape_cast %48 : vector<1x16x128xf32> to vector<16x128xf32>
      %50 = vector.shape_cast %47 : vector<16x128xf32> to vector<1x16x128xf32>
      tpu.vector_store %arg9[%c0_29, %c0_30, %c0_31], %50 {strides = array<i32>} : memref<1x16x128xf32, #tpu.memory_space<vmem>>, vector<1x16x128xf32>,
    } else {
    }
    return
  }
  func.func @transform_0(%arg0: i32, %arg1: i32, %arg2: i32) -> (i32, i32, i32) {
    %c0_i32 = arith.constant 0 : i32
    %c0_i32_0 = arith.constant 0 : i32
    return %arg0, %arg1, %c0_i32 : i32, i32, i32
  }
  func.func @transform_1(%arg0: i32, %arg1: i32, %arg2: i32) -> (i32, i32, i32) {
    %c0_i32 = arith.constant 0 : i32
    %c0_i32_0 = arith.constant 0 : i32
    return %arg0, %arg1, %c0_i32 : i32, i32, i32
  }
  func.func @transform_2(%arg0: i32, %arg1: i32, %arg2: i32) -> (i32, i32, i32) {
    %c0_i32 = arith.constant 0 : i32
    %c0_i32_0 = arith.constant 0 : i32
    %c0_i32_1 = arith.constant 0 : i32
    return %arg0, %c0_i32, %c0_i32_0 : i32, i32, i32
  }
  func.func @transform_3(%arg0: i32, %arg1: i32, %arg2: i32) -> (i32, i32, i32) {
    %c0_i32 = arith.constant 0 : i32
    %c0_i32_0 = arith.constant 0 : i32
    %c0_i32_1 = arith.constant 0 : i32
    return %arg0, %c0_i32, %c0_i32_0 : i32, i32, i32
  }
  func.func @transform_4(%arg0: i32, %arg1: i32, %arg2: i32) -> (i32, i32) {
    %c0_i32 = arith.constant 0 : i32
    %c0_i32_0 = arith.constant 0 : i32
    %c0_i32_1 = arith.constant 0 : i32
    return %c0_i32, %c0_i32_0 : i32, i32
  }
  func.func @transform_5(%arg0: i32, %arg1: i32, %arg2: i32) -> (i32, i32) {
    %c0_i32 = arith.constant 0 : i32
    %c0_i32_0 = arith.constant 0 : i32
    %c0_i32_1 = arith.constant 0 : i32
    return %c0_i32, %c0_i32_0 : i32, i32
  }
  func.func @transform_6(%arg0: i32, %arg1: i32, %arg2: i32) -> (i32, i32, i32) {
    %c0_i32 = arith.constant 0 : i32
    %c0_i32_0 = arith.constant 0 : i32
    return %arg0, %arg1, %c0_i32 : i32, i32, i32
  }
}

module attributes {stable_mosaic.version = 11 : i64} {
  func.func @kernel(%arg0: i32, %arg1: i32, %arg2: i32, %arg3: memref<1x4x5xf32, #tpu.memory_space<vmem>>, %arg4: memref<1x4x256xbf16, #tpu.memory_space<vmem>>, %arg5: memref<1x4x5xf32, #tpu.memory_space<vmem>>, %arg6: memref<1x4x256xbf16, #tpu.memory_space<vmem>>, %arg7: memref<256x256xbf16, #tpu.memory_space<vmem>>, %arg8: memref<1x256xf32, #tpu.memory_space<vmem>>, %arg9: memref<1x4x256xf32, #tpu.memory_space<vmem>>, %arg10: memref<4x256xf32, #tpu.memory_space<vmem>>) attributes {dimension_semantics = [#tpu.dimension_semantics<parallel>, #tpu.dimension_semantics<parallel>, #tpu.dimension_semantics<arbitrary>], iteration_bounds = array<i64: 2, 1, 1>, scalar_prefetch = 0 : i64, scratch_operands = 1 : i64, tpu.core_type = #tpu.core_type<tc>, window_params = [{transform_indices = @transform_0, window_bounds = array<i64: 1, 4, 5>}, {transform_indices = @transform_1, window_bounds = array<i64: 1, 4, 256>}, {transform_indices = @transform_2, window_bounds = array<i64: 1, 4, 5>}, {transform_indices = @transform_3, window_bounds = array<i64: 1, 4, 256>}, {pipeline_mode = #tpu.pipeline_mode<synchronous>, transform_indices = @transform_4, window_bounds = array<i64: 256, 256>}, {pipeline_mode = #tpu.pipeline_mode<synchronous>, transform_indices = @transform_5, window_bounds = array<i64: 1, 256>}, {transform_indices = @transform_6, window_bounds = array<i64: 1, 4, 256>}]} {
    %c0_i32 = arith.constant 0 : i32
    %0 = arith.cmpi eq, %arg2, %c0_i32 : i32
    %1 = arith.extui %0 : i1 to i32
    %c0_i32_0 = arith.constant 0 : i32
    %2 = arith.cmpi ne, %1, %c0_i32_0 : i32
    scf.if %2 {
      %cst_24 = arith.constant 0xFF800000 : f32
      %41 = vector.broadcast %cst_24 : f32 to vector<4x256xf32>
      %c0_25 = arith.constant 0 : index
      %c0_26 = arith.constant 0 : index
      %42 = vector.load %arg10[%c0_25, %c0_26] : memref<4x256xf32, #tpu.memory_space<vmem>>, vector<4x256xf32>
      tpu.vector_store %arg10[%c0_25, %c0_26], %41 {strides = array<i32>} : memref<4x256xf32, #tpu.memory_space<vmem>>, vector<4x256xf32>,
    } else {
    }
    %c4_i32 = arith.constant 4 : i32
    %3 = arith.muli %arg2, %c4_i32 : i32
    %c0 = arith.constant 0 : index
    %c0_1 = arith.constant 0 : index
    %c0_2 = arith.constant 0 : index
    %4 = vector.load %arg3[%c0, %c0_1, %c0_2] : memref<1x4x5xf32, #tpu.memory_space<vmem>>, vector<1x4x5xf32>
    %5 = vector.shape_cast %4 : vector<1x4x5xf32> to vector<4x5xf32>
    %c0_3 = arith.constant 0 : index
    %6 = arith.index_cast %3 : i32 to index
    %c0_4 = arith.constant 0 : index
    %7 = vector.load %arg5[%c0_3, %6, %c0_4] : memref<1x4x5xf32, #tpu.memory_space<vmem>>, vector<1x4x5xf32>
    %8 = vector.shape_cast %7 : vector<1x4x5xf32> to vector<4x5xf32>
    %cst = arith.constant dense<0.000000e+00> : vector<4x4xf32>
    %9 = tpu.matmul %5, %8, %cst {dimension_numbers = #tpu.dot_dimension_numbers<[1], [1], [0], [0], [0, 0, 1, 0], [], []>} : vector<4x5xf32>, vector<4x5xf32>, vector<4x4xf32> -> vector<4x4xf32>
    %cst_5 = arith.constant 1.000000e+00 : f32
    %10 = vector.broadcast %cst_5 : f32 to vector<4x4xf32>
    %11 = arith.cmpf ole, %9, %10 : vector<4x4xf32>
    %cst_6 = arith.constant 0.000000e+00 : f32
    %cst_7 = arith.constant -1.000000e+30 : f32
    %12 = vector.broadcast %cst_6 : f32 to vector<4x4xf32>
    %13 = vector.broadcast %cst_7 : f32 to vector<4x4xf32>
    %14 = arith.select %11, %12, %13 : vector<4x4xi1>, vector<4x4xf32>
    %c0_8 = arith.constant 0 : index
    %15 = arith.index_cast %3 : i32 to index
    %c0_9 = arith.constant 0 : index
    %16 = vector.load %arg6[%c0_8, %15, %c0_9] : memref<1x4x256xbf16, #tpu.memory_space<vmem>>, vector<1x4x256xbf16>
    %17 = vector.shape_cast %16 : vector<1x4x256xbf16> to vector<4x256xbf16>
    %c0_10 = arith.constant 0 : index
    %c0_11 = arith.constant 0 : index
    %c0_12 = arith.constant 0 : index
    %18 = vector.load %arg4[%c0_10, %c0_11, %c0_12] : memref<1x4x256xbf16, #tpu.memory_space<vmem>>, vector<1x4x256xbf16>
    %19 = vector.shape_cast %18 : vector<1x4x256xbf16> to vector<4x256xbf16>
    %20 = vector.shape_cast %17 : vector<4x256xbf16> to vector<1x4x256xbf16>
    %21 = vector.shape_cast %19 : vector<4x256xbf16> to vector<4x1x256xbf16>
    %22 = vector.broadcast %20 : vector<1x4x256xbf16> to vector<4x4x256xbf16>
    %23 = vector.broadcast %21 : vector<4x1x256xbf16> to vector<4x4x256xbf16>
    %24 = arith.subf %22, %23 : vector<4x4x256xbf16>
    %cst_13 = arith.constant 0.000000e+00 : bf16
    %25 = vector.broadcast %cst_13 : bf16 to vector<4x4x256xbf16>
    %26 = arith.maximumf %24, %25 : vector<4x4x256xbf16>
    %27 = vector.shape_cast %26 : vector<4x4x256xbf16> to vector<16x256xbf16>
    %c0_14 = arith.constant 0 : index
    %c0_15 = arith.constant 0 : index
    %28 = vector.load %arg7[%c0_14, %c0_15] : memref<256x256xbf16, #tpu.memory_space<vmem>>, vector<256x256xbf16>
    %cst_16 = arith.constant dense<0.000000e+00> : vector<16x256xf32>
    %29 = tpu.matmul %27, %28, %cst_16 {dimension_numbers = #tpu.dot_dimension_numbers<[1], [0], [0], [1], [0, 0, 1, 1], [], []>} : vector<16x256xbf16>, vector<256x256xbf16>, vector<16x256xf32> -> vector<16x256xf32>
    %30 = vector.shape_cast %29 : vector<16x256xf32> to vector<4x4x256xf32>
    %31 = vector.shape_cast %14 : vector<4x4xf32> to vector<4x4x1xf32>
    %32 = vector.broadcast %31 : vector<4x4x1xf32> to vector<4x4x256xf32>
    %33 = arith.addf %30, %32 : vector<4x4x256xf32>
    %c0_17 = arith.constant 0 : index
    %c0_18 = arith.constant 0 : index
    %34 = vector.load %arg10[%c0_17, %c0_18] : memref<4x256xf32, #tpu.memory_space<vmem>>, vector<4x256xf32>
    %cst_19 = arith.constant dense<0xFF800000> : vector<4x256xf32>
    %35 = vector.multi_reduction <maximumf>, %33, %cst_19 [1] : vector<4x4x256xf32> to vector<4x256xf32>
    %36 = arith.maximumf %34, %35 : vector<4x256xf32>
    %c0_20 = arith.constant 0 : index
    %c0_21 = arith.constant 0 : index
    %37 = vector.load %arg10[%c0_20, %c0_21] : memref<4x256xf32, #tpu.memory_space<vmem>>, vector<4x256xf32>
    tpu.vector_store %arg10[%c0_20, %c0_21], %36 {strides = array<i32>} : memref<4x256xf32, #tpu.memory_space<vmem>>, vector<4x256xf32>,
    %c0_i32_22 = arith.constant 0 : i32
    %38 = arith.cmpi eq, %arg2, %c0_i32_22 : i32
    %39 = arith.extui %38 : i1 to i32
    %c0_i32_23 = arith.constant 0 : i32
    %40 = arith.cmpi ne, %39, %c0_i32_23 : i32
    scf.if %40 {
      %c0_24 = arith.constant 0 : index
      %c0_25 = arith.constant 0 : index
      %41 = vector.load %arg10[%c0_24, %c0_25] : memref<4x256xf32, #tpu.memory_space<vmem>>, vector<4x256xf32>
      %c0_26 = arith.constant 0 : index
      %c0_27 = arith.constant 0 : index
      %42 = vector.load %arg8[%c0_26, %c0_27] : memref<1x256xf32, #tpu.memory_space<vmem>>, vector<1x256xf32>
      %43 = vector.broadcast %42 : vector<1x256xf32> to vector<4x256xf32>
      %44 = arith.addf %41, %43 : vector<4x256xf32>
      %cst_28 = arith.constant 0.000000e+00 : f32
      %45 = vector.broadcast %cst_28 : f32 to vector<4x256xf32>
      %46 = arith.maximumf %44, %45 : vector<4x256xf32>
      %c0_29 = arith.constant 0 : index
      %c0_30 = arith.constant 0 : index
      %c0_31 = arith.constant 0 : index
      %47 = vector.load %arg9[%c0_29, %c0_30, %c0_31] : memref<1x4x256xf32, #tpu.memory_space<vmem>>, vector<1x4x256xf32>
      %48 = vector.shape_cast %47 : vector<1x4x256xf32> to vector<4x256xf32>
      %49 = vector.shape_cast %46 : vector<4x256xf32> to vector<1x4x256xf32>
      tpu.vector_store %arg9[%c0_29, %c0_30, %c0_31], %49 {strides = array<i32>} : memref<1x4x256xf32, #tpu.memory_space<vmem>>, vector<1x4x256xf32>,
    } else {
    }
    return
  }
  func.func @transform_0(%arg0: i32, %arg1: i32, %arg2: i32) -> (i32, i32, i32) {
    %c0_i32 = arith.constant 0 : i32
    %c0_i32_0 = arith.constant 0 : i32
    return %arg0, %arg1, %c0_i32 : i32, i32, i32
  }
  func.func @transform_1(%arg0: i32, %arg1: i32, %arg2: i32) -> (i32, i32, i32) {
    %c0_i32 = arith.constant 0 : i32
    %c0_i32_0 = arith.constant 0 : i32
    return %arg0, %arg1, %c0_i32 : i32, i32, i32
  }
  func.func @transform_2(%arg0: i32, %arg1: i32, %arg2: i32) -> (i32, i32, i32) {
    %c0_i32 = arith.constant 0 : i32
    %c0_i32_0 = arith.constant 0 : i32
    %c0_i32_1 = arith.constant 0 : i32
    return %arg0, %c0_i32, %c0_i32_0 : i32, i32, i32
  }
  func.func @transform_3(%arg0: i32, %arg1: i32, %arg2: i32) -> (i32, i32, i32) {
    %c0_i32 = arith.constant 0 : i32
    %c0_i32_0 = arith.constant 0 : i32
    %c0_i32_1 = arith.constant 0 : i32
    return %arg0, %c0_i32, %c0_i32_0 : i32, i32, i32
  }
  func.func @transform_4(%arg0: i32, %arg1: i32, %arg2: i32) -> (i32, i32) {
    %c0_i32 = arith.constant 0 : i32
    %c0_i32_0 = arith.constant 0 : i32
    %c0_i32_1 = arith.constant 0 : i32
    return %c0_i32, %c0_i32_0 : i32, i32
  }
  func.func @transform_5(%arg0: i32, %arg1: i32, %arg2: i32) -> (i32, i32) {
    %c0_i32 = arith.constant 0 : i32
    %c0_i32_0 = arith.constant 0 : i32
    %c0_i32_1 = arith.constant 0 : i32
    return %c0_i32, %c0_i32_0 : i32, i32
  }
  func.func @transform_6(%arg0: i32, %arg1: i32, %arg2: i32) -> (i32, i32, i32) {
    %c0_i32 = arith.constant 0 : i32
    %c0_i32_0 = arith.constant 0 : i32
    return %arg0, %arg1, %c0_i32 : i32, i32, i32
  }
}

module attributes {stable_mosaic.version = 11 : i64} {
  func.func @_head_kernel(%arg0: i32, %arg1: memref<2x4x256xf32, #tpu.memory_space<vmem>>, %arg2: memref<256x256xf32, #tpu.memory_space<vmem>>, %arg3: memref<1x256xf32, #tpu.memory_space<vmem>>, %arg4: memref<256x256xf32, #tpu.memory_space<vmem>>, %arg5: memref<1x256xf32, #tpu.memory_space<vmem>>, %arg6: memref<256x10xf32, #tpu.memory_space<vmem>>, %arg7: memref<1x10xf32, #tpu.memory_space<vmem>>, %arg8: memref<2x10xf32, #tpu.memory_space<vmem>>) attributes {dimension_semantics = [#tpu.dimension_semantics<arbitrary>], iteration_bounds = array<i64: 1>, scalar_prefetch = 0 : i64, scratch_operands = 0 : i64, tpu.core_type = #tpu.core_type<tc>, window_params = [{pipeline_mode = #tpu.pipeline_mode<synchronous>, transform_indices = @transform_0, window_bounds = array<i64: 2, 4, 256>}, {pipeline_mode = #tpu.pipeline_mode<synchronous>, transform_indices = @transform_1, window_bounds = array<i64: 256, 256>}, {pipeline_mode = #tpu.pipeline_mode<synchronous>, transform_indices = @transform_2, window_bounds = array<i64: 1, 256>}, {pipeline_mode = #tpu.pipeline_mode<synchronous>, transform_indices = @transform_3, window_bounds = array<i64: 256, 256>}, {pipeline_mode = #tpu.pipeline_mode<synchronous>, transform_indices = @transform_4, window_bounds = array<i64: 1, 256>}, {pipeline_mode = #tpu.pipeline_mode<synchronous>, transform_indices = @transform_5, window_bounds = array<i64: 256, 10>}, {pipeline_mode = #tpu.pipeline_mode<synchronous>, transform_indices = @transform_6, window_bounds = array<i64: 1, 10>}, {pipeline_mode = #tpu.pipeline_mode<synchronous>, transform_indices = @transform_7, window_bounds = array<i64: 2, 10>}]} {
    %c0 = arith.constant 0 : index
    %c0_0 = arith.constant 0 : index
    %c0_1 = arith.constant 0 : index
    %0 = vector.load %arg1[%c0, %c0_0, %c0_1] : memref<2x4x256xf32, #tpu.memory_space<vmem>>, vector<2x4x256xf32>
    %cst = arith.constant dense<0xFF800000> : vector<2x256xf32>
    %1 = vector.multi_reduction <maximumf>, %0, %cst [1] : vector<2x4x256xf32> to vector<2x256xf32>
    %c0_2 = arith.constant 0 : index
    %c0_3 = arith.constant 0 : index
    %2 = vector.load %arg2[%c0_2, %c0_3] : memref<256x256xf32, #tpu.memory_space<vmem>>, vector<256x256xf32>
    %cst_4 = arith.constant dense<0.000000e+00> : vector<2x256xf32>
    %3 = tpu.matmul %1, %2, %cst_4 {dimension_numbers = #tpu.dot_dimension_numbers<[1], [0], [0], [1], [0, 0, 1, 1], [], []>} : vector<2x256xf32>, vector<256x256xf32>, vector<2x256xf32> -> vector<2x256xf32>
    %c0_5 = arith.constant 0 : index
    %c0_6 = arith.constant 0 : index
    %4 = vector.load %arg3[%c0_5, %c0_6] : memref<1x256xf32, #tpu.memory_space<vmem>>, vector<1x256xf32>
    %5 = vector.broadcast %4 : vector<1x256xf32> to vector<2x256xf32>
    %6 = arith.addf %3, %5 : vector<2x256xf32>
    %cst_7 = arith.constant 0.000000e+00 : f32
    %7 = vector.broadcast %cst_7 : f32 to vector<2x256xf32>
    %8 = arith.maximumf %6, %7 : vector<2x256xf32>
    %c0_8 = arith.constant 0 : index
    %c0_9 = arith.constant 0 : index
    %9 = vector.load %arg4[%c0_8, %c0_9] : memref<256x256xf32, #tpu.memory_space<vmem>>, vector<256x256xf32>
    %cst_10 = arith.constant dense<0.000000e+00> : vector<2x256xf32>
    %10 = tpu.matmul %8, %9, %cst_10 {dimension_numbers = #tpu.dot_dimension_numbers<[1], [0], [0], [1], [0, 0, 1, 1], [], []>} : vector<2x256xf32>, vector<256x256xf32>, vector<2x256xf32> -> vector<2x256xf32>
    %c0_11 = arith.constant 0 : index
    %c0_12 = arith.constant 0 : index
    %11 = vector.load %arg5[%c0_11, %c0_12] : memref<1x256xf32, #tpu.memory_space<vmem>>, vector<1x256xf32>
    %12 = vector.broadcast %11 : vector<1x256xf32> to vector<2x256xf32>
    %13 = arith.addf %10, %12 : vector<2x256xf32>
    %cst_13 = arith.constant 0.000000e+00 : f32
    %14 = vector.broadcast %cst_13 : f32 to vector<2x256xf32>
    %15 = arith.maximumf %13, %14 : vector<2x256xf32>
    %c0_14 = arith.constant 0 : index
    %c0_15 = arith.constant 0 : index
    %16 = vector.load %arg6[%c0_14, %c0_15] : memref<256x10xf32, #tpu.memory_space<vmem>>, vector<256x10xf32>
    %cst_16 = arith.constant dense<0.000000e+00> : vector<2x10xf32>
    %17 = tpu.matmul %15, %16, %cst_16 {dimension_numbers = #tpu.dot_dimension_numbers<[1], [0], [0], [1], [0, 0, 1, 1], [], []>} : vector<2x256xf32>, vector<256x10xf32>, vector<2x10xf32> -> vector<2x10xf32>
    %c0_17 = arith.constant 0 : index
    %c0_18 = arith.constant 0 : index
    %18 = vector.load %arg7[%c0_17, %c0_18] : memref<1x10xf32, #tpu.memory_space<vmem>>, vector<1x10xf32>
    %19 = vector.broadcast %18 : vector<1x10xf32> to vector<2x10xf32>
    %20 = arith.addf %17, %19 : vector<2x10xf32>
    %cst_19 = arith.constant dense<0xFF800000> : vector<2xf32>
    %21 = vector.multi_reduction <maximumf>, %20, %cst_19 [1] : vector<2x10xf32> to vector<2xf32>
    %22 = vector.shape_cast %21 : vector<2xf32> to vector<2x1xf32>
    %23 = vector.broadcast %22 : vector<2x1xf32> to vector<2x10xf32>
    %24 = arith.subf %20, %23 : vector<2x10xf32>
    %25 = math.exp %24 : vector<2x10xf32>
    %cst_20 = arith.constant dense<0.000000e+00> : vector<2xf32>
    %26 = vector.multi_reduction <add>, %25, %cst_20 [1] : vector<2x10xf32> to vector<2xf32>
    %27 = vector.shape_cast %26 : vector<2xf32> to vector<2x1xf32>
    %28 = math.log %27 : vector<2x1xf32>
    %29 = vector.broadcast %28 : vector<2x1xf32> to vector<2x10xf32>
    %30 = arith.subf %24, %29 : vector<2x10xf32>
    %c0_21 = arith.constant 0 : index
    %c0_22 = arith.constant 0 : index
    %31 = vector.load %arg8[%c0_21, %c0_22] : memref<2x10xf32, #tpu.memory_space<vmem>>, vector<2x10xf32>
    tpu.vector_store %arg8[%c0_21, %c0_22], %30 {strides = array<i32>} : memref<2x10xf32, #tpu.memory_space<vmem>>, vector<2x10xf32>,
    return
  }
  func.func @transform_0(%arg0: i32) -> (i32, i32, i32) {
    %c0_i32 = arith.constant 0 : i32
    %c0_i32_0 = arith.constant 0 : i32
    %c0_i32_1 = arith.constant 0 : i32
    %c0_i32_2 = arith.constant 0 : i32
    return %c0_i32, %c0_i32_0, %c0_i32_1 : i32, i32, i32
  }
  func.func @transform_1(%arg0: i32) -> (i32, i32) {
    %c0_i32 = arith.constant 0 : i32
    %c0_i32_0 = arith.constant 0 : i32
    %c0_i32_1 = arith.constant 0 : i32
    return %c0_i32, %c0_i32_0 : i32, i32
  }
  func.func @transform_2(%arg0: i32) -> (i32, i32) {
    %c0_i32 = arith.constant 0 : i32
    %c0_i32_0 = arith.constant 0 : i32
    %c0_i32_1 = arith.constant 0 : i32
    return %c0_i32, %c0_i32_0 : i32, i32
  }
  func.func @transform_3(%arg0: i32) -> (i32, i32) {
    %c0_i32 = arith.constant 0 : i32
    %c0_i32_0 = arith.constant 0 : i32
    %c0_i32_1 = arith.constant 0 : i32
    return %c0_i32, %c0_i32_0 : i32, i32
  }
  func.func @transform_4(%arg0: i32) -> (i32, i32) {
    %c0_i32 = arith.constant 0 : i32
    %c0_i32_0 = arith.constant 0 : i32
    %c0_i32_1 = arith.constant 0 : i32
    return %c0_i32, %c0_i32_0 : i32, i32
  }
  func.func @transform_5(%arg0: i32) -> (i32, i32) {
    %c0_i32 = arith.constant 0 : i32
    %c0_i32_0 = arith.constant 0 : i32
    %c0_i32_1 = arith.constant 0 : i32
    return %c0_i32, %c0_i32_0 : i32, i32
  }
  func.func @transform_6(%arg0: i32) -> (i32, i32) {
    %c0_i32 = arith.constant 0 : i32
    %c0_i32_0 = arith.constant 0 : i32
    %c0_i32_1 = arith.constant 0 : i32
    return %c0_i32, %c0_i32_0 : i32, i32
  }
  func.func @transform_7(%arg0: i32) -> (i32, i32) {
    %c0_i32 = arith.constant 0 : i32
    %c0_i32_0 = arith.constant 0 : i32
    %c0_i32_1 = arith.constant 0 : i32
    return %c0_i32, %c0_i32_0 : i32, i32
  }
}

</mosaic_0001>

<bundles_post_ra>
// kernel: custom-call.12
= control target key start
LH: loop header
LB: loop body
LE: loop exit
PB: predicated region body
PF: predicated region fallthrough
CT: control target
= control target key end

     0   :  { %s6_s0 = inlined_call_operand.vmem [shape: f32[2,32], index: 0, kind: output, shape index: {}]  }

// kernel: custom-call.13
= control target key start
LH: loop header
LB: loop body
LE: loop exit
PB: predicated region body
PF: predicated region fallthrough
CT: control target
= control target key end

     0   :  { %s6_s0 = inlined_call_operand.vmem [shape: f32[2,16], index: 0, kind: output, shape index: {}]  }

// kernel: forward.5
= control target key start
LH: loop header
LB: loop body
LE: loop exit
PB: predicated region body
PF: predicated region fallthrough
CT: control target
= control target key end

     0   :  { %s1992_s21 = smov 0   ;;  %s1994_s22 = smov 0   ;;  %s2405_s0 = inlined_call_operand.vmem [shape: f32[2,16,5], index: 0, kind: input, shape index: {}]   ;;  %s2406_s1 = inlined_call_operand.vmem [shape: bf16[2,16,128], index: 1, kind: input, shape index: {}]   ;;  %s2407_s2 = inlined_call_operand.vmem [shape: f32[2,16,5], index: 2, kind: input, shape index: {}]   ;;  %s2408_s3 = inlined_call_operand.vmem [shape: bf16[2,16,128], index: 3, kind: input, shape index: {}]   ;;  %s2409_s4 = inlined_call_operand.vmem [shape: bf16[128,128], index: 4, kind: input, shape index: {}]   ;;  %s2410_s5 = inlined_call_operand.vmem [shape: f32[1,128], index: 5, kind: input, shape index: {}]   ;;  %s2411_s6 = inlined_call_operand.vmem [shape: f32[2,16,128], index: 6, kind: output, shape index: {}]  }
   0x1   :  { %s1996_s23 = smov 0  }
   0x2 LB: > { %s35_s24 = sadd.s32 1, %s1948_s22  ;;  %p1717_p0 = scmp.ge.s32.totalorder %s1952_s23, 1  ;;  %s1952_s23 = sphi %s1996_s23, %s16_s23   ;;  %s1948_s22 = sphi %s1994_s22, %s2415_s22   ;;  %s1944_s21 = sphi %s1992_s21, %s2414_s21  }
   0x3   : > { %p37_p1 = scmp.ge.s32.totalorder %s35_s24, 2  ;;  %p277_p2 = scmp.lt.s32.totalorder %s1952_s23, 3 }
   0x5   : > { %s2417_s24 = smov (%p37_p1, %s35_s24), 0  ;;  %p278_p3 = pnand %p1717_p0, %p277_p2 }
   0x6   : > { %p335_p4 = scmp.lt.s32.totalorder (!%p278_p3), %s1944_s21, 1  ;;  %v500_v0 = vlaneseq (!%p278_p3)  ;;  %vm387_vm0 = vcmask (!%p278_p3), 39936   ;;  %v1954_v1 = vmov (!%p278_p3), 1966171168   ;;  %v2013_v3 = vld [vmem:[%s2409_s4] sm:$0xff] (!%p278_p3)   ;;  %v2023_v6 = vld [vmem:[%s2409_s4 + $0x8] sm:$0xff] (!%p278_p3)  }
   0x7   : > { %281 = sbr.rel (%p278_p3) target bundleno = 442 (0x1ba), region = 44  ;;  %v498_v2 = vunpack.c.l.s4 (!%p278_p3), %v1954_v1  ;;  %1879 = vmatprep.subr.bf16.mxu1 (!%p278_p3), %v2013_v3  ;;  %vm2031_vm1 = vmpackc.low (!%p278_p3), %vm387_vm0, %vm387_vm0  ;;  %v2050_v9 = vld [vmem:[%s2409_s4 + $0x10] sm:$0xff] (!%p278_p3)   ;;  %v2065_v20 = vld [vmem:[%s2409_s4 + $0x18] sm:$0xff] (!%p278_p3)   ;;  %vm1532_vm4 = vcmask (!%p278_p3), 1041409   ;;  %vm1534_vm5 = vcmask (!%p278_p3), 1042434   ;;  %vm1536_vm6 = vcmask (!%p278_p3), 1043459  }
   0x8   : > { %v2017_v4 = vshrl.u32 (!%p278_p3), %v500_v0, 7  ;;  %1887 = vmatpush3.bf16.msra.mxu1 (!%p278_p3), %v2013_v3  ;;  %v2087_v28 = vld [vmem:[%s2409_s4 + $0x20] sm:$0xff] (!%p278_p3)   ;;  %v2113_v46 = vld [vmem:[%s2409_s4 + $0x28] sm:$0xff] (!%p278_p3)   ;;  %v2132_v62 = vld [vmem:[%s2409_s4 + $0x30] sm:$0xff] (!%p278_p3)   ;;  %vm1538_vm7 = vcmask (!%p278_p3), 1044484   ;;  %vm1540_vm8 = vcmask (!%p278_p3), 1045509  }
   0x9   : > { %v499_v5 = vunpack.c.0.s8 (!%p278_p3), %v498_v2  ;;  %1880 = vmatprep.subr.bf16.mxu1 (!%p278_p3), %v2023_v6  ;;  %vm1542_vm9 = vcmask (!%p278_p3), 1046534   ;;  %vm1544_vm10 = vcmask (!%p278_p3), 1047559  }
   0xa   : > { %v2073_v22 = vsub.s32 (!%p278_p3), 0, %v2017_v4 }
   0xb   : > { %v502_v8 = vsub.s32 (!%p278_p3), %v499_v5, %v2017_v4 }
   0xc   : > { %1888 = vmatpush3.bf16.msra.mxu1 (!%p278_p3), %v2023_v6 }
   0xd   : > { %1881 = vmatprep.subr.bf16.mxu1 (!%p278_p3), %v2050_v9 }
   0xe   : > { %s2419_s21 = smov (!%p335_p4, %s1944_s21), 1 }
   0xf   : > { %s2026_s29 = sshll.u32 %s2419_s21, 4  ;;  %s1786_s30 = sshll.u32 %s2419_s21, 3 }
  0x10   : > { %s352_s9 = scalar_lea.vmem %s2406_s1, %s1786_s30  ;;  %s358_s12 = scalar_lea.vmem %s2407_s2, %s2026_s29  ;;  %1889 = vmatpush3.bf16.msra.mxu1 %v2050_v9 }
  0x11   : > { %v385_v10 = vld [vmem:[%s358_s12] sm:$0xff]  ;;  %v386_v11 = vld [vmem:[%s358_s12 + $0x8] sm:$0xff]  ;;  %s342_s17 = scalar_lea.vmem %s2405_s0, %s2026_s29  ;;  %1882 = vmatprep.subr.bf16.mxu1 %v2065_v20  ;;  %s363_s28 = scalar_lea.vmem %s2408_s3, %s1786_s30 }
  0x12   : > { %v1732_v12 = vld.sshfl [vmem:[%s352_s9] sm:$0x33 pattern:$0x75316420]  ;;  %v1873_v13 = vpack.c.bf16 %v386_v11, %v385_v10  ;;  %v383_v33 = vld [vmem:[%s342_s17 + $0x8] sm:$0xff]  ;;  %s372_s15 = scalar_lea.vmem %s2411_s6, %s2026_s29 }
  0x13   : > { %v496_v14 = vcombine.high %v1732_v12, %v1732_v12  ;;  %v1733_v15 = vld.sshfl [vmem:[%s352_s9 + $0x4] sm:$0x33 pattern:$0x75316420]  ;;  %v2078_v25 = vrot.slane %v1732_v12, %v502_v8  ;;  %v2121_v56 = vld [vmem:[%s363_s28] sm:$0xf] }
  0x14   : > { %v382_v16 = vld [vmem:[%s342_s17] sm:$0xff]  ;;  %1875 = vmatprep.subr.msk.bf16.mxu0 %vm2031_vm1, %v1873_v13  ;;  %v520_v18 = vcombine.high %v1733_v15, %v1733_v15  ;;  %v527_v19 = vrot.slane %v1733_v15, %v502_v8  ;;  %1890 = vmatpush3.bf16.msra.mxu1 %v2065_v20 }
  0x15   : > { %v2059_v17 = vrot.slane %v496_v14, %v502_v8  ;;  %1822 = vmatprep.mubr.msk.f32.mxu0 %vm387_vm0, %v382_v16  ;;  %1878 = vmatpush3.bf16.xpose.msk.msra.mxu0 %vm2031_vm1, %v1873_v13  ;;  %v1734_v44 = vpack.i.b16 %v2078_v25, %v2078_v25  ;;  %v538_v45 = vunpack.i.h.s16 %v2078_v25  ;;  %v2123_v57 = vld [vmem:[%s363_s28 + $0x4] sm:$0xf]  ;;  %v2153_v16 = vld [vmem:[%s2409_s4 + $0x38] sm:$0xff]  }
  0x16   : > { %v2070_v21 = vrot.slane %v520_v18, %v502_v8  ;;  %1825 = vmatprep.subr.bf16.mxu0 %v2013_v3  ;;  %v1738_v24 = vpack.i.b16 %v527_v19, %v527_v19  ;;  %v546_v26 = vunpack.i.h.s16 %v527_v19  ;;  %v2081_v27 = vcombine.high %v527_v19, %v527_v19  ;;  %1883 = vmatprep.subr.bf16.mxu1 %v2087_v28 }
  0x17   : > { %v512_v23 = vcombine.high %v2059_v17, %v2059_v17  ;;  %v554_v61 = vpack.i.b16 %v538_v45, %v538_v45  ;;  %v2136_v1 = vrot.slane %v1734_v44, %v2073_v22  ;;  %v1955_v18 = vmov 0  }
  0x18   : > { %v604_v31 = vrot.slane %v1738_v24, %v2073_v22  ;;  %v1739_v32 = vpack.i.b16 %v2070_v21, %v2070_v21  ;;  %v562_v34 = vpack.i.b16 %v546_v26, %v546_v26  ;;  %v548_v35 = vunpack.i.h.s16 %v2070_v21  ;;  %1891 = vmatpush3.bf16.msra.mxu1 %v2087_v28 }
  0x19   : > { %v544_v29 = vunpack.i.h.s16 %v512_v23  ;;  %v1737_v30 = vpack.i.b16 %v512_v23, %v512_v23  ;;  %v1740_v36 = vpack.i.b16 %v2081_v27, %v2081_v27  ;;  %1884 = vmatprep.subr.bf16.mxu1 %v2113_v46  ;;  %v550_v7 = vunpack.i.h.s16 %v2081_v27 }
  0x1a   : > { %v690_v39 = vpack.i.b16 %v604_v31, %v604_v31  ;;  %v612_v40 = vrot.slane %v1739_v32, %v2073_v22  ;;  %v608_v41 = vrot.slane %v562_v34, %v2073_v22  ;;  %v564_v42 = vpack.i.b16 %v548_v35, %v548_v35 }
  0x1b   : > { %v596_v37 = vrot.slane %v1737_v30, %v2073_v22  ;;  %v560_v38 = vpack.i.b16 %v544_v29, %v544_v29  ;;  %v620_v43 = vrot.slane %v1740_v36, %v2073_v22  ;;  %v566_v30 = vpack.i.b16 %v550_v7, %v550_v7 }
  0x1c   : > { %1823 = vmatmul.mubr.msk.f32.vlgmr.msra.gmra.mrb[0].mxu0 %vm387_vm0, %v383_v33  ;;  %v695_v49 = vrot.slane %v690_v39, %v2073_v22  ;;  %v697_v50 = vpack.i.b16 %v608_v41, %v608_v41  ;;  %v704_v51 = vpack.i.b16 %v612_v40, %v612_v40  ;;  %v616_v52 = vrot.slane %v564_v42, %v2073_v22 }
  0x1d   : > { %v676_v47 = vpack.i.b16 %v596_v37, %v596_v37  ;;  %v600_v48 = vrot.slane %v560_v38, %v2073_v22  ;;  %1826 = vmatpush3.bf16.msra.mxu0 %v2013_v3  ;;  %v718_v55 = vpack.i.b16 %v620_v43, %v620_v43  ;;  %1892 = vmatpush3.bf16.msra.mxu1 %v2113_v46  ;;  %v540_v44 = vunpack.i.h.s16 %v2059_v17 }
  0x1e   : > { %1827 = vmatprep.subr.bf16.mxu0 %v2023_v6  ;;  %v1750_v58 = vcombine.low %v695_v49, %v695_v49  ;;  %v702_v59 = vrot.slane %v697_v50, %v2073_v22  ;;  %v709_v60 = vrot.slane %v704_v51, %v2073_v22  ;;  %v711_v5 = vpack.i.b16 %v616_v52, %v616_v52 }
  0x1f   : > { %v681_v53 = vrot.slane %v676_v47, %v2073_v22  ;;  %v683_v54 = vpack.i.b16 %v600_v48, %v600_v48  ;;  %v723_v12 = vrot.slane %v718_v55, %v2073_v22  ;;  %1885 = vmatprep.subr.bf16.mxu1 %v2132_v62  ;;  %v1735_v31 = vpack.i.b16 %v2059_v17, %v2059_v17 }
  0x20   : > { %v1751_v2 = vcombine.low %v702_v59, %v702_v59  ;;  %v1752_v3 = vcombine.low %v709_v60, %v709_v60  ;;  %v825_v13 = vsub.bf16 %v2121_v56, %v1750_v58  ;;  %v826_v14 = vsub.bf16 %v2123_v57, %v1750_v58 }
  0x21   : > { %v1748_v63 = vcombine.low %v681_v53, %v681_v53  ;;  %v688_v0 = vrot.slane %v683_v54, %v2073_v22  ;;  %1828 = vmatpush3.bf16.msra.mxu0 %v2023_v6  ;;  %v716_v35 = vrot.slane %v711_v5, %v2073_v22  ;;  %1893 = vmatpush3.bf16.msra.mxu1 %v2132_v62 }
  0x22   : > { %1829 = vmatprep.subr.bf16.mxu0 %v2050_v9  ;;  %v827_v6 = vsub.bf16 %v2121_v56, %v1751_v2  ;;  %v828_v15 = vsub.bf16 %v2123_v57, %v1751_v2  ;;  %v829_v27 = vsub.bf16 %v2121_v56, %v1752_v3  ;;  %v830_v29 = vsub.bf16 %v2123_v57, %v1752_v3 }
  0x23   : > { %v821_v8 = vsub.bf16 %v2121_v56, %v1748_v63  ;;  %v822_v10 = vsub.bf16 %v2123_v57, %v1748_v63  ;;  %v1749_v11 = vcombine.low %v688_v0, %v688_v0  ;;  %v858_v36 = vmax.bf16 %v1955_v18, %v826_v14  ;;  %1886 = vmatprep.subr.bf16.mxu1 %v2153_v16 }
  0x24   : > { %v2172_v37 = vmax.bf16 %v1955_v18, %v827_v6  ;;  %v2175_v38 = vmax.bf16 %v1955_v18, %v828_v15  ;;  %v1754_v39 = vcombine.low %v723_v12, %v723_v12  ;;  %v2180_v40 = vcombine.high %v2078_v25, %v2078_v25 }
  0x25   : > { %v853_v19 = vmax.bf16 %v1955_v18, %v821_v8  ;;  %v854_v23 = vmax.bf16 %v1955_v18, %v822_v10  ;;  %v823_v24 = vsub.bf16 %v2121_v56, %v1749_v11  ;;  %v824_v26 = vsub.bf16 %v2123_v57, %v1749_v11  ;;  %1830 = vmatpush3.bf16.msra.mxu0 %v2050_v9 }
  0x26   : > { %1831 = vmatprep.subr.bf16.mxu0 %v2065_v20  ;;  %v857_v9 = vmax.bf16 %v1955_v18, %v825_v13  ;;  %v2183_v41 = vmax.bf16 %v1955_v18, %v829_v27  ;;  %v2186_v42 = vmax.bf16 %v1955_v18, %v830_v29  ;;  %v624_v43 = vrot.slane %v566_v30, %v2073_v22 }
  0x27   : > { %v1764_v32 = vcombine.low %v853_v19, %v854_v23  ;;  %v855_v33 = vmax.bf16 %v1955_v18, %v823_v24  ;;  %v856_v34 = vmax.bf16 %v1955_v18, %v824_v26  ;;  %v1753_v47 = vcombine.low %v716_v35, %v716_v35  ;;  %1894 = vmatpush3.bf16.msra.mxu1 %v2153_v16 }
  0x28   : > { %v536_v25 = vcombine.high %v2070_v21, %v2070_v21  ;;  %v634_v48 = vpack.i.b16 %v2136_v1, %v2136_v1  ;;  %v1766_v49 = vcombine.low %v857_v9, %v858_v36  ;;  %v576_v50 = vrot.slane %v554_v61, %v2073_v22 }
  0x29   : > { %1853 = vmatprep.mubr.bf16.mxu1 %v1764_v32  ;;  %1832 = vmatpush3.bf16.msra.mxu0 %v2065_v20  ;;  %v1765_v45 = vcombine.low %v855_v33, %v856_v34  ;;  %v1767_v20 = vcombine.low %v2172_v37, %v2175_v38  ;;  %v580_v17 = vrot.slane %v1735_v31, %v2073_v22  ;;  %v542_v38 = vunpack.i.h.s16 %v2180_v40 }
  0x2a   : > { %1833 = vmatprep.subr.bf16.mxu0 %v2087_v28  ;;  %v833_v51 = vsub.bf16 %v2121_v56, %v1754_v39  ;;  %v834_v52 = vsub.bf16 %v2123_v57, %v1754_v39  ;;  %v1741_v53 = vpack.i.b16 %v536_v25, %v536_v25  ;;  %v552_v54 = vunpack.i.h.s16 %v536_v25 }
  0x2b   : > { %v725_v21 = vpack.i.b16 %v624_v43, %v624_v43  ;;  %v639_v55 = vrot.slane %v634_v48, %v2073_v22  ;;  %v641_v58 = vpack.i.b16 %v576_v50, %v576_v50  ;;  %v648_v59 = vpack.i.b16 %v580_v17, %v580_v17  ;;  %1854 = vmatmul.mubr.bf16.vlgmr.msra.gmra.mrb[0].mxu1 %v1765_v45 }
  0x2c   : > { %v1768_v60 = vcombine.low %v2183_v41, %v2186_v42  ;;  %v831_v61 = vsub.bf16 %v2121_v56, %v1753_v47  ;;  %v628_v63 = vrot.slane %v1741_v53, %v2073_v22  ;;  %1857 = vmatprep.mubr.bf16.mxu1 %v1766_v49  ;;  %v568_v0 = vpack.i.b16 %v552_v54, %v552_v54 }
  0x2d   : > { %1834 = vmatpush3.bf16.msra.mxu0 %v2087_v28  ;;  %v1742_v1 = vcombine.low %v639_v55, %v639_v55  ;;  %v646_v28 = vrot.slane %v641_v58, %v2073_v22  ;;  %v653_v2 = vrot.slane %v648_v59, %v2073_v22  ;;  %v832_v3 = vsub.bf16 %v2123_v57, %v1753_v47 }
  0x2e   : > { %1835 = vmatprep.subr.bf16.mxu0 %v2113_v46  ;;  %v2214_v5 = vmax.bf16 %v1955_v18, %v833_v51  ;;  %v732_v7 = vpack.i.b16 %v628_v63, %v628_v63  ;;  %v556_v8 = vpack.i.b16 %v540_v44, %v540_v44  ;;  %v730_v10 = vrot.slane %v725_v21, %v2073_v22 }
  0x2f   : > { %v809_v11 = vsub.bf16 %v2121_v56, %v1742_v1  ;;  %v810_v12 = vsub.bf16 %v2123_v57, %v1742_v1  ;;  %v1743_v13 = vcombine.low %v646_v28, %v646_v28  ;;  %v866_v14 = vmax.bf16 %v1955_v18, %v834_v52 }
  0x30   : > { %v632_v6 = vrot.slane %v568_v0, %v2073_v22  ;;  %v1744_v15 = vcombine.low %v653_v2, %v653_v2  ;;  %v584_v19 = vrot.slane %v556_v8, %v2073_v22  ;;  %v737_v23 = vrot.slane %v732_v7, %v2073_v22 }
  0x31   : > { %1836 = vmatpush3.bf16.msra.mxu0 %v2113_v46  ;;  %v841_v24 = vmax.bf16 %v1955_v18, %v809_v11  ;;  %v842_v46 = vmax.bf16 %v1955_v18, %v810_v12  ;;  %v811_v26 = vsub.bf16 %v2121_v56, %v1743_v13  ;;  %v863_v27 = vmax.bf16 %v1955_v18, %v831_v61 }
  0x32   : > { %1837 = vmatprep.subr.bf16.mxu0 %v2132_v62  ;;  %v812_v29 = vsub.bf16 %v2123_v57, %v1743_v13  ;;  %v813_v30 = vsub.bf16 %v2121_v56, %v1744_v15  ;;  %v814_v31 = vsub.bf16 %v2123_v57, %v1744_v15  ;;  %v1755_v32 = vcombine.low %v730_v10, %v730_v10 }
  0x33   : > { %v1758_v33 = vcombine.low %v841_v24, %v842_v46  ;;  %v843_v34 = vmax.bf16 %v1955_v18, %v811_v26  ;;  %v655_v35 = vpack.i.b16 %v584_v19, %v584_v19  ;;  %1858 = vmatmul.mubr.bf16.gmra.mrb[4].mxu1 %v1767_v20  ;;  %v864_v9 = vmax.bf16 %v1955_v18, %v832_v3 }
  0x34   : > { %v739_v36 = vpack.i.b16 %v632_v6, %v632_v6  ;;  %v844_v37 = vmax.bf16 %v1955_v18, %v812_v29  ;;  %1861 = vmatprep.mubr.bf16.mxu1 %v1768_v60  ;;  %v1756_v39 = vcombine.low %v737_v23, %v737_v23  ;;  %v845_v41 = vmax.bf16 %v1955_v18, %v813_v30 }
  0x35   : > { %1838 = vmatpush3.bf16.msra.mxu0 %v2132_v62  ;;  %1841 = vmatprep.mubr.bf16.mxu0 %v1758_v33  ;;  %v846_v62 = vmax.bf16 %v1955_v18, %v814_v31  ;;  %v660_v43 = vrot.slane %v655_v35, %v2073_v22  ;;  %v835_v44 = vsub.bf16 %v2121_v56, %v1755_v32  ;;  %v1207_v35 = vsub.s32 1, %v2017_v4 }
  0x36   : > { %1839 = vmatprep.subr.bf16.mxu0 %v2153_v16  ;;  %v1759_v42 = vcombine.low %v843_v34, %v844_v37  ;;  %v836_v45 = vsub.bf16 %v2123_v57, %v1755_v32  ;;  %v1736_v25 = vpack.i.b16 %v2180_v40, %v2180_v40  ;;  %v1769_v48 = vcombine.low %v863_v27, %v864_v9 }
  0x37   : > { %v1760_v47 = vcombine.low %v845_v41, %v846_v62  ;;  %v744_v49 = vrot.slane %v739_v36, %v2073_v22  ;;  %v1745_v20 = vcombine.low %v660_v43, %v660_v43  ;;  %v558_v50 = vpack.i.b16 %v542_v38, %v542_v38 }
  0x38   : > { %v1770_v17 = vcombine.low %v2214_v5, %v866_v14  ;;  %v837_v51 = vsub.bf16 %v2121_v56, %v1756_v39  ;;  %v838_v52 = vsub.bf16 %v2123_v57, %v1756_v39  ;;  %v588_v53 = vrot.slane %v1736_v25, %v2073_v22 }
  0x39   : > { %1840 = vmatpush3.bf16.msra.mxu0 %v2153_v16  ;;  %v815_v16 = vsub.bf16 %v2121_v56, %v1745_v20  ;;  %v816_v54 = vsub.bf16 %v2123_v57, %v1745_v20  ;;  %v592_v40 = vrot.slane %v558_v50, %v2073_v22  ;;  %v867_v21 = vmax.bf16 %v1955_v18, %v835_v44 }
  0x3a   : > { %v868_v55 = vmax.bf16 %v1955_v18, %v836_v45  ;;  %v662_v58 = vpack.i.b16 %v588_v53, %v588_v53  ;;  %v1757_v59 = vcombine.low %v744_v49, %v744_v49  ;;  %v869_v0 = vmax.bf16 %v1955_v18, %v837_v51 }
  0x3b   : > { %1862 = vmatmul.mubr.bf16.gmra.mrb[8].mxu1 %v1769_v48  ;;  %v847_v60 = vmax.bf16 %v1955_v18, %v815_v16  ;;  %v848_v61 = vmax.bf16 %v1955_v18, %v816_v54  ;;  %v669_v63 = vpack.i.b16 %v592_v40, %v592_v40  ;;  %v870_v1 = vmax.bf16 %v1955_v18, %v838_v52 }
  0x3c   : > { %1842 = vmatmul.mubr.bf16.vlgmr.msra.gmra.mrb[4].mxu0 %v1759_v42  ;;  %1865 = vmatprep.mubr.bf16.mxu1 %v1770_v17  ;;  %v667_v28 = vrot.slane %v662_v58, %v2073_v22  ;;  %v1771_v7 = vcombine.low %v867_v21, %v868_v55  ;;  %v839_v8 = vsub.bf16 %v2121_v56, %v1757_v59  ;;  %v1956_v32 = vmov -1e+30  }
  0x3d   : > { %1845 = vmatprep.mubr.bf16.mxu0 %v1760_v47  ;;  %v1761_v2 = vcombine.low %v847_v60, %v848_v61  ;;  %v674_v3 = vrot.slane %v669_v63, %v2073_v22  ;;  %v840_v10 = vsub.bf16 %v2123_v57, %v1757_v59  ;;  %v1772_v12 = vcombine.low %v869_v0, %v870_v1 }
  0x3e   : > { %v1746_v5 = vcombine.low %v667_v28, %v667_v28  ;;  %v871_v24 = vmax.bf16 %v1955_v18, %v839_v8  ;;  %v1218_v9 = vsub.s32 2, %v2017_v4  ;;  %v1229_v37 = vsub.s32 3, %v2017_v4 }
  0x3f   : > { %v1747_v11 = vcombine.low %v674_v3, %v674_v3  ;;  %v872_v46 = vmax.bf16 %v1955_v18, %v840_v10  ;;  %v1240_v39 = vsub.s32 4, %v2017_v4  ;;  %v1251_v42 = vsub.s32 5, %v2017_v4 }
  0x40   : > { %v817_v13 = vsub.bf16 %v2121_v56, %v1746_v5  ;;  %v818_v14 = vsub.bf16 %v2123_v57, %v1746_v5  ;;  %v1262_v25 = vsub.s32 6, %v2017_v4 }
  0x41   : > { %v819_v6 = vsub.bf16 %v2121_v56, %v1747_v11  ;;  %v820_v15 = vsub.bf16 %v2123_v57, %v1747_v11  ;;  %v1773_v56 = vcombine.low %v871_v24, %v872_v46  ;;  %v1273_v46 = vsub.s32 7, %v2017_v4 }
  0x42   : > { %v849_v19 = vmax.bf16 %v1955_v18, %v817_v13  ;;  %v850_v23 = vmax.bf16 %v1955_v18, %v818_v14 }
  0x43   : > { %1866 = vmatmul.mubr.bf16.gmra.mrb[12].mxu1 %v1771_v7  ;;  %v851_v26 = vmax.bf16 %v1955_v18, %v819_v6  ;;  %v852_v27 = vmax.bf16 %v1955_v18, %v820_v15 }
  0x44   : > { %1846 = vmatmul.mubr.bf16.gmra.mrb[8].mxu0 %v1761_v2  ;;  %1869 = vmatprep.mubr.bf16.mxu1 %v1772_v12  ;;  %v1762_v29 = vcombine.low %v849_v19, %v850_v23 }
  0x45   : > { %v1763_v30 = vcombine.low %v851_v26, %v852_v27 }
  0x46   : > { %1849 = vmatprep.mubr.bf16.mxu0 %v1762_v29 }
  0x4b   : > { %1870 = vmatmul.mubr.bf16.gmra.mrb[16].mxu1 %v1773_v56 }
  0x4c   : > { %1850 = vmatmul.mubr.bf16.gmra.mrb[12].mxu0 %v1763_v30 }
  0xef   : > { %v1824_v57 = vpop.f32.mrb[0].mxu0 }
  0xf0   : > { %vm476_vm2 = vcmp.le.f32.partialorder %v1824_v57, 0.16  ;;  %v466_v31 = vpop.f32.mrb[1].mxu0 }
  0xf1   : > { %v2274_v33 = vsel %vm476_vm2, 0.0, %v1956_v32  ;;  %vm475_vm3 = vcmp.le.f32.partialorder %v466_v31, 0.16 }
  0xf2   : > { %v1285_v34 = vrot.slane %v2274_v33, %v2073_v22  ;;  %v1296_v18 = vrot.slane %v2274_v33, %v1207_v35  ;;  %v1307_v36 = vrot.slane %v2274_v33, %v1218_v9  ;;  %v1318_v38 = vrot.slane %v2274_v33, %v1229_v37 }
  0xf3   : > { %v1329_v62 = vrot.slane %v2274_v33, %v1240_v39  ;;  %v1340_v47 = vrot.slane %v2274_v33, %v1251_v42  ;;  %v1351_v49 = vrot.slane %v2274_v33, %v1262_v25  ;;  %v477_v50 = vsel %vm475_vm3, 0.0, %v1956_v32 }
  0xf4   : > { %1291 = vbcast.lane.b32.xlu1 %v1285_v34, 264  ;;  %1287 = vbcast.lane.b32.xlu0 %v1285_v34, 256  ;;  %v1208_v52 = vrot.slane %v477_v50, %v1207_v35  ;;  %v1197_v53 = vrot.slane %v477_v50, %v2073_v22  ;;  %v1219_v61 = vrot.slane %v477_v50, %v1218_v9 }
  0xf5   : > { %v1230_v28 = vrot.slane %v477_v50, %v1229_v37  ;;  %v1241_v8 = vrot.slane %v477_v50, %v1240_v39  ;;  %v1252_v14 = vrot.slane %v477_v50, %v1251_v42  ;;  %v1263_v24 = vrot.slane %v477_v50, %v1262_v25 }
  0xf6   : > { %v1274_v26 = vrot.slane %v477_v50, %v1273_v46  ;;  %v1362_v27 = vrot.slane %v2274_v33, %v1273_v46 }
  0xf8   : > { %1302 = vbcast.lane.b32.xlu1 %v1296_v18, 264  ;;  %1298 = vbcast.lane.b32.xlu0 %v1296_v18, 256 }
  0xfc   : > { %1313 = vbcast.lane.b32.xlu1 %v1307_v36, 264  ;;  %1309 = vbcast.lane.b32.xlu0 %v1307_v36, 256 }
  0xfe   : > { %v2285_v41 = vpop.f32.mrb[0].mxu1 }
  0xff   : > { %v2289_v43 = vpop.f32.mrb[1].mxu1 }
 0x100   : > { %1324 = vbcast.lane.b32.xlu1 %v1318_v38, 264  ;;  %1320 = vbcast.lane.b32.xlu0 %v1318_v38, 256  ;;  %v2291_v44 = vpop.f32.mrb[2].mxu1 }
 0x101   : > { %v2293_v45 = vpop.f32.mrb[3].mxu1 }
 0x104   : > { %1335 = vbcast.lane.b32.xlu1 %v1329_v62, 264  ;;  %1331 = vbcast.lane.b32.xlu0 %v1329_v62, 256 }
 0x106   : > { %v2297_v48 = vpop.f32.mrb[4].mxu1 }
 0x107   : > { %v1131_v20 = vpop.f32.mrb[5].mxu1 }
 0x108   : > { %1346 = vbcast.lane.b32.xlu1 %v1340_v47, 264  ;;  %1342 = vbcast.lane.b32.xlu0 %v1340_v47, 256  ;;  %v2300_v17 = vpop.f32.mrb[6].mxu1 }
 0x109   : > { %v1134_v51 = vpop.f32.mrb[7].mxu1 }
 0x10c   : > { %1357 = vbcast.lane.b32.xlu1 %v1351_v49, 264  ;;  %1353 = vbcast.lane.b32.xlu0 %v1351_v49, 256 }
 0x10e   : > { %v2307_v40 = vpop.f32.mrb[8].mxu1 }
 0x10f   : > { %v2303_v16 = vpop.f32.mrb[4].mxu0  ;;  %v1147_v55 = vpop.f32.mrb[9].mxu1 }
 0x110   : > { %1210 = vbcast.lane.b32.xlu1 %v1208_v52, 256  ;;  %1199 = vbcast.lane.b32.xlu0 %v1197_v53, 256  ;;  %v2305_v54 = vpop.f32.mrb[5].mxu0  ;;  %v2313_v59 = vpop.f32.mrb[10].mxu1 }
 0x111   : > { %v2309_v21 = vpop.f32.mrb[6].mxu0  ;;  %v1150_v60 = vpop.f32.mrb[11].mxu1 }
 0x112   : > { %v2311_v58 = vpop.f32.mrb[7].mxu0 }
 0x114   : > { %1214 = vbcast.lane.b32.xlu1 %v1208_v52, 264  ;;  %1203 = vbcast.lane.b32.xlu0 %v1197_v53, 264 }
 0x116   : > { %v2319_v0 = vpop.f32.mrb[12].mxu1 }
 0x117   : > { %v2315_v22 = vpop.f32.mrb[8].mxu0  ;;  %v2323_v2 = vpop.f32.mrb[13].mxu1 }
 0x118   : > { %1225 = vbcast.lane.b32.xlu1 %v1219_v61, 264  ;;  %1221 = vbcast.lane.b32.xlu0 %v1219_v61, 256  ;;  %v2317_v63 = vpop.f32.mrb[9].mxu0  ;;  %v2327_v5 = vpop.f32.mrb[14].mxu1 }
 0x119   : > { %v2321_v1 = vpop.f32.mrb[10].mxu0  ;;  %v1166_v7 = vpop.f32.mrb[15].mxu1 }
 0x11a   : > { %v2325_v3 = vpop.f32.mrb[11].mxu0 }
 0x11c   : > { %1236 = vbcast.lane.b32.xlu1 %v1230_v28, 264  ;;  %1232 = vbcast.lane.b32.xlu0 %v1230_v28, 256 }
 0x11e   : > { %v2333_v12 = vpop.f32.mrb[16].mxu1 }
 0x11f   : > { %v2329_v10 = vpop.f32.mrb[12].mxu0  ;;  %v2337_v6 = vpop.f32.mrb[17].mxu1 }
 0x120   : > { %1247 = vbcast.lane.b32.xlu1 %v1241_v8, 264  ;;  %1243 = vbcast.lane.b32.xlu0 %v1241_v8, 256  ;;  %v2331_v11 = vpop.f32.mrb[13].mxu0  ;;  %v2341_v19 = vpop.f32.mrb[18].mxu1 }
 0x121   : > { %v2335_v13 = vpop.f32.mrb[14].mxu0  ;;  %v2343_v23 = vpop.f32.mrb[19].mxu1 }
 0x122   : > { %v2339_v15 = vpop.f32.mrb[15].mxu0 }
 0x124   : > { %1258 = vbcast.lane.b32.xlu1 %v1252_v14, 264  ;;  %1254 = vbcast.lane.b32.xlu0 %v1252_v14, 256 }
 0x128   : > { %1269 = vbcast.lane.b32.xlu1 %v1263_v24, 264  ;;  %1265 = vbcast.lane.b32.xlu0 %v1263_v24, 256 }
 0x12c   : > { %1280 = vbcast.lane.b32.xlu1 %v1274_v26, 264  ;;  %1276 = vbcast.lane.b32.xlu0 %v1274_v26, 256 }
 0x130   : > { %1368 = vbcast.lane.b32.xlu1 %v1362_v27, 264  ;;  %1364 = vbcast.lane.b32.xlu0 %v1362_v27, 256 }
 0x166   : > { %v1292_v29 = vpop.permute.xlu1 %1291  ;;  %v1288_v30 = vpop.permute.xlu0 %1287 }
 0x167   : > { %v1387_v56 = vadd.f32 %v1292_v29, %v1134_v51  ;;  %v1386_v57 = vadd.f32 %v1288_v30, %v1131_v20 }
 0x169   : > { %v1460_v31 = vmax.f32 %v1386_v57, %v1387_v56 }
 0x16a   : > { %v1303_v32 = vpop.permute.xlu1 %1302  ;;  %v1299_v34 = vpop.permute.xlu0 %1298 }
 0x16b   : > { %v1461_v35 = vrot.slane %v1460_v31, 4  ;;  %v1389_v18 = vadd.f32 %v2300_v17, %v1303_v32  ;;  %v1388_v4 = vadd.f32 %v2297_v48, %v1299_v34 }
 0x16d   : > { %v1462_v9 = vmax.f32 %v1460_v31, %v1461_v35  ;;  %v1467_v36 = vmax.f32 %v1388_v4, %v1389_v18 }
 0x16e   : > { %v1314_v37 = vpop.permute.xlu1 %1313  ;;  %v1310_v38 = vpop.permute.xlu0 %1309 }
 0x16f   : > { %v1463_v39 = vrot.slane %v1462_v9, 2  ;;  %v1468_v33 = vrot.slane %v1467_v36, 4  ;;  %v1391_v62 = vadd.f32 %v1314_v37, %v1150_v60  ;;  %v1390_v42 = vadd.f32 %v1310_v38, %v1147_v55 }
 0x171   : > { %v1464_v47 = vmax.f32 %v1462_v9, %v1463_v39  ;;  %v1469_v25 = vmax.f32 %v1467_v36, %v1468_v33  ;;  %v1474_v49 = vmax.f32 %v1390_v42, %v1391_v62 }
 0x172   : > { %v1325_v20 = vpop.permute.xlu1 %1324  ;;  %v1321_v50 = vpop.permute.xlu0 %1320 }
 0x173   : > { %v1470_v51 = vrot.slane %v1469_v25, 2  ;;  %v1475_v52 = vrot.slane %v1474_v49, 4  ;;  %v1393_v53 = vadd.f32 %v2313_v59, %v1325_v20  ;;  %v1392_v17 = vadd.f32 %v2307_v40, %v1321_v50 }
 0x174   : > { %v1465_v48 = vrot.slane %v1464_v47, 1 }
 0x175   : > { %v1471_v61 = vmax.f32 %v1469_v25, %v1470_v51  ;;  %v1476_v28 = vmax.f32 %v1474_v49, %v1475_v52  ;;  %v1481_v8 = vmax.f32 %v1392_v17, %v1393_v53 }
 0x176   : > { %v1336_v14 = vpop.permute.xlu1 %1335  ;;  %v1332_v24 = vpop.permute.xlu0 %1331  ;;  %v1466_v29 = vmax.f32 %v1464_v47, %v1465_v48 }
 0x177   : > { %v1472_v46 = vrot.slane %v1471_v61, 1  ;;  %v1477_v60 = vrot.slane %v1476_v28, 2  ;;  %v1395_v55 = vadd.f32 %v1336_v14, %v1166_v7  ;;  %v1394_v26 = vadd.f32 %v1332_v24, %v2323_v2 }
 0x178   : > { %v1482_v27 = vrot.slane %v1481_v8, 4 }
 0x179   : > { %v1473_v30 = vmax.f32 %v1471_v61, %v1472_v46  ;;  %v1478_v56 = vmax.f32 %v1476_v28, %v1477_v60  ;;  %v1488_v57 = vmax.f32 %v1394_v26, %v1395_v55 }
 0x17a   : > { %v1483_v59 = vmax.f32 %v1481_v8, %v1482_v27  ;;  %v1347_v31 = vpop.permute.xlu1 %1346  ;;  %v1343_v40 = vpop.permute.xlu0 %1342 }
 0x17b   : > { %v1546_v32 = vsel %vm1532_vm4, %v1473_v30, %v1466_v29  ;;  %v1479_v34 = vrot.slane %v1478_v56, 1  ;;  %v1489_v35 = vrot.slane %v1488_v57, 4  ;;  %v1397_v18 = vadd.f32 %v2327_v5, %v1347_v31 }
 0x17c   : > { %v1484_v4 = vrot.slane %v1483_v59, 2  ;;  %v1396_v7 = vadd.f32 %v2319_v0, %v1343_v40 }
 0x17d   : > { %v1480_v2 = vmax.f32 %v1478_v56, %v1479_v34  ;;  %v1490_v9 = vmax.f32 %v1488_v57, %v1489_v35 }
 0x17e   : > { %v1485_v36 = vmax.f32 %v1483_v59, %v1484_v4  ;;  %v1495_v37 = vmax.f32 %v1396_v7, %v1397_v18  ;;  %v1358_v38 = vpop.permute.xlu1 %1357  ;;  %v1354_v39 = vpop.permute.xlu0 %1353 }
 0x17f   : > { %v1547_v33 = vsel %vm1534_vm5, %v1480_v2, %v1546_v32  ;;  %v1491_v62 = vrot.slane %v1490_v9, 2  ;;  %v1399_v42 = vadd.f32 %v1358_v38, %v2343_v23  ;;  %v1398_v47 = vadd.f32 %v1354_v39, %v2337_v6 }
 0x180   : > { %v1486_v25 = vrot.slane %v1485_v36, 1  ;;  %v1496_v49 = vrot.slane %v1495_v37, 4 }
 0x181   : > { %v1492_v5 = vmax.f32 %v1490_v9, %v1491_v62  ;;  %v1502_v20 = vmax.f32 %v1398_v47, %v1399_v42 }
 0x182   : > { %v1487_v50 = vmax.f32 %v1485_v36, %v1486_v25  ;;  %v1497_v0 = vmax.f32 %v1495_v37, %v1496_v49  ;;  %v1211_v51 = vpop.permute.xlu1 %1210  ;;  %v1200_v52 = vpop.permute.xlu0 %1199 }
 0x183   : > { %v1493_v53 = vrot.slane %v1492_v5, 1  ;;  %v1503_v17 = vrot.slane %v1502_v20, 4  ;;  %v1372_v6 = vadd.f32 %v2303_v16, %v1211_v51  ;;  %v1370_v14 = vadd.f32 %v1200_v52, %v2305_v54 }
 0x184   : > { %v1548_v48 = vsel %vm1536_vm6, %v1487_v50, %v1547_v33  ;;  %v1498_v61 = vrot.slane %v1497_v0, 2 }
 0x185   : > { %v1494_v28 = vmax.f32 %v1492_v5, %v1493_v53  ;;  %v1504_v8 = vmax.f32 %v1502_v20, %v1503_v17 }
 0x186   : > { %v1499_v23 = vmax.f32 %v1497_v0, %v1498_v61  ;;  %v1215_v24 = vpop.permute.xlu1 %1214  ;;  %v1204_v46 = vpop.permute.xlu0 %1203 }
 0x187   : > { %v1549_v60 = vsel %vm1538_vm7, %v1494_v28, %v1548_v48  ;;  %v1505_v55 = vrot.slane %v1504_v8, 2  ;;  %v1373_v26 = vadd.f32 %v2309_v21, %v1215_v24  ;;  %v1371_v27 = vadd.f32 %v1204_v46, %v2311_v58 }
 0x188   : > { %v1500_v29 = vrot.slane %v1499_v23, 1 }
 0x189   : > { %v1506_v30 = vmax.f32 %v1504_v8, %v1505_v55  ;;  %v1411_v56 = vmax.f32 %v1372_v6, %v1373_v26  ;;  %v1404_v57 = vmax.f32 %v1370_v14, %v1371_v27 }
 0x18a   : > { %v1501_v59 = vmax.f32 %v1499_v23, %v1500_v29  ;;  %v1226_v31 = vpop.permute.xlu1 %1225  ;;  %v1222_v40 = vpop.permute.xlu0 %1221 }
 0x18b   : > { %v1507_v16 = vrot.slane %v1506_v30, 1  ;;  %v1412_v32 = vrot.slane %v1411_v56, 4  ;;  %v1405_v54 = vrot.slane %v1404_v57, 4  ;;  %v1375_v34 = vadd.f32 %v1226_v31, %v2325_v3 }
 0x18c   : > { %v1550_v35 = vsel %vm1540_vm8, %v1501_v59, %v1549_v60  ;;  %v1374_v21 = vadd.f32 %v1222_v40, %v2317_v63 }
 0x18d   : > { %v1508_v18 = vmax.f32 %v1506_v30, %v1507_v16  ;;  %v1413_v58 = vmax.f32 %v1411_v56, %v1412_v32  ;;  %v1406_v4 = vmax.f32 %v1404_v57, %v1405_v54 }
 0x18e   : > { %v1418_v7 = vmax.f32 %v1374_v21, %v1375_v34  ;;  %v1237_v2 = vpop.permute.xlu1 %1236  ;;  %v1233_v9 = vpop.permute.xlu0 %1232 }
 0x18f   : > { %v2368_v36 = vsel %vm1542_vm9, %v1508_v18, %v1550_v35  ;;  %v1414_v37 = vrot.slane %v1413_v58, 2  ;;  %v1407_v38 = vrot.slane %v1406_v4, 2  ;;  %v1377_v39 = vadd.f32 %v2321_v1, %v1237_v2 }
 0x190   : > { %v1419_v33 = vrot.slane %v1418_v7, 4  ;;  %v1376_v3 = vadd.f32 %v2315_v22, %v1233_v9 }
 0x191   : > { %v1415_v62 = vmax.f32 %v1413_v58, %v1414_v37  ;;  %v1408_v42 = vmax.f32 %v1406_v4, %v1407_v38 }
 0x192   : > { %v1420_v47 = vmax.f32 %v1418_v7, %v1419_v33  ;;  %v1425_v63 = vmax.f32 %v1376_v3, %v1377_v39  ;;  %v1248_v25 = vpop.permute.xlu1 %1247  ;;  %v1244_v49 = vpop.permute.xlu0 %1243 }
 0x193   : > { %v1416_v5 = vrot.slane %v1415_v62, 1  ;;  %v1409_v20 = vrot.slane %v1408_v42, 1  ;;  %v1379_v50 = vadd.f32 %v1248_v25, %v2339_v15  ;;  %v1378_v0 = vadd.f32 %v1244_v49, %v2331_v11 }
 0x194   : > { %v1421_v51 = vrot.slane %v1420_v47, 2  ;;  %v1426_v52 = vrot.slane %v1425_v63, 4 }
 0x195   : > { %v1417_v53 = vmax.f32 %v1415_v62, %v1416_v5  ;;  %v1410_v17 = vmax.f32 %v1408_v42, %v1409_v20  ;;  %v1432_v1 = vmax.f32 %v1378_v0, %v1379_v50 }
 0x196   : > { %v1422_v48 = vmax.f32 %v1420_v47, %v1421_v51  ;;  %v1427_v61 = vmax.f32 %v1425_v63, %v1426_v52  ;;  %v1259_v22 = vpop.permute.xlu1 %1258  ;;  %v1255_v28 = vpop.permute.xlu0 %1254 }
 0x197   : > { %v1533_v8 = vsel %vm1532_vm4, %v1417_v53, %v1410_v17  ;;  %v1433_v23 = vrot.slane %v1432_v1, 4  ;;  %v1381_v6 = vadd.f32 %v2335_v13, %v1259_v22  ;;  %v1380_v14 = vadd.f32 %v2329_v10, %v1255_v28 }
 0x198   : > { %v1423_v24 = vrot.slane %v1422_v48, 1  ;;  %v1428_v15 = vrot.slane %v1427_v61, 2 }
 0x199   : > { %v1434_v46 = vmax.f32 %v1432_v1, %v1433_v23  ;;  %v1439_v11 = vmax.f32 %v1380_v14, %v1381_v6 }
 0x19a   : > { %v1424_v60 = vmax.f32 %v1422_v48, %v1423_v24  ;;  %v1429_v55 = vmax.f32 %v1427_v61, %v1428_v15  ;;  %v1270_v26 = vpop.permute.xlu1 %1269  ;;  %v1266_v27 = vpop.permute.xlu0 %1265 }
 0x19b   : > { %v1435_v29 = vrot.slane %v1434_v46, 2  ;;  %v1440_v30 = vrot.slane %v1439_v11, 4  ;;  %v1383_v56 = vadd.f32 %v1270_v26, %v2293_v45  ;;  %v1382_v57 = vadd.f32 %v1266_v27, %v2289_v43 }
 0x19c   : > { %v1535_v59 = vsel %vm1534_vm5, %v1424_v60, %v1533_v8  ;;  %v1430_v31 = vrot.slane %v1429_v55, 1 }
 0x19d   : > { %v1436_v13 = vmax.f32 %v1434_v46, %v1435_v29  ;;  %v1441_v40 = vmax.f32 %v1439_v11, %v1440_v30  ;;  %v1446_v10 = vmax.f32 %v1382_v57, %v1383_v56 }
 0x19e   : > { %v1431_v16 = vmax.f32 %v1429_v55, %v1430_v31  ;;  %v1281_v32 = vpop.permute.xlu1 %1280  ;;  %v1277_v54 = vpop.permute.xlu0 %1276 }
 0x19f   : > { %v1437_v34 = vrot.slane %v1436_v13, 1  ;;  %v1442_v35 = vrot.slane %v1441_v40, 2  ;;  %v1447_v21 = vrot.slane %v1446_v10, 4  ;;  %v1385_v18 = vadd.f32 %v2291_v44, %v1281_v32 }
 0x1a0   : > { %v1537_v58 = vsel %vm1536_vm6, %v1431_v16, %v1535_v59  ;;  %v1384_v45 = vadd.f32 %v2285_v41, %v1277_v54 }
 0x1a1   : > { %v1438_v4 = vmax.f32 %v1436_v13, %v1437_v34  ;;  %v1443_v43 = vmax.f32 %v1441_v40, %v1442_v35  ;;  %v1448_v7 = vmax.f32 %v1446_v10, %v1447_v21 }
 0x1a2   : > { %v1453_v2 = vmax.f32 %v1384_v45, %v1385_v18  ;;  %v1369_v9 = vpop.permute.xlu1 %1368  ;;  %v1365_v37 = vpop.permute.xlu0 %1364 }
 0x1a3   : > { %v1539_v38 = vsel %vm1538_vm7, %v1438_v4, %v1537_v58  ;;  %v1444_v39 = vrot.slane %v1443_v43, 1  ;;  %v1449_v33 = vrot.slane %v1448_v7, 2  ;;  %v1401_v3 = vadd.f32 %v2341_v19, %v1369_v9 }
 0x1a4   : > { %v1454_v62 = vrot.slane %v1453_v2, 4  ;;  %v1400_v42 = vadd.f32 %v2333_v12, %v1365_v37  ;;  %v1782_v12 = vld [vmem:[%s2410_s5] ss:$0 sm:$0xff] }
 0x1a5   : > { %v1445_v44 = vmax.f32 %v1443_v43, %v1444_v39  ;;  %v1450_v47 = vmax.f32 %v1448_v7, %v1449_v33 }
 0x1a6   : > { %v1455_v63 = vmax.f32 %v1453_v2, %v1454_v62  ;;  %v1509_v25 = vmax.f32 %v1400_v42, %v1401_v3 }
 0x1a7   : > { %v1541_v41 = vsel %vm1540_vm8, %v1445_v44, %v1539_v38  ;;  %v1451_v49 = vrot.slane %v1450_v47, 1 }
 0x1a8   : > { %v1456_v5 = vrot.slane %v1455_v63, 2  ;;  %v1510_v20 = vrot.slane %v1509_v25, 4 }
 0x1a9   : > { %v1452_v50 = vmax.f32 %v1450_v47, %v1451_v49 }
 0x1aa   : > { %v1457_v0 = vmax.f32 %v1455_v63, %v1456_v5  ;;  %v1511_v51 = vmax.f32 %v1509_v25, %v1510_v20 }
 0x1ab   : > { %v1543_v52 = vsel %vm1542_vm9, %v1452_v50, %v1541_v41 }
 0x1ac   : > { %v1458_v53 = vrot.slane %v1457_v0, 1  ;;  %v1512_v19 = vrot.slane %v1511_v51, 2 }
 0x1ae   : > { %v1459_v17 = vmax.f32 %v1457_v0, %v1458_v53  ;;  %v1513_v1 = vmax.f32 %v1511_v51, %v1512_v19 }
 0x1b0   : > { %v1545_v48 = vsel %vm1544_vm10, %v1459_v17, %v1543_v52  ;;  %v1514_v61 = vrot.slane %v1513_v1, 1 }
 0x1b1   : > { %v1571_v22 = vadd.f32 %v1782_v12, %v1545_v48 }
 0x1b2   : > { %v1515_v28 = vmax.f32 %v1513_v1, %v1514_v61 }
 0x1b3   : > { %v1573_v8 = vmax.f32 %v1571_v22, 0.0 }
 0x1b4   : > { %v1552_v23 = vsel %vm1544_vm10, %v1515_v28, %v2368_v36 }
 0x1b5   : > { %1575 = vst [vmem:[%s372_s15] sm:$0xff] %v1573_v8  ;;  %v1572_v6 = vadd.f32 %v1782_v12, %v1552_v23 }
 0x1b7   : > { %v1574_v14 = vmax.f32 %v1572_v6, 0.0 }
 0x1b9   : > { %1576 = vst [vmem:[%s372_s15 + $0x8] sm:$0xff] %v1574_v14 }
 0x1ba PF: > { %s16_s23 = sadd.s32 1, %s1952_s23   ;;  %s2414_s21 = smov %s1948_s22 }
 0x1bb   : > { %p13_p5 = scmp.ge.s32.totalorder %s16_s23, 4   ;;  %s2415_s22 = smov %s2417_s24 }
 0x1bd   :  { %15 = sbr.rel (!%p13_p5) target bundleno = 2 (0x2), region = 93 }

// kernel: forward.4
= control target key start
LH: loop header
LB: loop body
LE: loop exit
PB: predicated region body
PF: predicated region fallthrough
CT: control target
= control target key end

     0   :  { %s4472_s21 = smov 0   ;;  %s4474_s22 = smov 0   ;;  %s5908_s0 = inlined_call_operand.vmem [shape: f32[2,32,5], index: 0, kind: input, shape index: {}]   ;;  %s5909_s1 = inlined_call_operand.vmem [shape: bf16[2,32,64], index: 1, kind: input, shape index: {}]   ;;  %s5910_s2 = inlined_call_operand.vmem [shape: f32[2,32,5], index: 2, kind: input, shape index: {}]   ;;  %s5911_s3 = inlined_call_operand.vmem [shape: bf16[2,32,64], index: 3, kind: input, shape index: {}]   ;;  %s5912_s4 = inlined_call_operand.vmem [shape: bf16[64,64], index: 4, kind: input, shape index: {}]   ;;  %s5913_s5 = inlined_call_operand.vmem [shape: f32[1,64], index: 5, kind: input, shape index: {}]   ;;  %s5914_s6 = inlined_call_operand.vmem [shape: f32[2,32,64], index: 6, kind: output, shape index: {}]  }
   0x1   :  { %s4476_s23 = smov 0  }
   0x2 LB: > { %s35_s24 = sadd.s32 1, %s4427_s22  ;;  %p3915_p0 = scmp.ge.s32.totalorder %s4431_s23, 1  ;;  %s4431_s23 = sphi %s4476_s23, %s16_s23   ;;  %s4427_s22 = sphi %s4474_s22, %s6057_s22   ;;  %s4423_s21 = sphi %s4472_s21, %s6056_s21  }
   0x3   : > { %p37_p1 = scmp.ge.s32.totalorder %s35_s24, 2  ;;  %p277_p2 = scmp.lt.s32.totalorder %s4431_s23, 3 }
   0x5   : > { %s6059_s24 = smov (%p37_p1, %s35_s24), 0  ;;  %p278_p3 = pnand %p3915_p0, %p277_p2 }
   0x7   : > { %281 = sbr.rel (%p278_p3) target bundleno = 655 (0x28f), region = 44 }
   0xe   : > { %p335_p4 = scmp.lt.s32.totalorder %s4423_s21, 1  ;;  %v539_v0 = vlaneseq  ;;  %vm394_vm0 = vcmask 39936   ;;  %v4433_v1 = vmov 1966171168   ;;  %v4493_v3 = vld [vmem:[%s5912_s4] sm:$0xff]   ;;  %v4502_v6 = vld [vmem:[%s5912_s4 + $0x8] sm:$0xff]  }
   0xf   : > { %v537_v2 = vunpack.c.l.s4 %v4433_v1  ;;  %4364 = vmatprep.subr.bf16.mxu1 %v4493_v3  ;;  %vm4523_vm1 = vmpackc.low %vm394_vm0, %vm394_vm0  ;;  %v4542_v14 = vld [vmem:[%s5912_s4 + $0x10] sm:$0xff]   ;;  %v4556_v20 = vld [vmem:[%s5912_s4 + $0x18] sm:$0xff]   ;;  %v4434_v46 = vmov 0   ;;  %vm379_vm2 = vcmask 523264   ;;  %vm3702_vm7 = vcmask 1041409  }
  0x10   : > { %s6061_s21 = smov (!%p335_p4, %s4423_s21), 1  ;;  %v4497_v4 = vshrl.u32 %v539_v0, 7  ;;  %4368 = vmatpush3.bf16.msra.mxu1 %v4493_v3  ;;  %vm3704_vm8 = vcmask 1042434   ;;  %vm3706_vm9 = vcmask 1043459   ;;  %vm3708_vm10 = vcmask 1044484  }
  0x11   : > { %v538_v5 = vunpack.c.0.s8 %v537_v2  ;;  %s4506_s29 = sshll.u32 %s6061_s21, 5  ;;  %s4122_s30 = sshll.u32 %s6061_s21, 4  ;;  %4365 = vmatprep.subr.bf16.mxu1 %v4502_v6  ;;  %vm3710_vm11 = vcmask 1045509   ;;  %vm3712_vm12 = vcmask 1046534   ;;  %vm3714_vm13 = vcmask 1047559  }
  0x12   : > { %s4515_s9 = scalar_lea.vmem %s5909_s1, %s4122_s30  ;;  %s358_s12 = scalar_lea.vmem %s5910_s2, %s4506_s29  ;;  %v4562_v23 = vsub.s32 0, %v4497_v4 }
  0x13   : > { %v4528_v8 = vsub.s32 %v538_v5, %v4497_v4  ;;  %v390_v9 = vld [vmem:[%s358_s12] sm:$0xff]  ;;  %v391_v10 = vld [vmem:[%s358_s12 + $0x8] sm:$0xff]  ;;  %s4536_s15 = scalar_lea.vmem %s5908_s0, %s4506_s29  ;;  %v392_v26 = vld [vmem:[%s358_s12 + $0x10] sm:$0xff]  ;;  %s4578_s26 = scalar_lea.vmem %s5911_s3, %s4122_s30 }
  0x14   : > { %v3934_v11 = vld.sshfl [vmem:[%s4515_s9] sm:$0x33 pattern:$0x75316420]  ;;  %v4352_v12 = vpack.c.bf16 %v391_v10, %v390_v9  ;;  %4369 = vmatpush3.bf16.msra.mxu1 %v4502_v6  ;;  %v393_v27 = vld [vmem:[%s358_s12 + $0x18] sm:$0xff]  ;;  %v386_v40 = vld [vmem:[%s4536_s15 + $0x8] sm:$0xff]  ;;  %s5661_s7 = scalar_lea.vmem %s5914_s6, %s4506_s29 }
  0x15   : > { %v542_v13 = vrot.slane %v3934_v11, %v4528_v8  ;;  %v3937_v15 = vld.sshfl [vmem:[%s4515_s9 + $0xc] sm:$0x33 pattern:$0x75316420]  ;;  %v385_v17 = vld [vmem:[%s4536_s15] sm:$0xff]  ;;  %4366 = vmatprep.subr.bf16.mxu1 %v4542_v14  ;;  %v535_v18 = vcombine.high %v3934_v11, %v3934_v11  ;;  %v4358_v29 = vpack.c.bf16 %v393_v27, %v392_v26  ;;  %v387_v43 = vld [vmem:[%s4536_s15 + $0x10] sm:$0xff] }
  0x16   : > { %4354 = vmatprep.subr.msk.bf16.mxu0 %vm4523_vm1, %v4352_v12  ;;  %v607_v19 = vcombine.high %v3937_v15, %v3937_v15  ;;  %4210 = vmatprep.mubr.msk.f32.mxu0 %vm394_vm0, %v385_v17  ;;  %v4559_v21 = vrot.slane %v3937_v15, %v4528_v8  ;;  %v4587_v36 = vld [vmem:[%s4578_s26] sm:$0xf]  ;;  %v4590_v37 = vld [vmem:[%s4578_s26 + $0x4] sm:$0xf]  ;;  %v4602_v50 = vld [vmem:[%s4578_s26 + $0x8] sm:$0xf] }
  0x17   : > { %v625_v16 = vunpack.i.h.s16 %v542_v13  ;;  %4357 = vmatpush3.bf16.xpose.msk.msra.mxu0 %vm4523_vm1, %v4352_v12  ;;  %v3938_v22 = vpack.i.b16 %v542_v13, %v542_v13  ;;  %v549_v28 = vrot.slane %v535_v18, %v4528_v8  ;;  %v4605_v51 = vld [vmem:[%s4578_s26 + $0xc] sm:$0xf]  ;;  %v388_v52 = vld [vmem:[%s4536_s15 + $0x18] sm:$0xff]  ;;  %v550_v56 = vcombine.high %v542_v13, %v542_v13 }
  0x18   : > { %4370 = vmatpush3.bf16.msra.mxu1 %v4542_v14  ;;  %v4566_v24 = vrot.slane %v607_v19, %v4528_v8  ;;  %4360 = vmatprep.subr.msk.bf16.mxu0 %vm4523_vm1, %v4358_v29 }
  0x19   : > { %v657_v25 = vpack.i.b16 %v625_v16, %v625_v16  ;;  %4367 = vmatprep.subr.bf16.mxu1 %v4556_v20  ;;  %v691_v30 = vrot.slane %v3938_v22, %v4562_v23  ;;  %v3939_v34 = vpack.i.b16 %v549_v28, %v549_v28  ;;  %v627_v39 = vunpack.i.h.s16 %v549_v28 }
  0x1a   : > { %v3940_v63 = vpack.i.b16 %v550_v56, %v550_v56  ;;  %v629_v9 = vunpack.i.h.s16 %v550_v56  ;;  %v551_v10 = vcombine.high %v549_v28, %v549_v28 }
  0x1b   : > { %v695_v31 = vrot.slane %v657_v25, %v4562_v23  ;;  %v817_v32 = vpack.i.b16 %v691_v30, %v691_v30  ;;  %v699_v42 = vrot.slane %v3939_v34, %v4562_v23  ;;  %v659_v49 = vpack.i.b16 %v627_v39, %v627_v39 }
  0x1c   : > { %4371 = vmatpush3.bf16.msra.mxu1 %v4556_v20  ;;  %v707_v7 = vrot.slane %v3940_v63, %v4562_v23  ;;  %v661_v19 = vpack.i.b16 %v629_v9, %v629_v9  ;;  %v3941_v28 = vpack.i.b16 %v551_v10, %v551_v10 }
  0x1d   : > { %v824_v33 = vpack.i.b16 %v695_v31, %v695_v31  ;;  %v822_v35 = vrot.slane %v817_v32, %v4562_v23  ;;  %v831_v54 = vpack.i.b16 %v699_v42, %v699_v42  ;;  %v703_v59 = vrot.slane %v659_v49, %v4562_v23 }
  0x1e   : > { %v845_v18 = vpack.i.b16 %v707_v7, %v707_v7  ;;  %v711_v31 = vrot.slane %v661_v19, %v4562_v23  ;;  %v631_v32 = vunpack.i.h.s16 %v551_v10  ;;  %v715_v42 = vrot.slane %v3941_v28, %v4562_v23 }
  0x1f   : > { %4363 = vmatpush3.bf16.xpose.msk.msra.mxu0 %vm4523_vm1, %v4358_v29  ;;  %v3954_v38 = vcombine.low %v822_v35, %v822_v35  ;;  %v829_v41 = vrot.slane %v824_v33, %v4562_v23  ;;  %v836_v62 = vrot.slane %v831_v54, %v4562_v23  ;;  %v3935_v29 = vld.sshfl [vmem:[%s4515_s9 + $0x4] sm:$0x33 pattern:$0x75316420] }
  0x20   : > { %4216 = vmatprep.subr.bf16.mxu0 %v4493_v3  ;;  %v850_v30 = vrot.slane %v845_v18, %v4562_v23  ;;  %v559_v33 = vcombine.high %v3935_v29, %v3935_v29  ;;  %v859_v54 = vpack.i.b16 %v715_v42, %v715_v42 }
  0x21   : > { %v1168_v44 = vsub.bf16 %v4587_v36, %v3954_v38  ;;  %v1169_v45 = vsub.bf16 %v4590_v37, %v3954_v38  ;;  %v3955_v53 = vcombine.low %v829_v41, %v829_v41  ;;  %v1170_v57 = vsub.bf16 %v4602_v50, %v3954_v38 }
  0x22   : > { %v1171_v58 = vsub.bf16 %v4605_v51, %v3954_v38  ;;  %v3956_v5 = vcombine.low %v836_v62, %v836_v62  ;;  %v4652_v49 = vrot.slane %v559_v33, %v4528_v8 }
  0x23   : > { %v1296_v47 = vmax.bf16 %v4434_v46, %v1168_v44  ;;  %v1297_v48 = vmax.bf16 %v4434_v46, %v1169_v45  ;;  %v1172_v60 = vsub.bf16 %v4587_v36, %v3955_v53  ;;  %v1173_v61 = vsub.bf16 %v4590_v37, %v3955_v53 }
  0x24   : > { %v1298_v0 = vmax.bf16 %v4434_v46, %v1170_v57  ;;  %v1299_v1 = vmax.bf16 %v4434_v46, %v1171_v58  ;;  %v1174_v12 = vsub.bf16 %v4602_v50, %v3955_v53  ;;  %v1175_v13 = vsub.bf16 %v4605_v51, %v3955_v53 }
  0x25   : > { %v3986_v55 = vcombine.low %v1296_v47, %v1297_v48  ;;  %v1300_v2 = vmax.bf16 %v4434_v46, %v1172_v60  ;;  %v1176_v15 = vsub.bf16 %v4587_v36, %v3956_v5  ;;  %v1177_v16 = vsub.bf16 %v4590_v37, %v3956_v5  ;;  %v3936_v60 = vld.sshfl [vmem:[%s4515_s9 + $0x8] sm:$0x33 pattern:$0x75316420] }
  0x26   : > { %4211 = vmatmul.mubr.msk.f32.vlgmr.msra.gmra.mrb[0].mxu0 %vm394_vm0, %v386_v40  ;;  %v3987_v11 = vcombine.low %v1298_v0, %v1299_v1  ;;  %v1302_v22 = vmax.bf16 %v4434_v46, %v1174_v12  ;;  %v1303_v25 = vmax.bf16 %v4434_v46, %v1175_v13  ;;  %v1178_v35 = vsub.bf16 %v4602_v50, %v3956_v5 }
  0x27   : > { %4217 = vmatpush3.bf16.msra.mxu0 %v4493_v3  ;;  %4213 = vmatprep.mubr.msk.f32.mxu0 %vm394_vm0, %v387_v43  ;;  %v1301_v3 = vmax.bf16 %v4434_v46, %v1173_v61  ;;  %v1304_v26 = vmax.bf16 %v4434_v46, %v1176_v15  ;;  %v1179_v38 = vsub.bf16 %v4605_v51, %v3956_v5 }
  0x28   : > { %4218 = vmatprep.subr.bf16.mxu0 %v4502_v6  ;;  %v3989_v34 = vcombine.low %v1302_v22, %v1303_v25  ;;  %v3958_v43 = vcombine.low %v850_v30, %v850_v30  ;;  %v852_v44 = vpack.i.b16 %v711_v31, %v711_v31  ;;  %v663_v45 = vpack.i.b16 %v631_v32, %v631_v32 }
  0x29   : > { %v1306_v47 = vmax.bf16 %v4434_v46, %v1178_v35  ;;  %v1307_v48 = vmax.bf16 %v4434_v46, %v1179_v38  ;;  %v583_v1 = vcombine.high %v3936_v60, %v3936_v60 }
  0x2a   : > { %4214 = vmatmul.mubr.msk.f32.gmra.mrb[2].mxu0 %vm394_vm0, %v388_v52  ;;  %v1184_v56 = vsub.bf16 %v4587_v36, %v3958_v43  ;;  %v857_v57 = vrot.slane %v852_v44, %v4562_v23  ;;  %v719_v58 = vrot.slane %v663_v45, %v4562_v23  ;;  %v1185_v0 = vsub.bf16 %v4590_v37, %v3958_v43 }
  0x2b   : > { %4219 = vmatpush3.bf16.msra.mxu0 %v4502_v6  ;;  %4224 = vmatprep.mubr.msk.bf16.mxu0 %vm379_vm2, %v3986_v55  ;;  %v838_v6 = vpack.i.b16 %v703_v59, %v703_v59  ;;  %v566_v55 = vrot.slane %v3935_v29, %v4528_v8  ;;  %v4663_v59 = vcombine.high %v4652_v49, %v4652_v49 }
  0x2c   : > { %4220 = vmatprep.subr.bf16.mxu0 %v4542_v14  ;;  %v3991_v61 = vcombine.low %v1306_v47, %v1307_v48  ;;  %v1312_v7 = vmax.bf16 %v4434_v46, %v1184_v56  ;;  %v866_v9 = vpack.i.b16 %v719_v58, %v719_v58  ;;  %v1313_v13 = vmax.bf16 %v4434_v46, %v1185_v0 }
  0x2d   : > { %v843_v17 = vrot.slane %v838_v6, %v4562_v23  ;;  %v3942_v5 = vpack.i.b16 %v566_v55, %v566_v55  ;;  %v590_v6 = vrot.slane %v3936_v60, %v4528_v8  ;;  %v639_v10 = vunpack.i.h.s16 %v4663_v59 }
  0x2e   : > { %v4677_v15 = vcombine.high %v566_v55, %v566_v55  ;;  %v1186_v19 = vsub.bf16 %v4602_v50, %v3958_v43  ;;  %v1187_v22 = vsub.bf16 %v4605_v51, %v3958_v43  ;;  %v3994_v30 = vcombine.low %v1312_v7, %v1313_v13 }
  0x2f   : > { %4221 = vmatpush3.bf16.msra.mxu0 %v4542_v14  ;;  %v3988_v14 = vcombine.low %v1300_v2, %v1301_v3  ;;  %v3957_v27 = vcombine.low %v843_v17, %v843_v17  ;;  %v864_v3 = vrot.slane %v859_v54, %v4562_v23  ;;  %v4683_v18 = vcombine.high %v590_v6, %v590_v6 }
  0x30   : > { %4222 = vmatprep.subr.bf16.mxu0 %v4556_v20  ;;  %v723_v25 = vrot.slane %v3942_v5, %v4562_v23  ;;  %v671_v28 = vpack.i.b16 %v639_v10, %v639_v10  ;;  %v641_v38 = vunpack.i.h.s16 %v590_v6 }
  0x31   : > { %v1180_v40 = vsub.bf16 %v4587_v36, %v3957_v27  ;;  %v1181_v41 = vsub.bf16 %v4590_v37, %v3957_v27  ;;  %v1182_v62 = vsub.bf16 %v4602_v50, %v3957_v27  ;;  %v1183_v63 = vsub.bf16 %v4605_v51, %v3957_v27 }
  0x32   : > { %v3960_v17 = vcombine.low %v864_v3, %v864_v3  ;;  %v871_v27 = vrot.slane %v866_v9, %v4562_v23  ;;  %v751_v45 = vrot.slane %v671_v28, %v4562_v23  ;;  %v673_v60 = vpack.i.b16 %v641_v38, %v641_v38 }
  0x33   : > { %4223 = vmatpush3.bf16.msra.mxu0 %v4556_v20  ;;  %v1305_v20 = vmax.bf16 %v4434_v46, %v1177_v16  ;;  %v1308_v52 = vmax.bf16 %v4434_v46, %v1180_v40  ;;  %v1309_v53 = vmax.bf16 %v4434_v46, %v1181_v41  ;;  %v1311_v12 = vmax.bf16 %v4434_v46, %v1183_v63 }
  0x34   : > { %v4680_v16 = vrot.slane %v583_v1, %v4528_v8  ;;  %v1193_v35 = vsub.bf16 %v4590_v37, %v3960_v17  ;;  %v1315_v40 = vmax.bf16 %v4434_v46, %v1187_v22  ;;  %v873_v41 = vpack.i.b16 %v723_v25, %v723_v25 }
  0x35   : > { %v3990_v39 = vcombine.low %v1304_v26, %v1305_v20  ;;  %v3992_v2 = vcombine.low %v1308_v52, %v1309_v53  ;;  %v633_v26 = vunpack.i.h.s16 %v566_v55  ;;  %v3946_v20 = vpack.i.b16 %v590_v6, %v590_v6 }
  0x36   : > { %4225 = vmatmul.mubr.msk.bf16.vlgmr.msra.gmra.mrb[4].mxu0 %vm379_vm2, %v3987_v11  ;;  %v1310_v11 = vmax.bf16 %v4434_v46, %v1182_v62  ;;  %v1194_v42 = vsub.bf16 %v4602_v50, %v3960_v17  ;;  %v1195_v43 = vsub.bf16 %v4605_v51, %v3960_v17  ;;  %v3961_v44 = vcombine.low %v871_v27, %v871_v27 }
  0x37   : > { %4228 = vmatprep.mubr.msk.bf16.mxu0 %vm379_vm2, %v3988_v14  ;;  %v3959_v14 = vcombine.low %v857_v57, %v857_v57  ;;  %v4702_v47 = vcombine.high %v4680_v16, %v4680_v16  ;;  %v755_v53 = vrot.slane %v3946_v20, %v4562_v23  ;;  %v4719_v57 = vmax.bf16 %v4434_v46, %v1193_v35 }
  0x38   : > { %v3993_v29 = vcombine.low %v1310_v11, %v1311_v12  ;;  %v665_v58 = vpack.i.b16 %v633_v26, %v633_v26  ;;  %v878_v62 = vrot.slane %v873_v41, %v4562_v23  ;;  %v4723_v63 = vmax.bf16 %v4434_v46, %v1194_v42 }
  0x39   : > { %v1188_v8 = vsub.bf16 %v4587_v36, %v3959_v14  ;;  %v1189_v31 = vsub.bf16 %v4590_v37, %v3959_v14  ;;  %v1190_v32 = vsub.bf16 %v4602_v50, %v3959_v14  ;;  %v1191_v33 = vsub.bf16 %v4605_v51, %v3959_v14 }
  0x3a   : > { %v4726_v0 = vmax.bf16 %v4434_v46, %v1195_v43  ;;  %v1196_v1 = vsub.bf16 %v4587_v36, %v3961_v44  ;;  %v1197_v5 = vsub.bf16 %v4590_v37, %v3961_v44  ;;  %v1198_v6 = vsub.bf16 %v4602_v50, %v3961_v44 }
  0x3b   : > { %v1316_v48 = vmax.bf16 %v4434_v46, %v1188_v8  ;;  %v1317_v52 = vmax.bf16 %v4434_v46, %v1189_v31  ;;  %v4710_v54 = vmax.bf16 %v4434_v46, %v1190_v32  ;;  %v4713_v55 = vmax.bf16 %v4434_v46, %v1191_v33 }
  0x3c   : > { %v929_v7 = vpack.i.b16 %v755_v53, %v755_v53  ;;  %v1199_v11 = vsub.bf16 %v4605_v51, %v3961_v44  ;;  %v4737_v13 = vcombine.low %v878_v62, %v878_v62  ;;  %v3999_v22 = vcombine.low %v4723_v63, %v4726_v0 }
  0x3d   : > { %v3996_v3 = vcombine.low %v1316_v48, %v1317_v52  ;;  %v3997_v9 = vcombine.low %v4710_v54, %v4713_v55  ;;  %v4746_v25 = vmax.bf16 %v4434_v46, %v1196_v1  ;;  %v727_v26 = vrot.slane %v665_v58, %v4562_v23 }
  0x3e   : > { %4229 = vmatmul.mubr.msk.bf16.gmra.mrb[8].mxu0 %vm379_vm2, %v3989_v34  ;;  %v1192_v34 = vsub.bf16 %v4587_v36, %v3960_v17  ;;  %v934_v14 = vrot.slane %v929_v7, %v4562_v23  ;;  %v759_v17 = vrot.slane %v673_v60, %v4562_v23  ;;  %v4751_v27 = vmax.bf16 %v4434_v46, %v1197_v5 }
  0x3f   : > { %4232 = vmatprep.mubr.msk.bf16.mxu0 %vm379_vm2, %v3990_v39  ;;  %v1314_v39 = vmax.bf16 %v4434_v46, %v1186_v19  ;;  %v3947_v19 = vpack.i.b16 %v4680_v16, %v4680_v16  ;;  %v4754_v28 = vmax.bf16 %v4434_v46, %v1198_v6  ;;  %v1200_v35 = vsub.bf16 %v4587_v36, %v4737_v13 }
  0x40   : > { %v4716_v56 = vmax.bf16 %v4434_v46, %v1192_v34  ;;  %v4763_v34 = vmax.bf16 %v4434_v46, %v1199_v11  ;;  %v936_v38 = vpack.i.b16 %v759_v17, %v759_v17  ;;  %v1201_v43 = vsub.bf16 %v4590_v37, %v4737_v13 }
  0x41   : > { %v1202_v44 = vsub.bf16 %v4602_v50, %v4737_v13  ;;  %v3948_v60 = vpack.i.b16 %v4683_v18, %v4683_v18  ;;  %v1203_v11 = vsub.bf16 %v4605_v51, %v4737_v13 }
  0x42   : > { %v3998_v10 = vcombine.low %v4716_v56, %v4719_v57  ;;  %v3943_v56 = vpack.i.b16 %v4652_v49, %v4652_v49  ;;  %v941_v1 = vrot.slane %v936_v38, %v4562_v23  ;;  %v4001_v63 = vcombine.low %v4754_v28, %v4763_v34 }
  0x43   : > { %v1330_v0 = vmax.bf16 %v4434_v46, %v1202_v44 }
  0x46   : > { %4233 = vmatmul.mubr.msk.bf16.gmra.mrb[12].mxu0 %vm379_vm2, %v3991_v61  ;;  %v3995_v61 = vcombine.low %v1314_v39, %v1315_v40  ;;  %v763_v39 = vrot.slane %v3947_v19, %v4562_v23  ;;  %v731_v19 = vrot.slane %v3943_v56, %v4562_v23 }
  0x47   : > { %4236 = vmatprep.mubr.msk.bf16.mxu0 %vm379_vm2, %v3992_v2  ;;  %v922_v2 = vpack.i.b16 %v751_v45, %v751_v45  ;;  %v880_v45 = vpack.i.b16 %v727_v26, %v727_v26 }
  0x49   : > { %v927_v12 = vrot.slane %v922_v2, %v4562_v23  ;;  %v943_v2 = vpack.i.b16 %v763_v39, %v763_v39 }
  0x4b   : > { %v3969_v20 = vcombine.low %v927_v12, %v927_v12  ;;  %v948_v17 = vrot.slane %v943_v2, %v4562_v23 }
  0x4d   : > { %v1228_v8 = vsub.bf16 %v4587_v36, %v3969_v20  ;;  %v1229_v31 = vsub.bf16 %v4590_v37, %v3969_v20  ;;  %v1230_v32 = vsub.bf16 %v4602_v50, %v3969_v20  ;;  %v1231_v33 = vsub.bf16 %v4605_v51, %v3969_v20 }
  0x4e   : > { %4237 = vmatmul.mubr.msk.bf16.gmra.mrb[16].mxu0 %vm379_vm2, %v3993_v29  ;;  %v3970_v29 = vcombine.low %v934_v14, %v934_v14  ;;  %v3971_v14 = vcombine.low %v941_v1, %v941_v1 }
  0x4f   : > { %4240 = vmatprep.mubr.msk.bf16.mxu0 %vm379_vm2, %v3994_v30  ;;  %v643_v30 = vunpack.i.h.s16 %v4680_v16  ;;  %v1356_v16 = vmax.bf16 %v4434_v46, %v1228_v8  ;;  %v1357_v40 = vmax.bf16 %v4434_v46, %v1229_v31  ;;  %v1358_v41 = vmax.bf16 %v4434_v46, %v1230_v32 }
  0x50   : > { %v1359_v42 = vmax.bf16 %v4434_v46, %v1231_v33  ;;  %v1232_v54 = vsub.bf16 %v4587_v36, %v3970_v29  ;;  %v1233_v55 = vsub.bf16 %v4590_v37, %v3970_v29  ;;  %v1234_v57 = vsub.bf16 %v4602_v50, %v3970_v29 }
  0x51   : > { %v675_v48 = vpack.i.b16 %v643_v30, %v643_v30  ;;  %v4016_v52 = vcombine.low %v1356_v16, %v1357_v40  ;;  %v1235_v58 = vsub.bf16 %v4605_v51, %v3970_v29  ;;  %v1236_v20 = vsub.bf16 %v4587_v36, %v3971_v14 }
  0x52   : > { %v4017_v53 = vcombine.low %v1358_v41, %v1359_v42  ;;  %v1361_v62 = vmax.bf16 %v4434_v46, %v1233_v55  ;;  %v1362_v5 = vmax.bf16 %v4434_v46, %v1234_v57  ;;  %v771_v29 = vrot.slane %v3948_v60, %v4562_v23 }
  0x53   : > { %4284 = vmatprep.mubr.msk.bf16.mxu1 %vm379_vm2, %v4016_v52  ;;  %v1363_v6 = vmax.bf16 %v4434_v46, %v1235_v58  ;;  %v767_v7 = vrot.slane %v675_v48, %v4562_v23  ;;  %v645_v30 = vunpack.i.h.s16 %v4683_v18  ;;  %v1238_v31 = vsub.bf16 %v4602_v50, %v3971_v14 }
  0x54   : > { %4285 = vmatmul.mubr.msk.bf16.vlgmr.msra.gmra.mrb[0].mxu1 %vm379_vm2, %v4017_v53  ;;  %v1328_v32 = vmax.bf16 %v4434_v46, %v1200_v35  ;;  %v1364_v33 = vmax.bf16 %v4434_v46, %v1236_v20  ;;  %v1329_v16 = vmax.bf16 %v4434_v46, %v1201_v43  ;;  %v957_v53 = vpack.i.b16 %v771_v29, %v771_v29 }
  0x55   : > { %v950_v26 = vpack.i.b16 %v767_v7, %v767_v7  ;;  %v4019_v8 = vcombine.low %v1362_v5, %v1363_v6  ;;  %v677_v52 = vpack.i.b16 %v645_v30, %v645_v30  ;;  %v1366_v35 = vmax.bf16 %v4434_v46, %v1238_v31 }
  0x56   : > { %4241 = vmatmul.mubr.msk.bf16.gmra.mrb[20].mxu0 %vm379_vm2, %v3995_v61  ;;  %v1360_v61 = vmax.bf16 %v4434_v46, %v1232_v54  ;;  %v962_v13 = vrot.slane %v957_v53, %v4562_v23  ;;  %v4002_v1 = vcombine.low %v1328_v32, %v1329_v16  ;;  %v637_v20 = vunpack.i.h.s16 %v4677_v15 }
  0x57   : > { %4244 = vmatprep.mubr.msk.bf16.mxu0 %vm379_vm2, %v3996_v3  ;;  %v635_v3 = vunpack.i.h.s16 %v4652_v49  ;;  %v4000_v49 = vcombine.low %v4746_v25, %v4751_v27  ;;  %v1239_v25 = vsub.bf16 %v4605_v51, %v3971_v14  ;;  %v3972_v27 = vcombine.low %v948_v17, %v948_v17 }
  0x58   : > { %v4018_v12 = vcombine.low %v1360_v61, %v1361_v62  ;;  %v955_v39 = vrot.slane %v950_v26, %v4562_v23  ;;  %v775_v44 = vrot.slane %v677_v52, %v4562_v23  ;;  %v3949_v30 = vpack.i.b16 %v4702_v47, %v4702_v47 }
  0x59   : > { %v667_v40 = vpack.i.b16 %v635_v3, %v635_v3  ;;  %v1240_v41 = vsub.bf16 %v4587_v36, %v3972_v27  ;;  %v1241_v18 = vsub.bf16 %v4590_v37, %v3972_v27  ;;  %v1367_v43 = vmax.bf16 %v4434_v46, %v1239_v25 }
  0x5a   : > { %4288 = vmatprep.mubr.msk.bf16.mxu1 %vm379_vm2, %v4018_v12  ;;  %v3973_v56 = vcombine.low %v955_v39, %v955_v39  ;;  %v1242_v62 = vsub.bf16 %v4602_v50, %v3972_v27  ;;  %v1243_v34 = vsub.bf16 %v4605_v51, %v3972_v27  ;;  %v964_v26 = vpack.i.b16 %v775_v44, %v775_v44 }
  0x5b   : > { %v1368_v54 = vmax.bf16 %v4434_v46, %v1240_v41  ;;  %v1369_v55 = vmax.bf16 %v4434_v46, %v1241_v18  ;;  %v735_v57 = vrot.slane %v667_v40, %v4562_v23  ;;  %v4021_v28 = vcombine.low %v1366_v35, %v1367_v43 }
  0x5c   : > { %4289 = vmatmul.mubr.msk.bf16.gmra.mrb[4].mxu1 %vm379_vm2, %v4019_v8  ;;  %v1244_v3 = vsub.bf16 %v4587_v36, %v3973_v56  ;;  %v1245_v5 = vsub.bf16 %v4590_v37, %v3973_v56  ;;  %v1247_v16 = vsub.bf16 %v4605_v51, %v3973_v56  ;;  %v969_v41 = vrot.slane %v964_v26, %v4562_v23 }
  0x5d   : > { %v4022_v2 = vcombine.low %v1368_v54, %v1369_v55  ;;  %v894_v7 = vpack.i.b16 %v735_v57, %v735_v57  ;;  %v669_v53 = vpack.i.b16 %v637_v20, %v637_v20 }
  0x5e   : > { %4245 = vmatmul.mubr.msk.bf16.gmra.mrb[24].mxu0 %vm379_vm2, %v3997_v9  ;;  %v885_v9 = vrot.slane %v880_v45, %v4562_v23  ;;  %v887_v45 = vpack.i.b16 %v731_v19, %v731_v19  ;;  %v4858_v19 = vcombine.low %v962_v13, %v962_v13  ;;  %v1373_v29 = vmax.bf16 %v4434_v46, %v1245_v5 }
  0x5f   : > { %4248 = vmatprep.mubr.msk.bf16.mxu0 %vm379_vm2, %v3998_v10  ;;  %v1237_v10 = vsub.bf16 %v4590_v37, %v3971_v14  ;;  %v899_v25 = vrot.slane %v894_v7, %v4562_v23 }
  0x60   : > { %v4816_v42 = vcombine.low %v885_v9, %v885_v9  ;;  %v892_v61 = vrot.slane %v887_v45, %v4562_v23  ;;  %v1371_v9 = vmax.bf16 %v4434_v46, %v1243_v34  ;;  %v1248_v40 = vsub.bf16 %v4587_v36, %v4858_v19 }
  0x61   : > { %v1365_v38 = vmax.bf16 %v4434_v46, %v1237_v10  ;;  %v1372_v10 = vmax.bf16 %v4434_v46, %v1244_v3  ;;  %v779_v45 = vrot.slane %v3949_v30, %v4562_v23  ;;  %v743_v34 = vrot.slane %v669_v53, %v4562_v23 }
  0x62   : > { %v1204_v58 = vsub.bf16 %v4587_v36, %v4816_v42  ;;  %v1205_v60 = vsub.bf16 %v4590_v37, %v4816_v42  ;;  %v4852_v17 = vcombine.low %v892_v61, %v892_v61  ;;  %v1206_v8 = vsub.bf16 %v4602_v50, %v4816_v42 }
  0x63   : > { %v4020_v48 = vcombine.low %v1364_v33, %v1365_v38  ;;  %v1207_v31 = vsub.bf16 %v4605_v51, %v4816_v42  ;;  %v1246_v38 = vsub.bf16 %v4602_v50, %v3973_v56  ;;  %v4024_v18 = vcombine.low %v1372_v10, %v1373_v29 }
  0x64   : > { %v1332_v12 = vmax.bf16 %v4434_v46, %v1204_v58  ;;  %v1333_v14 = vmax.bf16 %v4434_v46, %v1205_v60  ;;  %v1208_v32 = vsub.bf16 %v4587_v36, %v4852_v17  ;;  %v1209_v33 = vsub.bf16 %v4590_v37, %v4852_v17 }
  0x65   : > { %4292 = vmatprep.mubr.msk.bf16.mxu1 %vm379_vm2, %v4020_v48  ;;  %v1249_v42 = vsub.bf16 %v4590_v37, %v4858_v19  ;;  %v647_v48 = vunpack.i.h.s16 %v4702_v47  ;;  %v1334_v52 = vmax.bf16 %v4434_v46, %v1206_v8  ;;  %v1335_v35 = vmax.bf16 %v4434_v46, %v1207_v31 }
  0x66   : > { %4249 = vmatmul.mubr.msk.bf16.gmra.mrb[28].mxu0 %vm379_vm2, %v3999_v22  ;;  %v1331_v22 = vmax.bf16 %v4434_v46, %v1203_v11  ;;  %v3944_v11 = vpack.i.b16 %v4677_v15, %v4677_v15  ;;  %4293 = vmatmul.mubr.msk.bf16.gmra.mrb[8].mxu1 %vm379_vm2, %v4021_v28  ;;  %v4004_v15 = vcombine.low %v1332_v12, %v1333_v14 }
  0x67   : > { %4252 = vmatprep.mubr.msk.bf16.mxu0 %vm379_vm2, %v4000_v49  ;;  %v1370_v49 = vmax.bf16 %v4434_v46, %v1242_v62  ;;  %4296 = vmatprep.mubr.msk.bf16.mxu1 %vm379_vm2, %v4022_v2  ;;  %v1336_v54 = vmax.bf16 %v4434_v46, %v1208_v32  ;;  %v1337_v55 = vmax.bf16 %v4434_v46, %v1209_v33 }
  0x68   : > { %v4003_v6 = vcombine.low %v1330_v0, %v1331_v22  ;;  %v739_v27 = vrot.slane %v3944_v11, %v4562_v23  ;;  %v4890_v56 = vcombine.low %v899_v25, %v899_v25  ;;  %v1375_v47 = vmax.bf16 %v4434_v46, %v1247_v16 }
  0x69   : > { %v4023_v39 = vcombine.low %v1370_v49, %v1371_v9  ;;  %v1376_v0 = vmax.bf16 %v4434_v46, %v1248_v40  ;;  %v4897_v22 = vcombine.low %v969_v41, %v969_v41  ;;  %v1377_v57 = vmax.bf16 %v4434_v46, %v1249_v42 }
  0x6a   : > { %v901_v43 = vpack.i.b16 %v739_v27, %v739_v27  ;;  %v971_v58 = vpack.i.b16 %v779_v45, %v779_v45  ;;  %v679_v60 = vpack.i.b16 %v647_v48, %v647_v48  ;;  %v4005_v61 = vcombine.low %v1334_v52, %v1335_v35 }
  0x6b   : > { %v1210_v62 = vsub.bf16 %v4602_v50, %v4852_v17  ;;  %v4006_v13 = vcombine.low %v1336_v54, %v1337_v55  ;;  %v1211_v44 = vsub.bf16 %v4605_v51, %v4852_v17  ;;  %v1213_v2 = vsub.bf16 %v4590_v37, %v4890_v56 }
  0x6c   : > { %v906_v28 = vrot.slane %v901_v43, %v4562_v23  ;;  %v1250_v5 = vsub.bf16 %v4602_v50, %v4858_v19  ;;  %v1252_v7 = vsub.bf16 %v4587_v36, %v4897_v22  ;;  %v4026_v11 = vcombine.low %v1376_v0, %v1377_v57 }
  0x6d   : > { %v1253_v12 = vsub.bf16 %v4590_v37, %v4897_v22  ;;  %v976_v14 = vrot.slane %v971_v58, %v4562_v23  ;;  %v783_v17 = vrot.slane %v679_v60, %v4562_v23  ;;  %v3950_v49 = vpack.i.b16 %v4559_v21, %v4559_v21 }
  0x6e   : > { %4253 = vmatmul.mubr.msk.bf16.gmra.mrb[32].mxu0 %vm379_vm2, %v4001_v63  ;;  %v1374_v63 = vmax.bf16 %v4434_v46, %v1246_v38  ;;  %4297 = vmatmul.mubr.msk.bf16.gmra.mrb[12].mxu1 %vm379_vm2, %v4023_v39  ;;  %v4924_v9 = vcombine.low %v906_v28, %v906_v28  ;;  %v908_v26 = vpack.i.b16 %v743_v34, %v743_v34 }
  0x6f   : > { %4256 = vmatprep.mubr.msk.bf16.mxu0 %vm379_vm2, %v4002_v1  ;;  %4300 = vmatprep.mubr.msk.bf16.mxu1 %vm379_vm2, %v4024_v18  ;;  %v1212_v1 = vsub.bf16 %v4587_v36, %v4890_v56  ;;  %v1338_v20 = vmax.bf16 %v4434_v46, %v1210_v62  ;;  %v1339_v10 = vmax.bf16 %v4434_v46, %v1211_v44 }
  0x70   : > { %v4025_v3 = vcombine.low %v1374_v63, %v1375_v47  ;;  %v1341_v30 = vmax.bf16 %v4434_v46, %v1213_v2  ;;  %v1378_v8 = vmax.bf16 %v4434_v46, %v1250_v5  ;;  %v1380_v25 = vmax.bf16 %v4434_v46, %v1252_v7 }
  0x71   : > { %v1340_v29 = vmax.bf16 %v4434_v46, %v1212_v1  ;;  %v1381_v27 = vmax.bf16 %v4434_v46, %v1253_v12  ;;  %v978_v32 = vpack.i.b16 %v783_v17, %v783_v17  ;;  %v1214_v33 = vsub.bf16 %v4602_v50, %v4890_v56 }
  0x72   : > { %v1215_v38 = vsub.bf16 %v4605_v51, %v4890_v56  ;;  %v913_v39 = vrot.slane %v908_v26, %v4562_v23  ;;  %v4007_v40 = vcombine.low %v1338_v20, %v1339_v10  ;;  %v1216_v18 = vsub.bf16 %v4587_v36, %v4924_v9 }
  0x73   : > { %v4008_v41 = vcombine.low %v1340_v29, %v1341_v30  ;;  %v1217_v42 = vsub.bf16 %v4590_v37, %v4924_v9  ;;  %v1254_v48 = vsub.bf16 %v4602_v50, %v4897_v22  ;;  %v1255_v52 = vsub.bf16 %v4605_v51, %v4897_v22 }
  0x74   : > { %v787_v35 = vrot.slane %v3950_v49, %v4562_v23  ;;  %v4028_v43 = vcombine.low %v1380_v25, %v1381_v27  ;;  %v983_v55 = vrot.slane %v978_v32, %v4562_v23  ;;  %v1342_v63 = vmax.bf16 %v4434_v46, %v1214_v33 }
  0x75   : > { %v1343_v47 = vmax.bf16 %v4434_v46, %v1215_v38  ;;  %v1344_v0 = vmax.bf16 %v4434_v46, %v1216_v18  ;;  %v1345_v57 = vmax.bf16 %v4434_v46, %v1217_v42  ;;  %v3967_v58 = vcombine.low %v913_v39, %v913_v39 }
  0x76   : > { %4257 = vmatmul.mubr.msk.bf16.gmra.mrb[36].mxu0 %vm379_vm2, %v4003_v6  ;;  %v1251_v6 = vsub.bf16 %v4605_v51, %v4858_v19  ;;  %v3945_v19 = vpack.i.b16 %v4663_v59, %v4663_v59  ;;  %4301 = vmatmul.mubr.msk.bf16.gmra.mrb[16].mxu1 %vm379_vm2, %v4025_v3  ;;  %v649_v59 = vunpack.i.h.s16 %v4559_v21  ;;  %v1382_v60 = vmax.bf16 %v4434_v46, %v1254_v48 }
  0x77   : > { %4260 = vmatprep.mubr.msk.bf16.mxu0 %vm379_vm2, %v4004_v15  ;;  %4304 = vmatprep.mubr.msk.bf16.mxu1 %vm379_vm2, %v4026_v11  ;;  %v3976_v15 = vcombine.low %v976_v14, %v976_v14  ;;  %v985_v62 = vpack.i.b16 %v787_v35, %v787_v35  ;;  %v4009_v44 = vcombine.low %v1342_v63, %v1343_v47 }
  0x78   : > { %v1379_v31 = vmax.bf16 %v4434_v46, %v1251_v6  ;;  %v747_v16 = vrot.slane %v3945_v19, %v4562_v23  ;;  %v681_v56 = vpack.i.b16 %v649_v59, %v649_v59  ;;  %v1218_v1 = vsub.bf16 %v4602_v50, %v4924_v9 }
  0x79   : > { %v1256_v53 = vsub.bf16 %v4587_v36, %v3976_v15  ;;  %v1257_v54 = vsub.bf16 %v4590_v37, %v3976_v15  ;;  %v1219_v2 = vsub.bf16 %v4605_v51, %v4924_v9  ;;  %v1220_v3 = vsub.bf16 %v4587_v36, %v3967_v58 }
  0x7a   : > { %v4027_v45 = vcombine.low %v1378_v8, %v1379_v31  ;;  %v915_v22 = vpack.i.b16 %v747_v16, %v747_v16  ;;  %v1221_v5 = vsub.bf16 %v4590_v37, %v3967_v58  ;;  %v1258_v7 = vsub.bf16 %v4602_v50, %v3976_v15 }
  0x7b   : > { %v1384_v28 = vmax.bf16 %v4434_v46, %v1256_v53  ;;  %v1385_v34 = vmax.bf16 %v4434_v46, %v1257_v54  ;;  %v1259_v12 = vsub.bf16 %v4605_v51, %v3976_v15  ;;  %v990_v14 = vrot.slane %v985_v62, %v4562_v23 }
  0x7c   : > { %v920_v6 = vrot.slane %v915_v22, %v4562_v23  ;;  %v791_v17 = vrot.slane %v681_v56, %v4562_v23  ;;  %v4010_v49 = vcombine.low %v1344_v0, %v1345_v57  ;;  %v1346_v20 = vmax.bf16 %v4434_v46, %v1218_v1 }
  0x7d   : > { %v4030_v26 = vcombine.low %v1384_v28, %v1385_v34  ;;  %v1347_v10 = vmax.bf16 %v4434_v46, %v1219_v2  ;;  %v1348_v29 = vmax.bf16 %v4434_v46, %v1220_v3  ;;  %v1349_v30 = vmax.bf16 %v4434_v46, %v1221_v5 }
  0x7e   : > { %4261 = vmatmul.mubr.msk.bf16.gmra.mrb[40].mxu0 %vm379_vm2, %v4005_v61  ;;  %4305 = vmatmul.mubr.msk.bf16.gmra.mrb[20].mxu1 %vm379_vm2, %v4027_v45  ;;  %v1383_v61 = vmax.bf16 %v4434_v46, %v1255_v52  ;;  %v3968_v8 = vcombine.low %v920_v6, %v920_v6  ;;  %v1386_v31 = vmax.bf16 %v4434_v46, %v1258_v7  ;;  %v651_v56 = vunpack.i.h.s16 %v4566_v24 }
  0x7f   : > { %4264 = vmatprep.mubr.msk.bf16.mxu0 %vm379_vm2, %v4006_v13  ;;  %4308 = vmatprep.mubr.msk.bf16.mxu1 %vm379_vm2, %v4028_v43  ;;  %v3977_v13 = vcombine.low %v983_v55, %v983_v55  ;;  %v1387_v25 = vmax.bf16 %v4434_v46, %v1259_v12  ;;  %v3978_v59 = vcombine.low %v990_v14, %v990_v14 }
  0x80   : > { %v4029_v11 = vcombine.low %v1382_v60, %v1383_v61  ;;  %v992_v27 = vpack.i.b16 %v791_v17, %v791_v17  ;;  %v3951_v33 = vpack.i.b16 %v4566_v24, %v4566_v24  ;;  %v1222_v38 = vsub.bf16 %v4602_v50, %v3967_v58 }
  0x81   : > { %v1260_v19 = vsub.bf16 %v4587_v36, %v3977_v13  ;;  %v1261_v9 = vsub.bf16 %v4590_v37, %v3977_v13  ;;  %v1223_v39 = vsub.bf16 %v4605_v51, %v3967_v58  ;;  %v4011_v16 = vcombine.low %v1346_v20, %v1347_v10 }
  0x82   : > { %v1262_v18 = vsub.bf16 %v4602_v50, %v3977_v13  ;;  %v4031_v42 = vcombine.low %v1386_v31, %v1387_v25  ;;  %v1263_v45 = vsub.bf16 %v4605_v51, %v3977_v13  ;;  %v1264_v48 = vsub.bf16 %v4587_v36, %v3978_v59 }
  0x83   : > { %v1388_v15 = vmax.bf16 %v4434_v46, %v1260_v19  ;;  %v1389_v32 = vmax.bf16 %v4434_v46, %v1261_v9  ;;  %v997_v52 = vrot.slane %v992_v27, %v4562_v23  ;;  %v4012_v35 = vcombine.low %v1348_v29, %v1349_v30 }
  0x84   : > { %v1265_v53 = vsub.bf16 %v4590_v37, %v3978_v59  ;;  %v795_v54 = vrot.slane %v3951_v33, %v4562_v23  ;;  %v1350_v55 = vmax.bf16 %v4434_v46, %v1222_v38  ;;  %v1351_v63 = vmax.bf16 %v4434_v46, %v1223_v39 }
  0x85   : > { %v4032_v43 = vcombine.low %v1388_v15, %v1389_v32  ;;  %v1390_v57 = vmax.bf16 %v4434_v46, %v1262_v18  ;;  %v1391_v58 = vmax.bf16 %v4434_v46, %v1263_v45  ;;  %v1392_v22 = vmax.bf16 %v4434_v46, %v1264_v48 }
  0x86   : > { %4265 = vmatmul.mubr.msk.bf16.gmra.mrb[44].mxu0 %vm379_vm2, %v4007_v40  ;;  %4309 = vmatmul.mubr.msk.bf16.gmra.mrb[24].mxu1 %vm379_vm2, %v4029_v11  ;;  %v1224_v40 = vsub.bf16 %v4587_v36, %v3968_v8  ;;  %v3979_v60 = vcombine.low %v997_v52, %v997_v52  ;;  %v1393_v61 = vmax.bf16 %v4434_v46, %v1265_v53 }
  0x87   : > { %4268 = vmatprep.mubr.msk.bf16.mxu0 %vm379_vm2, %v4008_v41  ;;  %4312 = vmatprep.mubr.msk.bf16.mxu1 %vm379_vm2, %v4030_v26  ;;  %v1225_v41 = vsub.bf16 %v4590_v37, %v3968_v8  ;;  %v999_v62 = vpack.i.b16 %v795_v54, %v795_v54  ;;  %v683_v28 = vpack.i.b16 %v651_v56, %v651_v56 }
  0x88   : > { %v1352_v47 = vmax.bf16 %v4434_v46, %v1224_v40  ;;  %v622_v34 = vcombine.high %v4559_v21, %v4559_v21  ;;  %v4013_v13 = vcombine.low %v1350_v55, %v1351_v63  ;;  %v1227_v1 = vsub.bf16 %v4605_v51, %v3968_v8 }
  0x89   : > { %v1353_v0 = vmax.bf16 %v4434_v46, %v1225_v41  ;;  %v1266_v2 = vsub.bf16 %v4602_v50, %v3978_v59  ;;  %v4033_v5 = vcombine.low %v1390_v57, %v1391_v58  ;;  %v1267_v6 = vsub.bf16 %v4605_v51, %v3978_v59 }
  0x8a   : > { %v1268_v7 = vsub.bf16 %v4587_v36, %v3979_v60  ;;  %v4034_v11 = vcombine.low %v1392_v22, %v1393_v61  ;;  %v1269_v12 = vsub.bf16 %v4590_v37, %v3979_v60  ;;  %v1004_v14 = vrot.slane %v999_v62, %v4562_v23 }
  0x8b   : > { %v4014_v3 = vcombine.low %v1352_v47, %v1353_v0  ;;  %v799_v21 = vrot.slane %v683_v28, %v4562_v23  ;;  %v1394_v26 = vmax.bf16 %v4434_v46, %v1266_v2  ;;  %v1395_v19 = vmax.bf16 %v4434_v46, %v1267_v6  ;;  %v4404_v28 = vld [vmem:[%s4578_s26] sm:$0xf] }
  0x8c   : > { %v1396_v9 = vmax.bf16 %v4434_v46, %v1268_v7  ;;  %v3952_v20 = vpack.i.b16 %v622_v34, %v622_v34  ;;  %v1397_v10 = vmax.bf16 %v4434_v46, %v1269_v12  ;;  %v3980_v29 = vcombine.low %v1004_v14, %v1004_v14 }
  0x8d   : > { %v1006_v30 = vpack.i.b16 %v799_v21, %v799_v21  ;;  %v4035_v31 = vcombine.low %v1394_v26, %v1395_v19  ;;  %v1270_v25 = vsub.bf16 %v4602_v50, %v3979_v60  ;;  %v1271_v59 = vsub.bf16 %v4605_v51, %v3979_v60  ;;  %v4407_v19 = vld [vmem:[%s4578_s26 + $0xc] sm:$0xf] }
  0x8e   : > { %4269 = vmatmul.mubr.msk.bf16.gmra.mrb[48].mxu0 %vm379_vm2, %v4009_v44  ;;  %4313 = vmatmul.mubr.msk.bf16.gmra.mrb[28].mxu1 %vm379_vm2, %v4031_v42  ;;  %v1226_v44 = vsub.bf16 %v4602_v50, %v3968_v8  ;;  %v803_v27 = vrot.slane %v3952_v20, %v4562_v23  ;;  %v4036_v15 = vcombine.low %v1396_v9, %v1397_v10  ;;  %v653_v39 = vunpack.i.h.s16 %v622_v34 }
  0x8f   : > { %4272 = vmatprep.mubr.msk.bf16.mxu0 %vm379_vm2, %v4010_v49  ;;  %4316 = vmatprep.mubr.msk.bf16.mxu1 %vm379_vm2, %v4032_v43  ;;  %v1355_v49 = vmax.bf16 %v4434_v46, %v1227_v1  ;;  %v1272_v32 = vsub.bf16 %v4587_v36, %v3980_v29  ;;  %v1273_v33 = vsub.bf16 %v4590_v37, %v3980_v29 }
  0x90   : > { %v1354_v17 = vmax.bf16 %v4434_v46, %v1226_v44  ;;  %v1011_v38 = vrot.slane %v1006_v30, %v4562_v23  ;;  %v1399_v40 = vmax.bf16 %v4434_v46, %v1271_v59  ;;  %v1013_v41 = vpack.i.b16 %v803_v27, %v803_v27 }
  0x91   : > { %v1400_v18 = vmax.bf16 %v4434_v46, %v1272_v32  ;;  %v1401_v42 = vmax.bf16 %v4434_v46, %v1273_v33  ;;  %v685_v48 = vpack.i.b16 %v653_v39, %v653_v39  ;;  %v1274_v52 = vsub.bf16 %v4602_v50, %v3980_v29 }
  0x92   : > { %v4015_v8 = vcombine.low %v1354_v17, %v1355_v49  ;;  %v3981_v45 = vcombine.low %v1011_v38, %v1011_v38  ;;  %v623_v43 = vcombine.high %v4566_v24, %v4566_v24  ;;  %v1018_v54 = vrot.slane %v1013_v41, %v4562_v23  ;;  %v4406_v49 = vld [vmem:[%s4578_s26 + $0x8] sm:$0xf] }
  0x93   : > { %v4038_v55 = vcombine.low %v1400_v18, %v1401_v42  ;;  %v807_v47 = vrot.slane %v685_v48, %v4562_v23  ;;  %v1402_v0 = vmax.bf16 %v4434_v46, %v1274_v52 }
  0x94   : > { %v1276_v56 = vsub.bf16 %v4587_v36, %v3981_v45  ;;  %v1277_v63 = vsub.bf16 %v4590_v37, %v3981_v45  ;;  %v3982_v58 = vcombine.low %v1018_v54, %v1018_v54  ;;  %v3953_v36 = vpack.i.b16 %v623_v43, %v623_v43 }
  0x95   : > { %v1020_v60 = vpack.i.b16 %v807_v47, %v807_v47  ;;  %v1278_v37 = vsub.bf16 %v4602_v50, %v3981_v45  ;;  %v1279_v62 = vsub.bf16 %v4605_v51, %v3981_v45 }
  0x96   : > { %4273 = vmatmul.mubr.msk.bf16.gmra.mrb[52].mxu0 %vm379_vm2, %v4011_v16  ;;  %4317 = vmatmul.mubr.msk.bf16.gmra.mrb[32].mxu1 %vm379_vm2, %v4033_v5  ;;  %v1398_v16 = vmax.bf16 %v4434_v46, %v1270_v25  ;;  %v1404_v24 = vmax.bf16 %v4434_v46, %v1276_v56  ;;  %v1405_v22 = vmax.bf16 %v4434_v46, %v1277_v63  ;;  %v655_v5 = vunpack.i.h.s16 %v623_v43 }
  0x97   : > { %4276 = vmatprep.mubr.msk.bf16.mxu0 %vm379_vm2, %v4012_v35  ;;  %4320 = vmatprep.mubr.msk.bf16.mxu1 %vm379_vm2, %v4034_v11  ;;  %v1275_v35 = vsub.bf16 %v4605_v51, %v3980_v29  ;;  %v1280_v34 = vsub.bf16 %v4404_v28, %v3982_v58  ;;  %v1025_v2 = vrot.slane %v1020_v60, %v4562_v23 }
  0x98   : > { %v4037_v53 = vcombine.low %v1398_v16, %v1399_v40  ;;  %v4040_v1 = vcombine.low %v1404_v24, %v1405_v22  ;;  %v1406_v6 = vmax.bf16 %v4434_v46, %v1278_v37  ;;  %v1407_v50 = vmax.bf16 %v4434_v46, %v1279_v62 }
  0x99   : > { %v1403_v57 = vmax.bf16 %v4434_v46, %v1275_v35  ;;  %v1408_v51 = vmax.bf16 %v4434_v46, %v1280_v34  ;;  %v3983_v11 = vcombine.low %v1025_v2, %v1025_v2  ;;  %v687_v14 = vpack.i.b16 %v655_v5, %v655_v5 }
  0x9a   : > { %v4041_v21 = vcombine.low %v1406_v6, %v1407_v50  ;;  %v1282_v26 = vsub.bf16 %v4406_v49, %v3982_v58  ;;  %v1283_v9 = vsub.bf16 %v4407_v19, %v3982_v58  ;;  %v2535_v34 = vsub.s32 1, %v4497_v4 }
  0x9b   : > { %v4039_v61 = vcombine.low %v1402_v0, %v1403_v57  ;;  %v1284_v20 = vsub.bf16 %v4404_v28, %v3983_v11  ;;  %v815_v30 = vrot.slane %v687_v14, %v4562_v23  ;;  %v1286_v33 = vsub.bf16 %v4406_v49, %v3983_v11 }
  0x9c   : > { %v1287_v38 = vsub.bf16 %v4407_v19, %v3983_v11  ;;  %v2573_v2 = vsub.s32 3, %v4497_v4  ;;  %v5121_v6 = vsub.s32 5, %v4497_v4  ;;  %v5124_v50 = vsub.s32 6, %v4497_v4 }
  0x9d   : > { %v1412_v25 = vmax.bf16 %v4434_v46, %v1284_v20  ;;  %v1414_v18 = vmax.bf16 %v4434_v46, %v1286_v33 }
  0x9e   : > { %4277 = vmatmul.mubr.msk.bf16.gmra.mrb[56].mxu0 %vm379_vm2, %v4013_v13  ;;  %4321 = vmatmul.mubr.msk.bf16.gmra.mrb[36].mxu1 %vm379_vm2, %v4035_v31  ;;  %v4405_v13 = vld [vmem:[%s4578_s26 + $0x4] sm:$0xf]  ;;  %v1411_v31 = vmax.bf16 %v4434_v46, %v1283_v9  ;;  %v1415_v42 = vmax.bf16 %v4434_v46, %v1287_v38 }
  0x9f   : > { %4280 = vmatprep.mubr.msk.bf16.mxu0 %vm379_vm2, %v4014_v3  ;;  %4324 = vmatprep.mubr.msk.bf16.mxu1 %vm379_vm2, %v4036_v15  ;;  %v1281_v44 = vsub.bf16 %v4405_v13, %v3982_v58  ;;  %v811_v3 = vrot.slane %v3953_v36, %v4562_v23  ;;  %v1285_v10 = vsub.bf16 %v4405_v13, %v3983_v11 }
  0xa0   : > { %v1034_v15 = vpack.i.b16 %v815_v30, %v815_v30  ;;  %v4045_v35 = vcombine.low %v1414_v18, %v1415_v42 }
  0xa1   : > { %v1409_v7 = vmax.bf16 %v4434_v46, %v1281_v44  ;;  %v1027_v12 = vpack.i.b16 %v811_v3, %v811_v3  ;;  %v1413_v59 = vmax.bf16 %v4434_v46, %v1285_v10  ;;  %v4435_v44 = vmov -1e+30  }
  0xa2   : > { %v1039_v41 = vrot.slane %v1034_v15, %v4562_v23 }
  0xa3   : > { %v4042_v17 = vcombine.low %v1408_v51, %v1409_v7  ;;  %v1032_v29 = vrot.slane %v1027_v12, %v4562_v23  ;;  %v4044_v39 = vcombine.low %v1412_v25, %v1413_v59  ;;  %v5127_v51 = vsub.s32 7, %v4497_v4 }
  0xa4   : > { %v3985_v52 = vcombine.low %v1039_v41, %v1039_v41 }
  0xa5   : > { %v3984_v27 = vcombine.low %v1032_v29, %v1032_v29 }
  0xa6   : > { %4281 = vmatmul.mubr.msk.bf16.gmra.mrb[60].mxu0 %vm379_vm2, %v4015_v8  ;;  %4325 = vmatmul.mubr.msk.bf16.gmra.mrb[40].mxu1 %vm379_vm2, %v4037_v53  ;;  %v1410_v8 = vmax.bf16 %v4434_v46, %v1282_v26  ;;  %v1293_v56 = vsub.bf16 %v4405_v13, %v3985_v52  ;;  %v1294_v24 = vsub.bf16 %v4406_v49, %v3985_v52 }
  0xa7   : > { %4328 = vmatprep.mubr.msk.bf16.mxu1 %vm379_vm2, %v4038_v55  ;;  %v1288_v16 = vsub.bf16 %v4404_v28, %v3984_v27  ;;  %v1289_v40 = vsub.bf16 %v4405_v13, %v3984_v27  ;;  %v1290_v43 = vsub.bf16 %v4406_v49, %v3984_v27  ;;  %v1291_v53 = vsub.bf16 %v4407_v19, %v3984_v27 }
  0xa8   : > { %v4043_v32 = vcombine.low %v1410_v8, %v1411_v31  ;;  %v1292_v55 = vsub.bf16 %v4404_v28, %v3985_v52  ;;  %v1421_v57 = vmax.bf16 %v4434_v46, %v1293_v56  ;;  %v1295_v22 = vsub.bf16 %v4407_v19, %v3985_v52 }
  0xa9   : > { %v1416_v45 = vmax.bf16 %v4434_v46, %v1288_v16  ;;  %v1417_v48 = vmax.bf16 %v4434_v46, %v1289_v40  ;;  %v1418_v63 = vmax.bf16 %v4434_v46, %v1290_v43  ;;  %v1419_v47 = vmax.bf16 %v4434_v46, %v1291_v53 }
  0xaa   : > { %v1420_v0 = vmax.bf16 %v4434_v46, %v1292_v55  ;;  %v1422_v36 = vmax.bf16 %v4434_v46, %v1294_v24  ;;  %v2554_v13 = vsub.s32 2, %v4497_v4 }
  0xab   : > { %v4046_v54 = vcombine.low %v1416_v45, %v1417_v48  ;;  %v4047_v58 = vcombine.low %v1418_v63, %v1419_v47 }
  0xac   : > { %v4048_v60 = vcombine.low %v1420_v0, %v1421_v57 }
  0xae   : > { %4329 = vmatmul.mubr.msk.bf16.gmra.mrb[44].mxu1 %vm379_vm2, %v4039_v61  ;;  %v1423_v61 = vmax.bf16 %v4434_v46, %v1295_v22  ;;  %v5114_v46 = vsub.s32 4, %v4497_v4 }
  0xaf   : > { %4332 = vmatprep.mubr.msk.bf16.mxu1 %vm379_vm2, %v4040_v1 }
  0xb0   : > { %v4049_v37 = vcombine.low %v1422_v36, %v1423_v61 }
  0xb6   : > { %4333 = vmatmul.mubr.msk.bf16.gmra.mrb[48].mxu1 %vm379_vm2, %v4041_v21 }
  0xb7   : > { %4336 = vmatprep.mubr.msk.bf16.mxu1 %vm379_vm2, %v4042_v17 }
  0xbe   : > { %4337 = vmatmul.mubr.msk.bf16.gmra.mrb[52].mxu1 %vm379_vm2, %v4043_v32 }
  0xbf   : > { %4340 = vmatprep.mubr.msk.bf16.mxu1 %vm379_vm2, %v4044_v39 }
  0xc6   : > { %4341 = vmatmul.mubr.msk.bf16.gmra.mrb[56].mxu1 %vm379_vm2, %v4045_v35 }
  0xc7   : > { %4344 = vmatprep.mubr.msk.bf16.mxu1 %vm379_vm2, %v4046_v54 }
  0xce   : > { %4345 = vmatmul.mubr.msk.bf16.gmra.mrb[60].mxu1 %vm379_vm2, %v4047_v58 }
  0xcf   : > { %4348 = vmatprep.mubr.msk.bf16.mxu1 %vm379_vm2, %v4048_v60 }
  0xd6   : > { %4349 = vmatmul.mubr.msk.bf16.gmra.mrb[64].mxu1 %vm379_vm2, %v4049_v37 }
  0xf9   : > { %v4212_v62 = vpop.f32.mrb[0].mxu0 }
  0xfa   : > { %vm505_vm3 = vcmp.le.f32.partialorder %v4212_v62, 0.04  ;;  %v485_v28 = vpop.f32.mrb[1].mxu0 }
  0xfb   : > { %v5110_v1 = vsel %vm505_vm3, 0.0, %v4435_v44  ;;  %vm504_vm4 = vcmp.le.f32.partialorder %v485_v28, 0.04 }
  0xfc   : > { %v5116_v3 = vsel %vm504_vm4, 0.0, %v4435_v44  ;;  %v2669_v5 = vrot.slane %v5110_v1, %v4562_v23  ;;  %v2688_v31 = vrot.slane %v5110_v1, %v2535_v34  ;;  %v2707_v42 = vrot.slane %v5110_v1, %v2554_v13 }
  0xfd   : > { %v4215_v7 = vpop.f32.mrb[2].mxu0  ;;  %v5130_v11 = vrot.slane %v5116_v3, %v2535_v34  ;;  %v5135_v21 = vrot.slane %v5116_v3, %v2554_v13  ;;  %v5138_v17 = vrot.slane %v5116_v3, %v2573_v2  ;;  %v5144_v4 = vrot.slane %v5116_v3, %v5114_v46 }
  0xfe   : > { %2675 = vbcast.lane.b32.xlu1 %v2669_v5, 264  ;;  %2671 = vbcast.lane.b32.xlu0 %v2669_v5, 256  ;;  %vm507_vm5 = vcmp.le.f32.partialorder %v4215_v7, 0.04  ;;  %v495_v12 = vpop.f32.mrb[3].mxu0  ;;  %v5148_v26 = vrot.slane %v5116_v3, %v5121_v6  ;;  %v5152_v19 = vrot.slane %v5116_v3, %v5124_v50  ;;  %v5156_v9 = vrot.slane %v5116_v3, %v5127_v51 }
  0xff   : > { %v5132_v14 = vsel %vm507_vm5, 0.0, %v4435_v44  ;;  %vm506_vm6 = vcmp.le.f32.partialorder %v495_v12, 0.04  ;;  %v2726_v43 = vrot.slane %v5110_v1, %v2573_v2  ;;  %v2745_v63 = vrot.slane %v5110_v1, %v5114_v46 }
 0x100   : > { %v5140_v49 = vsel %vm506_vm6, 0.0, %v4435_v44  ;;  %v5159_v20 = vrot.slane %v5132_v14, %v2535_v34  ;;  %v5162_v10 = vrot.slane %v5132_v14, %v2554_v13  ;;  %v5165_v29 = vrot.slane %v5132_v14, %v2573_v2 }
 0x101   : > { %v5169_v30 = vrot.slane %v5132_v14, %v5114_v46  ;;  %v5173_v8 = vrot.slane %v5132_v14, %v5121_v6  ;;  %v5178_v25 = vrot.slane %v5132_v14, %v5124_v50  ;;  %v5182_v59 = vrot.slane %v5132_v14, %v5127_v51 }
 0x102   : > { %2683 = vbcast.lane.b32.xlu1 %v2669_v5, 280  ;;  %2679 = vbcast.lane.b32.xlu0 %v2669_v5, 272  ;;  %v5185_v27 = vrot.slane %v5140_v49, %v2535_v34  ;;  %v5188_v15 = vrot.slane %v5140_v49, %v2554_v13  ;;  %v5191_v32 = vrot.slane %v5140_v49, %v2573_v2  ;;  %v4436_v12 = vmov -inf  }
 0x103   : > { %v5195_v33 = vrot.slane %v5140_v49, %v5114_v46  ;;  %v5199_v38 = vrot.slane %v5140_v49, %v5121_v6  ;;  %v5203_v39 = vrot.slane %v5140_v49, %v5124_v50  ;;  %v5207_v16 = vrot.slane %v5140_v49, %v5127_v51  ;;  %381 = vst.msk [vmem:[#allocation2 + $0x8] sm:$0xff] %vm379_vm2, %v4436_v12 }
 0x104   : > { %5922 = vst [vmem:[#allocation3_spill] sm:$0xff] %v5191_v32  ;;  %v2764_v24 = vrot.slane %v5110_v1, %v5121_v6  ;;  %v2783_v37 = vrot.slane %v5110_v1, %v5124_v50  ;;  %v2802_v5 = vrot.slane %v5110_v1, %v5127_v51  ;;  %380 = vst.msk [vmem:[#allocation2] sm:$0xff] %vm379_vm2, %v4436_v12 }
 0x105   : > { %5923 = vst [vmem:[#allocation4_spill] sm:$0xff] %v5195_v33  ;;  %5924 = vst [vmem:[#allocation5_spill] sm:$0xff] %v5199_v38 }
 0x106   : > { %5925 = vst [vmem:[#allocation6_spill] sm:$0xff] %v5203_v39  ;;  %5926 = vst [vmem:[#allocation7_spill] sm:$0xff] %v5207_v16  ;;  %2694 = vbcast.lane.b32.xlu1 %v2688_v31, 264  ;;  %2690 = vbcast.lane.b32.xlu0 %v2688_v31, 256 }
 0x107   : > { %382 = vst.msk [vmem:[#allocation2 + $0x10] sm:$0xff] %vm379_vm2, %v4436_v12  ;;  %383 = vst.msk [vmem:[#allocation2 + $0x18] sm:$0xff] %vm379_vm2, %v4436_v12 }
 0x109   : > { %v5209_v40 = vpop.f32.mrb[4].mxu0 }
 0x10a   : > { %2702 = vbcast.lane.b32.xlu1 %v2688_v31, 280  ;;  %2698 = vbcast.lane.b32.xlu0 %v2688_v31, 272  ;;  %v5211_v41 = vpop.f32.mrb[5].mxu0  ;;  %v2517_v31 = vrot.slane %v5116_v3, %v4562_v23 }
 0x10b   : > { %v5213_v18 = vpop.f32.mrb[6].mxu0 }
 0x10c   : > { %v5216_v45 = vpop.f32.mrb[7].mxu0 }
 0x10e   : > { %2713 = vbcast.lane.b32.xlu1 %v2707_v42, 264  ;;  %2709 = vbcast.lane.b32.xlu0 %v2707_v42, 256 }
 0x111   : > { %v5218_v48 = vpop.f32.mrb[8].mxu0 }
 0x112   : > { %2721 = vbcast.lane.b32.xlu1 %v2707_v42, 280  ;;  %2717 = vbcast.lane.b32.xlu0 %v2707_v42, 272  ;;  %v5220_v52 = vpop.f32.mrb[9].mxu0 }
 0x113   : > { %v5222_v35 = vpop.f32.mrb[10].mxu0 }
 0x114   : > { %v5225_v53 = vpop.f32.mrb[11].mxu0 }
 0x116   : > { %2732 = vbcast.lane.b32.xlu1 %v2726_v43, 264  ;;  %2728 = vbcast.lane.b32.xlu0 %v2726_v43, 256 }
 0x119   : > { %v5227_v54 = vpop.f32.mrb[12].mxu0 }
 0x11a   : > { %2740 = vbcast.lane.b32.xlu1 %v2726_v43, 280  ;;  %2736 = vbcast.lane.b32.xlu0 %v2726_v43, 272  ;;  %v5229_v55 = vpop.f32.mrb[13].mxu0 }
 0x11b   : > { %v5231_v56 = vpop.f32.mrb[14].mxu0 }
 0x11c   : > { %v5235_v47 = vpop.f32.mrb[15].mxu0 }
 0x11e   : > { %2751 = vbcast.lane.b32.xlu1 %v2745_v63, 264  ;;  %2747 = vbcast.lane.b32.xlu0 %v2745_v63, 256 }
 0x121   : > { %v5237_v0 = vpop.f32.mrb[16].mxu0 }
 0x122   : > { %5927 = vst [vmem:[#allocation8_spill] sm:$0xff] %v5237_v0  ;;  %2759 = vbcast.lane.b32.xlu1 %v2745_v63, 280  ;;  %2755 = vbcast.lane.b32.xlu0 %v2745_v63, 272  ;;  %v5239_v57 = vpop.f32.mrb[17].mxu0 }
 0x123   : > { %5928 = vst [vmem:[#allocation9_spill] sm:$0xff] %v5239_v57  ;;  %v5241_v58 = vpop.f32.mrb[18].mxu0 }
 0x124   : > { %5929 = vst [vmem:[#allocation10_spill] sm:$0xff] %v5241_v58  ;;  %v5245_v22 = vpop.f32.mrb[19].mxu0 }
 0x125   : > { %5930 = vst [vmem:[#allocation11_spill] sm:$0xff] %v5245_v22 }
 0x126   : > { %2770 = vbcast.lane.b32.xlu1 %v2764_v24, 264  ;;  %2766 = vbcast.lane.b32.xlu0 %v2764_v24, 256 }
 0x127   : > { %v5259_v34 = vpop.f32.mrb[0].mxu1 }
 0x128   : > { %v5263_v44 = vpop.f32.mrb[1].mxu1 }
 0x129   : > { %v5247_v60 = vpop.f32.mrb[20].mxu0  ;;  %v5267_v46 = vpop.f32.mrb[2].mxu1 }
 0x12a   : > { %5931 = vst [vmem:[#allocation12_spill] sm:$0xff] %v5247_v60  ;;  %2778 = vbcast.lane.b32.xlu1 %v2764_v24, 280  ;;  %2774 = vbcast.lane.b32.xlu0 %v2764_v24, 272  ;;  %v5249_v36 = vpop.f32.mrb[21].mxu0  ;;  %v5273_v50 = vpop.f32.mrb[3].mxu1 }
 0x12b   : > { %5932 = vst [vmem:[#allocation13_spill] sm:$0xff] %v5249_v36  ;;  %v5251_v61 = vpop.f32.mrb[22].mxu0 }
 0x12c   : > { %5933 = vst [vmem:[#allocation14_spill] sm:$0xff] %v5251_v61  ;;  %v5255_v62 = vpop.f32.mrb[23].mxu0 }
 0x12d   : > { %5934 = vst [vmem:[#allocation15_spill] sm:$0xff] %v5255_v62 }
 0x12e   : > { %2789 = vbcast.lane.b32.xlu1 %v2783_v37, 264  ;;  %2785 = vbcast.lane.b32.xlu0 %v2783_v37, 256 }
 0x131   : > { %v5257_v28 = vpop.f32.mrb[24].mxu0 }
 0x132   : > { %5935 = vst [vmem:[#allocation16_spill] sm:$0xff] %v5257_v28  ;;  %2797 = vbcast.lane.b32.xlu1 %v2783_v37, 280  ;;  %2793 = vbcast.lane.b32.xlu0 %v2783_v37, 272  ;;  %v5261_v13 = vpop.f32.mrb[25].mxu0 }
 0x133   : > { %5936 = vst [vmem:[#allocation17_spill] sm:$0xff] %v5261_v13  ;;  %v5265_v2 = vpop.f32.mrb[26].mxu0 }
 0x134   : > { %5937 = vst [vmem:[#allocation18_spill] sm:$0xff] %v5265_v2  ;;  %v5271_v6 = vpop.f32.mrb[27].mxu0 }
 0x135   : > { %5938 = vst [vmem:[#allocation19_spill] sm:$0xff] %v5271_v6 }
 0x136   : > { %2808 = vbcast.lane.b32.xlu1 %v2802_v5, 264  ;;  %2804 = vbcast.lane.b32.xlu0 %v2802_v5, 256 }
 0x139   : > { %v5275_v7 = vpop.f32.mrb[28].mxu0 }
 0x13a   : > { %5939 = vst [vmem:[#allocation20_spill] sm:$0xff] %v5275_v7  ;;  %2816 = vbcast.lane.b32.xlu1 %v2802_v5, 280  ;;  %2812 = vbcast.lane.b32.xlu0 %v2802_v5, 272  ;;  %v5281_v1 = vpop.f32.mrb[29].mxu0 }
 0x13b   : > { %5940 = vst [vmem:[#allocation21_spill] sm:$0xff] %v5281_v1  ;;  %v5283_v51 = vpop.f32.mrb[30].mxu0 }
 0x13c   : > { %5941 = vst [vmem:[#allocation22_spill] sm:$0xff] %v5283_v51  ;;  %v5287_v42 = vpop.f32.mrb[31].mxu0 }
 0x13d   : > { %5942 = vst [vmem:[#allocation23_spill] sm:$0xff] %v5287_v42 }
 0x13e   : > { %2527 = vbcast.lane.b32.xlu1 %v2517_v31, 272  ;;  %2519 = vbcast.lane.b32.xlu0 %v2517_v31, 256 }
 0x141   : > { %v5289_v43 = vpop.f32.mrb[32].mxu0 }
 0x142   : > { %5943 = vst [vmem:[#allocation24_spill] sm:$0xff] %v5289_v43  ;;  %2531 = vbcast.lane.b32.xlu1 %v2517_v31, 280  ;;  %2523 = vbcast.lane.b32.xlu0 %v2517_v31, 264  ;;  %v5291_v63 = vpop.f32.mrb[33].mxu0 }
 0x143   : > { %5944 = vst [vmem:[#allocation25_spill] sm:$0xff] %v5291_v63  ;;  %v5293_v24 = vpop.f32.mrb[34].mxu0 }
 0x144   : > { %5945 = vst [vmem:[#allocation26_spill] sm:$0xff] %v5293_v24  ;;  %v5295_v37 = vpop.f32.mrb[35].mxu0  ;;  %v5313_v24 = vpop.f32.mrb[4].mxu1 }
 0x145   : > { %5946 = vst [vmem:[#allocation27_spill] sm:$0xff] %v5295_v37  ;;  %5947 = vst [vmem:[#allocation28_spill] sm:$0xff] %v5313_v24 }
 0x146   : > { %2542 = vbcast.lane.b32.xlu1 %v5130_v11, 264  ;;  %2538 = vbcast.lane.b32.xlu0 %v5130_v11, 256 }
 0x149   : > { %v5299_v5 = vpop.f32.mrb[36].mxu0 }
 0x14a   : > { %2550 = vbcast.lane.b32.xlu1 %v5130_v11, 280  ;;  %2546 = vbcast.lane.b32.xlu0 %v5130_v11, 272  ;;  %v5303_v3 = vpop.f32.mrb[37].mxu0  ;;  %v5319_v11 = vpop.f32.mrb[5].mxu1 }
 0x14b   : > { %v5305_v12 = vpop.f32.mrb[38].mxu0  ;;  %5948 = vst [vmem:[#allocation29_spill] sm:$0xff] %v5319_v11  ;;  %v5323_v37 = vpop.f32.mrb[6].mxu1 }
 0x14c   : > { %v5307_v31 = vpop.f32.mrb[39].mxu0  ;;  %5949 = vst [vmem:[#allocation30_spill] sm:$0xff] %v5323_v37  ;;  %v5327_v51 = vpop.f32.mrb[7].mxu1 }
 0x14d   : > { %5950 = vst [vmem:[#allocation31_spill] sm:$0xff] %v5327_v51  ;;  %v5329_v39 = vpop.f32.mrb[8].mxu1 }
 0x14e   : > { %2561 = vbcast.lane.b32.xlu1 %v5135_v21, 264  ;;  %2557 = vbcast.lane.b32.xlu0 %v5135_v21, 256  ;;  %5951 = vst [vmem:[#allocation32_spill] sm:$0xff] %v5329_v39  ;;  %v5333_v24 = vpop.f32.mrb[9].mxu1 }
 0x14f   : > { %5952 = vst [vmem:[#allocation33_spill] sm:$0xff] %v5333_v24 }
 0x151   : > { %v5311_v43 = vpop.f32.mrb[40].mxu0 }
 0x152   : > { %2569 = vbcast.lane.b32.xlu1 %v5135_v21, 280  ;;  %2565 = vbcast.lane.b32.xlu0 %v5135_v21, 272  ;;  %v5317_v16 = vpop.f32.mrb[41].mxu0  ;;  %v5335_v21 = vpop.f32.mrb[10].mxu1 }
 0x153   : > { %v5321_v63 = vpop.f32.mrb[42].mxu0  ;;  %5953 = vst [vmem:[#allocation34_spill] sm:$0xff] %v5335_v21  ;;  %v5337_v1 = vpop.f32.mrb[11].mxu1 }
 0x154   : > { %v5325_v7 = vpop.f32.mrb[43].mxu0  ;;  %5954 = vst [vmem:[#allocation35_spill] sm:$0xff] %v5337_v1  ;;  %v5341_v42 = vpop.f32.mrb[12].mxu1 }
 0x155   : > { %5955 = vst [vmem:[#allocation36_spill] sm:$0xff] %v5341_v42  ;;  %v5347_v39 = vpop.f32.mrb[13].mxu1 }
 0x156   : > { %2580 = vbcast.lane.b32.xlu1 %v5138_v17, 264  ;;  %2576 = vbcast.lane.b32.xlu0 %v5138_v17, 256  ;;  %5956 = vst [vmem:[#allocation37_spill] sm:$0xff] %v5347_v39  ;;  %v5351_v28 = vpop.f32.mrb[14].mxu1 }
 0x157   : > { %5957 = vst [vmem:[#allocation38_spill] sm:$0xff] %v5351_v28  ;;  %v5355_v21 = vpop.f32.mrb[15].mxu1 }
 0x158   : > { %5958 = vst [vmem:[#allocation39_spill] sm:$0xff] %v5355_v21  ;;  %v5357_v1 = vpop.f32.mrb[16].mxu1 }
 0x159   : > { %v5339_v11 = vpop.f32.mrb[44].mxu0  ;;  %5959 = vst [vmem:[#allocation40_spill] sm:$0xff] %v5357_v1  ;;  %v5361_v42 = vpop.f32.mrb[17].mxu1 }
 0x15a   : > { %2588 = vbcast.lane.b32.xlu1 %v5138_v17, 280  ;;  %2584 = vbcast.lane.b32.xlu0 %v5138_v17, 272  ;;  %v5345_v37 = vpop.f32.mrb[45].mxu0  ;;  %5960 = vst [vmem:[#allocation41_spill] sm:$0xff] %v5361_v42  ;;  %v5363_v17 = vpop.f32.mrb[18].mxu1 }
 0x15b   : > { %v5349_v51 = vpop.f32.mrb[46].mxu0  ;;  %5961 = vst [vmem:[#allocation42_spill] sm:$0xff] %v5363_v17  ;;  %v5365_v2 = vpop.f32.mrb[19].mxu1 }
 0x15c   : > { %v5353_v24 = vpop.f32.mrb[47].mxu0  ;;  %5962 = vst [vmem:[#allocation43_spill] sm:$0xff] %v5365_v2  ;;  %v5369_v38 = vpop.f32.mrb[20].mxu1 }
 0x15d   : > { %5963 = vst [vmem:[#allocation44_spill] sm:$0xff] %v5369_v38  ;;  %v5375_v1 = vpop.f32.mrb[21].mxu1 }
 0x15e   : > { %2599 = vbcast.lane.b32.xlu1 %v5144_v4, 264  ;;  %2595 = vbcast.lane.b32.xlu0 %v5144_v4, 256  ;;  %5964 = vst [vmem:[#allocation45_spill] sm:$0xff] %v5375_v1  ;;  %v5379_v13 = vpop.f32.mrb[22].mxu1 }
 0x15f   : > { %5965 = vst [vmem:[#allocation46_spill] sm:$0xff] %v5379_v13  ;;  %v5383_v17 = vpop.f32.mrb[23].mxu1 }
 0x160   : > { %5966 = vst [vmem:[#allocation47_spill] sm:$0xff] %v5383_v17  ;;  %v5385_v2 = vpop.f32.mrb[24].mxu1 }
 0x161   : > { %v5367_v39 = vpop.f32.mrb[48].mxu0  ;;  %5967 = vst [vmem:[#allocation48_spill] sm:$0xff] %v5385_v2  ;;  %v5389_v38 = vpop.f32.mrb[25].mxu1 }
 0x162   : > { %2607 = vbcast.lane.b32.xlu1 %v5144_v4, 280  ;;  %2603 = vbcast.lane.b32.xlu0 %v5144_v4, 272  ;;  %v5373_v28 = vpop.f32.mrb[49].mxu0  ;;  %5968 = vst [vmem:[#allocation49_spill] sm:$0xff] %v5389_v38  ;;  %v5391_v4 = vpop.f32.mrb[26].mxu1 }
 0x163   : > { %v5377_v21 = vpop.f32.mrb[50].mxu0  ;;  %5969 = vst [vmem:[#allocation50_spill] sm:$0xff] %v5391_v4  ;;  %v5393_v6 = vpop.f32.mrb[27].mxu1 }
 0x164   : > { %v5381_v42 = vpop.f32.mrb[51].mxu0  ;;  %5970 = vst [vmem:[#allocation51_spill] sm:$0xff] %v5393_v6  ;;  %v5397_v60 = vpop.f32.mrb[28].mxu1 }
 0x165   : > { %5971 = vst [vmem:[#allocation52_spill] sm:$0xff] %v5397_v60  ;;  %v5403_v2 = vpop.f32.mrb[29].mxu1 }
 0x166   : > { %2618 = vbcast.lane.b32.xlu1 %v5148_v26, 264  ;;  %2614 = vbcast.lane.b32.xlu0 %v5148_v26, 256  ;;  %5972 = vst [vmem:[#allocation53_spill] sm:$0xff] %v5403_v2  ;;  %v5407_v61 = vpop.f32.mrb[30].mxu1 }
 0x167   : > { %5973 = vst [vmem:[#allocation54_spill] sm:$0xff] %v5407_v61  ;;  %v5411_v4 = vpop.f32.mrb[31].mxu1 }
 0x168   : > { %5974 = vst [vmem:[#allocation55_spill] sm:$0xff] %v5411_v4 }
 0x169   : > { %v5395_v1 = vpop.f32.mrb[52].mxu0  ;;  %v5419_v2 = vpop.f32.mrb[32].mxu1 }
 0x16a   : > { %2626 = vbcast.lane.b32.xlu1 %v5148_v26, 280  ;;  %2622 = vbcast.lane.b32.xlu0 %v5148_v26, 272  ;;  %v5401_v13 = vpop.f32.mrb[53].mxu0  ;;  %5975 = vst [vmem:[#allocation56_spill] sm:$0xff] %v5419_v2  ;;  %v5425_v4 = vpop.f32.mrb[33].mxu1 }
 0x16b   : > { %v5405_v17 = vpop.f32.mrb[54].mxu0  ;;  %5976 = vst [vmem:[#allocation57_spill] sm:$0xff] %v5425_v4 }
 0x16c   : > { %v5409_v38 = vpop.f32.mrb[55].mxu0 }
 0x16e   : > { %2637 = vbcast.lane.b32.xlu1 %v5152_v19, 264  ;;  %2633 = vbcast.lane.b32.xlu0 %v5152_v19, 256 }
 0x170   : > { %v2676_v60 = vpop.permute.xlu1 %2675  ;;  %v2672_v6 = vpop.permute.xlu0 %2671 }
 0x171   : > { %v3154_v26 = vadd.f32 %v2672_v6, %v5303_v3  ;;  %v3155_v33 = vadd.f32 %v2676_v60, %v5307_v31  ;;  %v5417_v36 = vpop.f32.mrb[56].mxu0  ;;  %v5431_v6 = vpop.f32.mrb[34].mxu1 }
 0x172   : > { %2645 = vbcast.lane.b32.xlu1 %v5152_v19, 280  ;;  %2641 = vbcast.lane.b32.xlu0 %v5152_v19, 272  ;;  %v5423_v61 = vpop.f32.mrb[57].mxu0  ;;  %5977 = vst [vmem:[#allocation58_spill] sm:$0xff] %v5431_v6  ;;  %v5437_v57 = vpop.f32.mrb[35].mxu1 }
 0x173   : > { %v3358_v62 = vsel %vm379_vm2, %v3154_v26, -inf  ;;  %v3359_v32 = vsel %vm379_vm2, %v3155_v33, -inf  ;;  %v5429_v0 = vpop.f32.mrb[58].mxu0  ;;  %5978 = vst [vmem:[#allocation59_spill] sm:$0xff] %v5437_v57 }
 0x174   : > { %v3360_v60 = vmax.f32 %v3358_v62, %v3359_v32  ;;  %v2684_v3 = vpop.permute.xlu1 %2683  ;;  %v2680_v31 = vpop.permute.xlu0 %2679 }
 0x175   : > { %v3157_v2 = vadd.f32 %v5305_v12, %v2684_v3  ;;  %v3156_v58 = vadd.f32 %v5299_v5, %v2680_v31  ;;  %v5435_v19 = vpop.f32.mrb[59].mxu0  ;;  %v5447_v3 = vpop.f32.mrb[36].mxu1 }
 0x176   : > { %2656 = vbcast.lane.b32.xlu1 %v5156_v9, 264  ;;  %2652 = vbcast.lane.b32.xlu0 %v5156_v9, 256  ;;  %5979 = vst [vmem:[#allocation60_spill] sm:$0xff] %v5447_v3 }
 0x177   : > { %v3361_v33 = vsel %vm379_vm2, %v3156_v58, -inf  ;;  %v3363_v32 = vsel %vm379_vm2, %v3157_v2, -inf  ;;  %v5453_v58 = vrot.slane %v5132_v14, %v4562_v23  ;;  %v5457_v2 = vpop.f32.mrb[37].mxu1 }
 0x178   : > { %v3362_v26 = vmax.f32 %v3360_v60, %v3361_v33  ;;  %v2695_v4 = vpop.permute.xlu1 %2694  ;;  %v2691_v6 = vpop.permute.xlu0 %2690  ;;  %5980 = vst [vmem:[#allocation61_spill] sm:$0xff] %v5457_v2 }
 0x179   : > { %v3158_v62 = vadd.f32 %v2691_v6, %v5317_v16  ;;  %v3159_v12 = vadd.f32 %v2695_v4, %v5325_v7  ;;  %v5445_v5 = vpop.f32.mrb[60].mxu0  ;;  %v5463_v6 = vpop.f32.mrb[38].mxu1 }
 0x17a   : > { %v3364_v31 = vmax.f32 %v3362_v26, %v3363_v32  ;;  %2664 = vbcast.lane.b32.xlu1 %v5156_v9, 280  ;;  %2660 = vbcast.lane.b32.xlu0 %v5156_v9, 272  ;;  %v5455_v60 = vpop.f32.mrb[61].mxu0  ;;  %5981 = vst [vmem:[#allocation62_spill] sm:$0xff] %v5463_v6  ;;  %v5469_v22 = vpop.f32.mrb[39].mxu1 }
 0x17b   : > { %v3371_v16 = vsel %vm379_vm2, %v3158_v62, -inf  ;;  %v3372_v7 = vsel %vm379_vm2, %v3159_v12, -inf  ;;  %v5461_v4 = vpop.f32.mrb[62].mxu0  ;;  %5982 = vst [vmem:[#allocation63_spill] sm:$0xff] %v5469_v22 }
 0x17c   : > { %v3365_v33 = vrot.slane %v3364_v31, 4  ;;  %v3373_v26 = vmax.f32 %v3371_v16, %v3372_v7  ;;  %v2703_v32 = vpop.permute.xlu1 %2702  ;;  %v2699_v9 = vpop.permute.xlu0 %2698 }
 0x17d   : > { %v3161_v57 = vadd.f32 %v5321_v63, %v2703_v32  ;;  %v3160_v14 = vadd.f32 %v5311_v43, %v2699_v9  ;;  %v5467_v3 = vpop.f32.mrb[63].mxu0  ;;  %v5477_v32 = vpop.f32.mrb[40].mxu1 }
 0x17e   : > { %v3366_v2 = vmax.f32 %v3364_v31, %v3365_v33  ;;  %2979 = vbcast.lane.b32.xlu1 %v5453_v58, 264  ;;  %2975 = vbcast.lane.b32.xlu0 %v5453_v58, 256  ;;  %5983 = vst [vmem:[#allocation64_spill] sm:$0xff] %v5477_v32  ;;  %v5481_v31 = vpop.f32.mrb[41].mxu1 }
 0x17f   : > { %v3374_v62 = vsel %vm379_vm2, %v3160_v14, -inf  ;;  %v3376_v7 = vsel %vm379_vm2, %v3161_v57, -inf  ;;  %5984 = vst [vmem:[#allocation65_spill] sm:$0xff] %v5481_v31  ;;  %v5485_v14 = vpop.f32.mrb[42].mxu1 }
 0x180   : > { %v3375_v12 = vmax.f32 %v3373_v26, %v3374_v62  ;;  %v2714_v6 = vpop.permute.xlu1 %2713  ;;  %v2710_v16 = vpop.permute.xlu0 %2709  ;;  %v3367_v9 = vrot.slane %v3366_v2, 2  ;;  %5985 = vst [vmem:[#allocation66_spill] sm:$0xff] %v5485_v14 }
 0x181   : > { %v3162_v63 = vadd.f32 %v2710_v16, %v5345_v37  ;;  %v3163_v43 = vadd.f32 %v2714_v6, %v5353_v24  ;;  %v5489_v16 = vpop.f32.mrb[43].mxu1 }
 0x182   : > { %v3377_v22 = vmax.f32 %v3375_v12, %v3376_v7  ;;  %2998 = vbcast.lane.b32.xlu1 %v5159_v20, 264  ;;  %2994 = vbcast.lane.b32.xlu0 %v5159_v20, 256  ;;  %v3368_v7 = vmax.f32 %v3366_v2, %v3367_v9 }
 0x183   : > { %v3384_v33 = vsel %vm379_vm2, %v3162_v63, -inf  ;;  %v3385_v26 = vsel %vm379_vm2, %v3163_v43, -inf }
 0x184   : > { %v3378_v57 = vrot.slane %v3377_v22, 4  ;;  %v3386_v37 = vmax.f32 %v3384_v33, %v3385_v26  ;;  %v2722_v62 = vpop.permute.xlu1 %2721  ;;  %v2718_v24 = vpop.permute.xlu0 %2717  ;;  %v3369_v2 = vrot.slane %v3368_v7, 1 }
 0x185   : > { %v3165_v6 = vadd.f32 %v5349_v51, %v2722_v62  ;;  %v3164_v12 = vadd.f32 %v5339_v11, %v2718_v24  ;;  %v5497_v62 = vpop.f32.mrb[44].mxu1 }
 0x186   : > { %v3379_v32 = vmax.f32 %v3377_v22, %v3378_v57  ;;  %3017 = vbcast.lane.b32.xlu1 %v5162_v10, 264  ;;  %3013 = vbcast.lane.b32.xlu0 %v5162_v10, 256  ;;  %5986 = vst [vmem:[#allocation67_spill] sm:$0xff] %v5497_v62  ;;  %v5501_v57 = vpop.f32.mrb[45].mxu1 }
 0x187   : > { %v3387_v63 = vsel %vm379_vm2, %v3164_v12, -inf  ;;  %v3389_v26 = vsel %vm379_vm2, %v3165_v6, -inf  ;;  %5987 = vst [vmem:[#allocation68_spill] sm:$0xff] %v5501_v57  ;;  %v5505_v6 = vpop.f32.mrb[46].mxu1 }
 0x188   : > { %v3380_v43 = vrot.slane %v3379_v32, 2  ;;  %v3388_v14 = vmax.f32 %v3386_v37, %v3387_v63  ;;  %v2733_v31 = vpop.permute.xlu1 %2732  ;;  %v2729_v33 = vpop.permute.xlu0 %2728  ;;  %5988 = vst [vmem:[#allocation69_spill] sm:$0xff] %v5505_v6 }
 0x189   : > { %v3166_v51 = vadd.f32 %v2729_v33, %v5373_v28  ;;  %v3167_v11 = vadd.f32 %v2733_v31, %v5381_v42  ;;  %v3370_v33 = vmax.f32 %v3368_v7, %v3369_v2 }
 0x18a   : > { %v3381_v22 = vmax.f32 %v3379_v32, %v3380_v43  ;;  %v3390_v9 = vmax.f32 %v3388_v14, %v3389_v26  ;;  %3002 = vbcast.lane.b32.xlu1 %v5159_v20, 272  ;;  %2983 = vbcast.lane.b32.xlu0 %v5453_v58, 272  ;;  %v5509_v43 = vpop.f32.mrb[47].mxu1 }
 0x18b   : > { %v3397_v37 = vsel %vm379_vm2, %v3166_v51, -inf  ;;  %v3398_v24 = vsel %vm379_vm2, %v3167_v11, -inf  ;;  %v5518_v2 = vpop.f32.mrb[48].mxu1 }
 0x18c   : > { %v3382_v28 = vrot.slane %v3381_v22, 1  ;;  %v3391_v12 = vrot.slane %v3390_v9, 4  ;;  %v3399_v42 = vmax.f32 %v3397_v37, %v3398_v24  ;;  %v2741_v31 = vpop.permute.xlu1 %2740  ;;  %v2737_v63 = vpop.permute.xlu0 %2736 }
 0x18d   : > { %v3169_v32 = vadd.f32 %v5377_v21, %v2741_v31  ;;  %v3168_v14 = vadd.f32 %v5367_v39, %v2737_v63 }
 0x18e   : > { %v3383_v26 = vmax.f32 %v3381_v22, %v3382_v28  ;;  %v3392_v62 = vmax.f32 %v3390_v9, %v3391_v12  ;;  %3036 = vbcast.lane.b32.xlu1 %v5165_v29, 264  ;;  %3032 = vbcast.lane.b32.xlu0 %v5165_v29, 256  ;;  %v5522_v28 = vpop.f32.mrb[49].mxu1 }
 0x18f   : > { %v3400_v51 = vsel %vm379_vm2, %v3168_v14, -inf  ;;  %v3402_v21 = vsel %vm379_vm2, %v3169_v32, -inf  ;;  %v5526_v31 = vpop.f32.mrb[50].mxu1 }
 0x190   : > { %v3716_v11 = vsel %vm3702_vm7, %v3383_v26, %v3370_v33  ;;  %v3393_v37 = vrot.slane %v3392_v62, 2  ;;  %v3401_v24 = vmax.f32 %v3399_v42, %v3400_v51  ;;  %v2752_v6 = vpop.permute.xlu1 %2751  ;;  %v2748_v57 = vpop.permute.xlu0 %2747 }
 0x191   : > { %v3170_v39 = vadd.f32 %v2748_v57, %v5401_v13  ;;  %v3171_v7 = vadd.f32 %v2752_v6, %v5409_v38  ;;  %v5530_v14 = vpop.f32.mrb[51].mxu1 }
 0x192   : > { %v3394_v22 = vmax.f32 %v3392_v62, %v3393_v37  ;;  %v3403_v9 = vmax.f32 %v3401_v24, %v3402_v21  ;;  %3051 = vbcast.lane.b32.xlu1 %v5169_v30, 256  ;;  %3021 = vbcast.lane.b32.xlu0 %v5162_v10, 272 }
 0x193   : > { %v3410_v12 = vsel %vm379_vm2, %v3170_v39, -inf  ;;  %v3411_v42 = vsel %vm379_vm2, %v3171_v7, -inf }
 0x194   : > { %v3395_v63 = vrot.slane %v3394_v22, 1  ;;  %v3404_v13 = vrot.slane %v3403_v9, 4  ;;  %v3412_v57 = vmax.f32 %v3410_v12, %v3411_v42  ;;  %v2760_v38 = vpop.permute.xlu1 %2759  ;;  %v2756_v6 = vpop.permute.xlu0 %2755 }
 0x195   : > { %v3173_v62 = vadd.f32 %v5405_v17, %v2760_v38  ;;  %v3172_v32 = vadd.f32 %v5395_v1, %v2756_v6 }
 0x196   : > { %v3396_v33 = vmax.f32 %v3394_v22, %v3395_v63  ;;  %v3405_v26 = vmax.f32 %v3403_v9, %v3404_v13  ;;  %3006 = vbcast.lane.b32.xlu1 %v5159_v20, 280  ;;  %3055 = vbcast.lane.b32.xlu0 %v5169_v30, 264  ;;  %v5539_v22 = vpop.f32.mrb[52].mxu1 }
 0x197   : > { %v3413_v51 = vsel %vm379_vm2, %v3172_v32, -inf  ;;  %v3415_v17 = vsel %vm379_vm2, %v3173_v62, -inf  ;;  %v5543_v42 = vpop.f32.mrb[53].mxu1 }
 0x198   : > { %v3717_v37 = vsel %vm3704_vm8, %v3396_v33, %v3716_v11  ;;  %v3406_v24 = vrot.slane %v3405_v26, 2  ;;  %v3414_v21 = vmax.f32 %v3412_v57, %v3413_v51  ;;  %v2771_v39 = vpop.permute.xlu1 %2770  ;;  %v2767_v7 = vpop.permute.xlu0 %2766 }
 0x199   : > { %v3174_v1 = vadd.f32 %v2767_v7, %v5423_v61  ;;  %v3175_v12 = vadd.f32 %v2771_v39, %v5435_v19  ;;  %v5547_v13 = vpop.f32.mrb[54].mxu1 }
 0x19a   : > { %v3407_v9 = vmax.f32 %v3405_v26, %v3406_v24  ;;  %v3416_v20 = vmax.f32 %v3414_v21, %v3415_v17  ;;  %3070 = vbcast.lane.b32.xlu1 %v5173_v8, 256  ;;  %2987 = vbcast.lane.b32.xlu0 %v5453_v58, 280  ;;  %v5551_v33 = vpop.f32.mrb[55].mxu1 }
 0x19b   : > { %v3423_v11 = vsel %vm379_vm2, %v3174_v1, -inf  ;;  %v3424_v63 = vsel %vm379_vm2, %v3175_v12, -inf  ;;  %v5560_v12 = vpop.f32.mrb[56].mxu1 }
 0x19c   : > { %v3408_v57 = vrot.slane %v3407_v9, 1  ;;  %v3417_v61 = vrot.slane %v3416_v20, 4  ;;  %v3425_v38 = vmax.f32 %v3423_v11, %v3424_v63  ;;  %v2779_v19 = vpop.permute.xlu1 %2778  ;;  %v2775_v6 = vpop.permute.xlu0 %2774 }
 0x19d   : > { %v3177_v62 = vadd.f32 %v5429_v0, %v2779_v19  ;;  %v3176_v32 = vadd.f32 %v5417_v36, %v2775_v6  ;;  %v5564_v11 = vpop.f32.mrb[57].mxu1 }
 0x19e   : > { %v3409_v58 = vmax.f32 %v3407_v9, %v3408_v57  ;;  %v3418_v26 = vmax.f32 %v3416_v20, %v3417_v61  ;;  %3059 = vbcast.lane.b32.xlu1 %v5169_v30, 272  ;;  %3040 = vbcast.lane.b32.xlu0 %v5165_v29, 272  ;;  %v5568_v57 = vpop.f32.mrb[58].mxu1 }
 0x19f   : > { %v3426_v51 = vsel %vm379_vm2, %v3176_v32, -inf  ;;  %v3428_v0 = vsel %vm379_vm2, %v3177_v62, -inf  ;;  %v5572_v32 = vpop.f32.mrb[59].mxu1 }
 0x1a0   : > { %v3718_v24 = vsel %vm3706_vm9, %v3409_v58, %v3717_v37  ;;  %v3419_v21 = vrot.slane %v3418_v26, 2  ;;  %v3427_v39 = vmax.f32 %v3425_v38, %v3426_v51  ;;  %v2790_v7 = vpop.permute.xlu1 %2789  ;;  %v2786_v17 = vpop.permute.xlu0 %2785 }
 0x1a1   : > { %v3178_v36 = vadd.f32 %v2786_v17, %v5455_v60  ;;  %v3179_v1 = vadd.f32 %v2790_v7, %v5467_v3 }
 0x1a2   : > { %v3420_v9 = vmax.f32 %v3418_v26, %v3419_v21  ;;  %v3429_v20 = vmax.f32 %v3427_v39, %v3428_v0  ;;  %3093 = vbcast.lane.b32.xlu1 %v5178_v25, 264  ;;  %3074 = vbcast.lane.b32.xlu0 %v5173_v8, 264 }
 0x1a3   : > { %v3436_v37 = vsel %vm379_vm2, %v3178_v36, -inf  ;;  %v3437_v63 = vsel %vm379_vm2, %v3179_v1, -inf  ;;  %v5581_v1 = vpop.f32.mrb[60].mxu1 }
 0x1a4   : > { %v3421_v61 = vrot.slane %v3420_v9, 1  ;;  %v3430_v60 = vrot.slane %v3429_v20, 4  ;;  %v3438_v38 = vmax.f32 %v3436_v37, %v3437_v63  ;;  %v2798_v3 = vpop.permute.xlu1 %2797  ;;  %v2794_v19 = vpop.permute.xlu0 %2793 }
 0x1a5   : > { %v3181_v6 = vadd.f32 %v5461_v4, %v2798_v3  ;;  %v3180_v62 = vadd.f32 %v5445_v5, %v2794_v19 }
 0x1a6   : > { %v3422_v58 = vmax.f32 %v3420_v9, %v3421_v61  ;;  %v3431_v26 = vmax.f32 %v3429_v20, %v3430_v60  ;;  %3078 = vbcast.lane.b32.xlu1 %v5173_v8, 272  ;;  %3025 = vbcast.lane.b32.xlu0 %v5162_v10, 280  ;;  %v5585_v10 = vpop.f32.mrb[61].mxu1 }
 0x1a7   : > { %v3439_v51 = vsel %vm379_vm2, %v3180_v62, -inf  ;;  %v3441_v4 = vsel %vm379_vm2, %v3181_v6, -inf  ;;  %v5589_v63 = vpop.f32.mrb[62].mxu1 }
 0x1a8   : > { %v3719_v21 = vsel %vm3708_vm10, %v3422_v58, %v3718_v24  ;;  %v3432_v39 = vrot.slane %v3431_v26, 2  ;;  %v3440_v7 = vmax.f32 %v3438_v38, %v3439_v51  ;;  %v2809_v17 = vpop.permute.xlu1 %2808  ;;  %v2805_v0 = vpop.permute.xlu0 %2804 }
 0x1a9   : > { %v3183_v5 = vadd.f32 %v2809_v17, %v5273_v50  ;;  %v3182_v36 = vadd.f32 %v2805_v0, %v5263_v44  ;;  %v5593_v6 = vpop.f32.mrb[63].mxu1 }
 0x1aa   : > { %v3433_v9 = vmax.f32 %v3431_v26, %v3432_v39  ;;  %v3442_v20 = vmax.f32 %v3440_v7, %v3441_v4  ;;  %3112 = vbcast.lane.b32.xlu1 %v5182_v59, 264  ;;  %3089 = vbcast.lane.b32.xlu0 %v5178_v25, 256  ;;  %v5600_v4 = vpop.f32.mrb[64].mxu1 }
 0x1ab   : > { %v3450_v24 = vsel %vm379_vm2, %v3183_v5, -inf  ;;  %v3449_v37 = vsel %vm379_vm2, %v3182_v36, -inf  ;;  %v5604_v36 = vpop.f32.mrb[65].mxu1 }
 0x1ac   : > { %v3434_v61 = vrot.slane %v3433_v9, 1  ;;  %v3443_v50 = vrot.slane %v3442_v20, 4  ;;  %v3451_v60 = vmax.f32 %v3449_v37, %v3450_v24  ;;  %v2817_v44 = vpop.permute.xlu1 %2816  ;;  %v2813_v38 = vpop.permute.xlu0 %2812 }
 0x1ad   : > { %v3185_v3 = vadd.f32 %v5267_v46, %v2817_v44  ;;  %v3184_v19 = vadd.f32 %v5259_v34, %v2813_v38 }
 0x1ae   : > { %v3435_v62 = vmax.f32 %v3433_v9, %v3434_v61  ;;  %v3444_v58 = vmax.f32 %v3442_v20, %v3443_v50  ;;  %3097 = vbcast.lane.b32.xlu1 %v5178_v25, 272  ;;  %3044 = vbcast.lane.b32.xlu0 %v5165_v29, 280  ;;  %v5607_v9 = vpop.f32.mrb[66].mxu1  ;;  %v2821_v61 = vrot.slane %v5140_v49, %v4562_v23 }
 0x1af   : > { %v3452_v26 = vsel %vm379_vm2, %v3184_v19, -inf  ;;  %v3454_v46 = vsel %vm379_vm2, %v3185_v3, -inf  ;;  %v5613_v44 = vpop.f32.mrb[67].mxu1 }
 0x1b0   : > { %v3720_v51 = vsel %vm3710_vm11, %v3435_v62, %v3719_v21  ;;  %v3445_v39 = vrot.slane %v3444_v58, 2  ;;  %v3453_v7 = vmax.f32 %v3451_v60, %v3452_v26  ;;  %v2528_v17 = vpop.permute.xlu1 %2527  ;;  %v2520_v0 = vpop.permute.xlu0 %2519 }
 0x1b1   : > { %v3122_v29 = vadd.f32 %v2520_v0, %v5211_v41  ;;  %v3124_v50 = vadd.f32 %v5209_v40, %v2528_v17 }
 0x1b2   : > { %v3446_v34 = vmax.f32 %v3444_v58, %v3445_v39  ;;  %v3455_v5 = vmax.f32 %v3453_v7, %v3454_v46  ;;  %3116 = vbcast.lane.b32.xlu1 %v5182_v59, 272  ;;  %3108 = vbcast.lane.b32.xlu0 %v5182_v59, 256 }
 0x1b3   : > { %v3254_v41 = vsel %vm379_vm2, %v3122_v29, -inf }
 0x1b4   : > { %v3447_v21 = vrot.slane %v3446_v34, 1  ;;  %v3456_v20 = vrot.slane %v3455_v5, 4  ;;  %v2532_v24 = vpop.permute.xlu1 %2531  ;;  %v2524_v37 = vpop.permute.xlu0 %2523 }
 0x1b5   : > { %v3123_v60 = vadd.f32 %v2524_v37, %v5216_v45  ;;  %v3125_v19 = vadd.f32 %v5213_v18, %v2532_v24  ;;  %v3257_v45 = vsel %vm379_vm2, %v3124_v50, -inf }
 0x1b6   : > { %v3448_v38 = vmax.f32 %v3446_v34, %v3447_v21  ;;  %v3457_v3 = vmax.f32 %v3455_v5, %v3456_v20  ;;  %3063 = vbcast.lane.b32.xlu0 %v5169_v30, 280  ;;  %2827 = vbcast.lane.b32.xlu1 %v2821_v61, 264  ;;  %v3251_v20 = vld [vmem:[#allocation2 + $0x8] sm:$0xff] }
 0x1b7   : > { %v3255_v62 = vsel %vm379_vm2, %v3123_v60, -inf  ;;  %v3259_v18 = vsel %vm379_vm2, %v3125_v19, -inf }
 0x1b8   : > { %v3721_v23 = vsel %vm3712_vm12, %v3448_v38, %v3720_v51  ;;  %v3458_v49 = vrot.slane %v3457_v3, 2  ;;  %v3256_v58 = vmax.f32 %v3254_v41, %v3255_v62  ;;  %v2543_v40 = vpop.permute.xlu1 %2542  ;;  %v2539_v26 = vpop.permute.xlu0 %2538 }
 0x1b9   : > { %v3127_v39 = vadd.f32 %v2543_v40, %v5225_v53  ;;  %v3126_v7 = vadd.f32 %v2539_v26, %v5220_v52 }
 0x1ba   : > { %v3459_v30 = vmax.f32 %v3457_v3, %v3458_v49  ;;  %v3258_v17 = vmax.f32 %v3256_v58, %v3257_v45  ;;  %3082 = vbcast.lane.b32.xlu0 %v5173_v8, 280  ;;  %2835 = vbcast.lane.b32.xlu1 %v2821_v61, 280 }
 0x1bb   : > { %v3268_v0 = vsel %vm379_vm2, %v3127_v39, -inf  ;;  %v3267_v51 = vsel %vm379_vm2, %v3126_v7, -inf }
 0x1bc   : > { %v3460_v46 = vrot.slane %v3459_v30, 1  ;;  %v3260_v34 = vmax.f32 %v3258_v17, %v3259_v18  ;;  %v3269_v5 = vmax.f32 %v3267_v51, %v3268_v0  ;;  %v2551_v29 = vpop.permute.xlu1 %2550  ;;  %v2547_v21 = vpop.permute.xlu0 %2546  ;;  %v5647_v18 = vld [vmem:[%s5913_s5] ss:$0 sm:$0xff] }
 0x1bd   : > { %v3129_v53 = vadd.f32 %v5222_v35, %v2551_v29  ;;  %v3128_v52 = vadd.f32 %v5218_v48, %v2547_v21  ;;  %v5990_v29 = vld [vmem:[#allocation9_spill] sm:$0xff] }
 0x1be   : > { %v3461_v24 = vmax.f32 %v3459_v30, %v3460_v46  ;;  %v3261_v8 = vrot.slane %v3260_v34, 4  ;;  %2846 = vbcast.lane.b32.xlu1 %v5185_v27, 264  ;;  %2823 = vbcast.lane.b32.xlu0 %v2821_v61, 256 }
 0x1bf   : > { %v3270_v37 = vsel %vm379_vm2, %v3128_v52, -inf  ;;  %v3272_v62 = vsel %vm379_vm2, %v3129_v53, -inf }
 0x1c0   : > { %v3722_v50 = vsel %vm3714_vm13, %v3461_v24, %v3721_v23  ;;  %v3262_v60 = vmax.f32 %v3260_v34, %v3261_v8  ;;  %v3271_v38 = vmax.f32 %v3269_v5, %v3270_v37  ;;  %v2562_v3 = vpop.permute.xlu1 %2561  ;;  %v2558_v41 = vpop.permute.xlu0 %2557  ;;  %v5989_v34 = vld [vmem:[#allocation11_spill] sm:$0xff] }
 0x1c1   : > { %v3742_v19 = vmax.f32 %v3251_v20, %v3722_v50  ;;  %v3131_v35 = vadd.f32 %v2562_v3, %v5235_v47  ;;  %v3130_v48 = vadd.f32 %v2558_v41, %v5229_v55 }
 0x1c2   : > { %v3263_v49 = vrot.slane %v3262_v60, 2  ;;  %v3273_v58 = vmax.f32 %v3271_v38, %v3272_v62  ;;  %2854 = vbcast.lane.b32.xlu1 %v5185_v27, 280  ;;  %2831 = vbcast.lane.b32.xlu0 %v2821_v61, 272 }
 0x1c3   : > { %3746 = vst.msk [vmem:[#allocation2 + $0x8] sm:$0xff] %vm379_vm2, %v3742_v19  ;;  %v3281_v23 = vsel %vm379_vm2, %v3131_v35, -inf  ;;  %v3280_v40 = vsel %vm379_vm2, %v3130_v48, -inf  ;;  %v5991_v35 = vld [vmem:[#allocation10_spill] sm:$0xff]  ;;  %v5992_v48 = vld [vmem:[#allocation8_spill] sm:$0xff] }
 0x1c4   : > { %v3274_v26 = vrot.slane %v3273_v58, 4  ;;  %v3282_v45 = vmax.f32 %v3280_v40, %v3281_v23  ;;  %v2570_v39 = vpop.permute.xlu1 %2569  ;;  %v2566_v7 = vpop.permute.xlu0 %2565  ;;  %v3264_v55 = vmax.f32 %v3262_v60, %v3263_v49 }
 0x1c5   : > { %v3133_v30 = vadd.f32 %v5231_v56, %v2570_v39  ;;  %v3132_v47 = vadd.f32 %v5227_v54, %v2566_v7 }
 0x1c6   : > { %v3275_v17 = vmax.f32 %v3273_v58, %v3274_v26  ;;  %2865 = vbcast.lane.b32.xlu1 %v5188_v15, 264  ;;  %2842 = vbcast.lane.b32.xlu0 %v5185_v27, 256  ;;  %v3265_v52 = vrot.slane %v3264_v55, 1  ;;  %v5993_v26 = vld [vmem:[#allocation3_spill] sm:$0xff] }
 0x1c7   : > { %v3283_v61 = vsel %vm379_vm2, %v3132_v47, -inf  ;;  %v3285_v54 = vsel %vm379_vm2, %v3133_v30, -inf }
 0x1c8   : > { %v3276_v0 = vrot.slane %v3275_v17, 2  ;;  %v3284_v51 = vmax.f32 %v3282_v45, %v3283_v61  ;;  %v2581_v46 = vpop.permute.xlu1 %2580  ;;  %v2577_v56 = vpop.permute.xlu0 %2576  ;;  %v3266_v58 = vmax.f32 %v3264_v55, %v3265_v52 }
 0x1c9   : > { %v3135_v5 = vadd.f32 %v2581_v46, %v5989_v34  ;;  %v3134_v21 = vadd.f32 %v2577_v56, %v5990_v29  ;;  %v5996_v34 = vld [vmem:[#allocation4_spill] sm:$0xff] }
 0x1ca   : > { %v3753_v53 = vld [vmem:[#allocation2 + $0x8] sm:$0xff]  ;;  %v3277_v20 = vmax.f32 %v3275_v17, %v3276_v0  ;;  %v3286_v24 = vmax.f32 %v3284_v51, %v3285_v54  ;;  %2873 = vbcast.lane.b32.xlu1 %v5188_v15, 280  ;;  %2850 = vbcast.lane.b32.xlu0 %v5185_v27, 272  ;;  %v5994_v0 = vld [vmem:[#allocation15_spill] sm:$0xff]  ;;  %v5995_v51 = vld [vmem:[#allocation13_spill] sm:$0xff] }
 0x1cb   : > { %v3764_v8 = vadd.f32 %v5647_v18, %v3753_v53  ;;  %v3294_v37 = vsel %vm379_vm2, %v3135_v5, -inf  ;;  %v3293_v50 = vsel %vm379_vm2, %v3134_v21, -inf }
 0x1cc   : > { %v3278_v60 = vrot.slane %v3277_v20, 1  ;;  %v3287_v38 = vrot.slane %v3286_v24, 4  ;;  %v3295_v3 = vmax.f32 %v3293_v50, %v3294_v37  ;;  %v2589_v41 = vpop.permute.xlu1 %2588  ;;  %v2585_v19 = vpop.permute.xlu0 %2584  ;;  %v5998_v50 = vld [vmem:[#allocation12_spill] sm:$0xff] }
 0x1cd   : > { %v3768_v62 = vmax.f32 %v3764_v8, 0.0  ;;  %v3137_v27 = vadd.f32 %v5991_v35, %v2589_v41  ;;  %v3136_v49 = vadd.f32 %v5992_v48, %v2585_v19  ;;  %v5997_v8 = vld [vmem:[#allocation14_spill] sm:$0xff] }
 0x1ce   : > { %v3279_v23 = vmax.f32 %v3277_v20, %v3278_v60  ;;  %v3288_v40 = vmax.f32 %v3286_v24, %v3287_v38  ;;  %2884 = vbcast.lane.b32.xlu1 %v5993_v26, 264  ;;  %2861 = vbcast.lane.b32.xlu0 %v5188_v15, 256 }
 0x1cf   : > { %3772 = vst.msk [vmem:[%s5661_s7 + $0x8] sm:$0xff] %vm379_vm2, %v3768_v62  ;;  %v3296_v45 = vsel %vm379_vm2, %v3136_v49, -inf  ;;  %v3298_v61 = vsel %vm379_vm2, %v3137_v27, -inf  ;;  %v5999_v49 = vld [vmem:[#allocation19_spill] sm:$0xff] }
 0x1d0   : > { %v3703_v39 = vsel %vm3702_vm7, %v3279_v23, %v3266_v58  ;;  %v3289_v7 = vrot.slane %v3288_v40, 2  ;;  %v3297_v30 = vmax.f32 %v3295_v3, %v3296_v45  ;;  %v2600_v47 = vpop.permute.xlu1 %2599  ;;  %v2596_v17 = vpop.permute.xlu0 %2595  ;;  %v6000_v23 = vld [vmem:[#allocation17_spill] sm:$0xff] }
 0x1d1   : > { %v3139_v55 = vadd.f32 %v2600_v47, %v5994_v0  ;;  %v3138_v46 = vadd.f32 %v2596_v17, %v5995_v51 }
 0x1d2   : > { %v3290_v56 = vmax.f32 %v3288_v40, %v3289_v7  ;;  %v3299_v54 = vmax.f32 %v3297_v30, %v3298_v61  ;;  %2903 = vbcast.lane.b32.xlu1 %v5996_v34, 264  ;;  %2869 = vbcast.lane.b32.xlu0 %v5188_v15, 272  ;;  %v6001_v30 = vld [vmem:[#allocation5_spill] sm:$0xff] }
 0x1d3   : > { %v3307_v5 = vsel %vm379_vm2, %v3139_v55, -inf  ;;  %v3306_v29 = vsel %vm379_vm2, %v3138_v46, -inf  ;;  %v6002_v46 = vld [vmem:[#allocation18_spill] sm:$0xff] }
 0x1d4   : > { %v3291_v21 = vrot.slane %v3290_v56, 1  ;;  %v3300_v53 = vrot.slane %v3299_v54, 4  ;;  %v3308_v52 = vmax.f32 %v3306_v29, %v3307_v5  ;;  %v2608_v20 = vpop.permute.xlu1 %2607  ;;  %v2604_v24 = vpop.permute.xlu0 %2603 }
 0x1d5   : > { %v3141_v37 = vadd.f32 %v5997_v8, %v2608_v20  ;;  %v3140_v60 = vadd.f32 %v5998_v50, %v2604_v24 }
 0x1d6   : > { %v3292_v38 = vmax.f32 %v3290_v56, %v3291_v21  ;;  %v3301_v3 = vmax.f32 %v3299_v54, %v3300_v53  ;;  %2888 = vbcast.lane.b32.xlu1 %v5993_v26, 272  ;;  %2880 = vbcast.lane.b32.xlu0 %v5993_v26, 256  ;;  %v6003_v54 = vld [vmem:[#allocation16_spill] sm:$0xff] }
 0x1d7   : > { %v3309_v15 = vsel %vm379_vm2, %v3140_v60, -inf  ;;  %v3311_v48 = vsel %vm379_vm2, %v3141_v37, -inf  ;;  %v6004_v60 = vld [vmem:[#allocation23_spill] sm:$0xff] }
 0x1d8   : > { %v3705_v41 = vsel %vm3704_vm8, %v3292_v38, %v3703_v39  ;;  %v3302_v19 = vrot.slane %v3301_v3, 2  ;;  %v3310_v62 = vmax.f32 %v3308_v52, %v3309_v15  ;;  %v2619_v35 = vpop.permute.xlu1 %2618  ;;  %v2615_v27 = vpop.permute.xlu0 %2614 }
 0x1d9   : > { %v3143_v58 = vadd.f32 %v2619_v35, %v5999_v49  ;;  %v3142_v40 = vadd.f32 %v2615_v27, %v6000_v23  ;;  %v6006_v35 = vld [vmem:[#allocation6_spill] sm:$0xff] }
 0x1da   : > { %v3303_v45 = vmax.f32 %v3301_v3, %v3302_v19  ;;  %v3312_v7 = vmax.f32 %v3310_v62, %v3311_v48  ;;  %2922 = vbcast.lane.b32.xlu1 %v6001_v30, 264  ;;  %2899 = vbcast.lane.b32.xlu0 %v5996_v34, 256  ;;  %v6005_v3 = vld [vmem:[#allocation21_spill] sm:$0xff] }
 0x1db   : > { %v3320_v47 = vsel %vm379_vm2, %v3143_v58, -inf  ;;  %v3319_v39 = vsel %vm379_vm2, %v3142_v40, -inf }
 0x1dc   : > { %v3304_v17 = vrot.slane %v3303_v45, 1  ;;  %v3313_v61 = vrot.slane %v3312_v7, 4  ;;  %v3321_v0 = vmax.f32 %v3319_v39, %v3320_v47  ;;  %v2627_v55 = vpop.permute.xlu1 %2626  ;;  %v2623_v51 = vpop.permute.xlu0 %2622  ;;  %v6008_v47 = vld [vmem:[#allocation20_spill] sm:$0xff] }
 0x1dd   : > { %v3145_v56 = vadd.f32 %v6002_v46, %v2627_v55  ;;  %v3144_v5 = vadd.f32 %v6003_v54, %v2623_v51 }
 0x1de   : > { %v3305_v29 = vmax.f32 %v3303_v45, %v3304_v17  ;;  %v3314_v21 = vmax.f32 %v3312_v7, %v3313_v61  ;;  %2907 = vbcast.lane.b32.xlu1 %v5996_v34, 272  ;;  %2918 = vbcast.lane.b32.xlu0 %v6001_v30, 256  ;;  %v6007_v45 = vld [vmem:[#allocation22_spill] sm:$0xff] }
 0x1df   : > { %v3322_v53 = vsel %vm379_vm2, %v3144_v5, -inf  ;;  %v3324_v50 = vsel %vm379_vm2, %v3145_v56, -inf }
 0x1e0   : > { %v3707_v52 = vsel %vm3706_vm9, %v3305_v29, %v3705_v41  ;;  %v3315_v20 = vrot.slane %v3314_v21, 2  ;;  %v3323_v24 = vmax.f32 %v3321_v0, %v3322_v53  ;;  %v2638_v8 = vpop.permute.xlu1 %2637  ;;  %v2634_v37 = vpop.permute.xlu0 %2633  ;;  %v6009_v29 = vld [vmem:[#allocation27_spill] sm:$0xff]  ;;  %v6010_v53 = vld [vmem:[#allocation25_spill] sm:$0xff] }
 0x1e1   : > { %v3147_v38 = vadd.f32 %v2638_v8, %v6004_v60  ;;  %v3146_v15 = vadd.f32 %v2634_v37, %v6005_v3  ;;  %v6011_v37 = vld [vmem:[#allocation7_spill] sm:$0xff] }
 0x1e2   : > { %v3316_v19 = vmax.f32 %v3314_v21, %v3315_v20  ;;  %v3325_v62 = vmax.f32 %v3323_v24, %v3324_v50  ;;  %2941 = vbcast.lane.b32.xlu1 %v6006_v35, 264  ;;  %2937 = vbcast.lane.b32.xlu0 %v6006_v35, 256 }
 0x1e3   : > { %v3333_v27 = vsel %vm379_vm2, %v3147_v38, -inf  ;;  %v3332_v41 = vsel %vm379_vm2, %v3146_v15, -inf }
 0x1e4   : > { %v3317_v48 = vrot.slane %v3316_v19, 1  ;;  %v3326_v49 = vrot.slane %v3325_v62, 4  ;;  %v3334_v58 = vmax.f32 %v3332_v41, %v3333_v27  ;;  %v2646_v23 = vpop.permute.xlu1 %2645  ;;  %v2642_v40 = vpop.permute.xlu0 %2641  ;;  %v6013_v27 = vld [vmem:[#allocation24_spill] sm:$0xff] }
 0x1e5   : > { %v3149_v7 = vadd.f32 %v6007_v45, %v2646_v23  ;;  %v3148_v39 = vadd.f32 %v6008_v47, %v2642_v40 }
 0x1e6   : > { %v3318_v17 = vmax.f32 %v3316_v19, %v3317_v48  ;;  %v3327_v61 = vmax.f32 %v3325_v62, %v3326_v49  ;;  %2926 = vbcast.lane.b32.xlu1 %v6001_v30, 272  ;;  %2892 = vbcast.lane.b32.xlu0 %v5993_v26, 280  ;;  %v6012_v19 = vld [vmem:[#allocation26_spill] sm:$0xff] }
 0x1e7   : > { %v3335_v0 = vsel %vm379_vm2, %v3148_v39, -inf  ;;  %v3337_v5 = vsel %vm379_vm2, %v3149_v7, -inf }
 0x1e8   : > { %v3709_v55 = vsel %vm3708_vm10, %v3318_v17, %v3707_v52  ;;  %v3328_v51 = vrot.slane %v3327_v61, 2  ;;  %v3336_v46 = vmax.f32 %v3334_v58, %v3335_v0  ;;  %v2657_v56 = vpop.permute.xlu1 %2656  ;;  %v2653_v54 = vpop.permute.xlu0 %2652  ;;  %v6014_v17 = vld [vmem:[#allocation63_spill] sm:$0xff]  ;;  %v6015_v0 = vld [vmem:[#allocation61_spill] sm:$0xff] }
 0x1e9   : > { %v3151_v21 = vadd.f32 %v2657_v56, %v6009_v29  ;;  %v3150_v20 = vadd.f32 %v2653_v54, %v6010_v53 }
 0x1ea   : > { %v3329_v24 = vmax.f32 %v3327_v61, %v3328_v51  ;;  %v3338_v8 = vmax.f32 %v3336_v46, %v3337_v5  ;;  %2960 = vbcast.lane.b32.xlu1 %v6011_v37, 264  ;;  %2956 = vbcast.lane.b32.xlu0 %v6011_v37, 256 }
 0x1eb   : > { %v3346_v26 = vsel %vm379_vm2, %v3151_v21, -inf  ;;  %v3345_v52 = vsel %vm379_vm2, %v3150_v20, -inf }
 0x1ec   : > { %v3330_v50 = vrot.slane %v3329_v24, 1  ;;  %v3339_v60 = vrot.slane %v3338_v8, 4  ;;  %v3347_v38 = vmax.f32 %v3345_v52, %v3346_v26  ;;  %v2665_v3 = vpop.permute.xlu1 %2664  ;;  %v2661_v15 = vpop.permute.xlu0 %2660 }
 0x1ed   : > { %v3153_v62 = vadd.f32 %v6012_v19, %v2665_v3  ;;  %v3152_v41 = vadd.f32 %v6013_v27, %v2661_v15 }
 0x1ee   : > { %v3331_v48 = vmax.f32 %v3329_v24, %v3330_v50  ;;  %v3340_v49 = vmax.f32 %v3338_v8, %v3339_v60  ;;  %2945 = vbcast.lane.b32.xlu1 %v6006_v35, 272  ;;  %2911 = vbcast.lane.b32.xlu0 %v5996_v34, 280  ;;  %v6016_v24 = vld [vmem:[#allocation65_spill] sm:$0xff] }
 0x1ef   : > { %v3348_v58 = vsel %vm379_vm2, %v3152_v41, -inf  ;;  %v3350_v39 = vsel %vm379_vm2, %v3153_v62, -inf  ;;  %v6017_v62 = vld [vmem:[#allocation68_spill] sm:$0xff] }
 0x1f0   : > { %v3711_v23 = vsel %vm3710_vm11, %v3331_v48, %v3709_v55  ;;  %v3341_v40 = vrot.slane %v3340_v49, 2  ;;  %v3349_v45 = vmax.f32 %v3347_v38, %v3348_v58  ;;  %v2980_v7 = vpop.permute.xlu1 %2979  ;;  %v2976_v47 = vpop.permute.xlu0 %2975 }
 0x1f1   : > { %v3219_v61 = vadd.f32 %v2980_v7, %v6014_v17  ;;  %v3218_v51 = vadd.f32 %v2976_v47, %v6015_v0  ;;  %v6019_v7 = vld [vmem:[#allocation60_spill] sm:$0xff] }
 0x1f2   : > { %v3342_v46 = vmax.f32 %v3340_v49, %v3341_v40  ;;  %v3351_v56 = vmax.f32 %v3349_v45, %v3350_v39  ;;  %2964 = vbcast.lane.b32.xlu1 %v6011_v37, 272  ;;  %2930 = vbcast.lane.b32.xlu0 %v6001_v30, 280  ;;  %v6018_v40 = vld [vmem:[#allocation64_spill] sm:$0xff] }
 0x1f3   : > { %v3567_v34 = vsel %vm379_vm2, %v3219_v61, -inf  ;;  %v3566_v55 = vsel %vm379_vm2, %v3218_v51, -inf }
 0x1f4   : > { %v3343_v54 = vrot.slane %v3342_v46, 1  ;;  %v3352_v5 = vrot.slane %v3351_v56, 4  ;;  %v3568_v29 = vmax.f32 %v3566_v55, %v3567_v34  ;;  %v2999_v21 = vpop.permute.xlu1 %2998  ;;  %v2995_v53 = vpop.permute.xlu0 %2994 }
 0x1f5   : > { %v3223_v20 = vadd.f32 %v2999_v21, %v5489_v16  ;;  %v3222_v8 = vadd.f32 %v2995_v53, %v6016_v24 }
 0x1f6   : > { %v3344_v26 = vmax.f32 %v3342_v46, %v3343_v54  ;;  %v3353_v52 = vmax.f32 %v3351_v56, %v3352_v5  ;;  %3101 = vbcast.lane.b32.xlu1 %v5178_v25, 280  ;;  %2949 = vbcast.lane.b32.xlu0 %v6006_v35, 280 }
 0x1f7   : > { %v3580_v30 = vsel %vm379_vm2, %v3223_v20, -inf  ;;  %v3579_v50 = vsel %vm379_vm2, %v3222_v8, -inf  ;;  %v6020_v8 = vld [vmem:[#allocation67_spill] sm:$0xff] }
 0x1f8   : > { %v3713_v60 = vsel %vm3712_vm12, %v3344_v26, %v3711_v23  ;;  %v3354_v38 = vrot.slane %v3353_v52, 2  ;;  %v3581_v3 = vmax.f32 %v3579_v50, %v3580_v30  ;;  %v3018_v15 = vpop.permute.xlu1 %3017  ;;  %v3014_v19 = vpop.permute.xlu0 %3013  ;;  %v6021_v50 = vld [vmem:[#allocation66_spill] sm:$0xff] }
 0x1f9   : > { %v3227_v16 = vadd.f32 %v3018_v15, %v5509_v43  ;;  %v3226_v27 = vadd.f32 %v3014_v19, %v6017_v62  ;;  %v3250_v43 = vld [vmem:[#allocation2] sm:$0xff] }
 0x1fa   : > { %v3355_v41 = vmax.f32 %v3353_v52, %v3354_v38  ;;  %3120 = vbcast.lane.b32.xlu1 %v5182_v59, 280  ;;  %2968 = vbcast.lane.b32.xlu0 %v6011_v37, 280 }
 0x1fb   : > { %v3593_v25 = vsel %vm379_vm2, %v3227_v16, -inf  ;;  %v3592_v35 = vsel %vm379_vm2, %v3226_v27, -inf }
 0x1fc   : > { %v3356_v48 = vrot.slane %v3355_v41, 1  ;;  %v3594_v49 = vmax.f32 %v3592_v35, %v3593_v25  ;;  %v3003_v58 = vpop.permute.xlu1 %3002  ;;  %v2984_v23 = vpop.permute.xlu0 %2983 }
 0x1fd   : > { %v3224_v45 = vadd.f32 %v6018_v40, %v3003_v58  ;;  %v3220_v47 = vadd.f32 %v6019_v7, %v2984_v23 }
 0x1fe   : > { %v3357_v39 = vmax.f32 %v3355_v41, %v3356_v48  ;;  %v6022_v48 = vld [vmem:[#allocation62_spill] sm:$0xff] }
 0x1ff   : > { %v3582_v17 = vsel %vm379_vm2, %v3224_v45, -inf  ;;  %v3569_v59 = vsel %vm379_vm2, %v3220_v47, -inf }
 0x200   : > { %v3715_v37 = vsel %vm3714_vm13, %v3357_v39, %v3713_v60  ;;  %v3583_v61 = vmax.f32 %v3581_v3, %v3582_v17  ;;  %v3570_v0 = vmax.f32 %v3568_v29, %v3569_v59  ;;  %v3037_v51 = vpop.permute.xlu1 %3036  ;;  %v3033_v46 = vpop.permute.xlu0 %3032 }
 0x201   : > { %v3741_v56 = vmax.f32 %v3250_v43, %v3715_v37  ;;  %v3231_v34 = vadd.f32 %v3037_v51, %v5530_v14  ;;  %v3230_v55 = vadd.f32 %v3033_v46, %v5522_v28 }
 0x203   : > { %3745 = vst.msk [vmem:[#allocation2] sm:$0xff] %vm379_vm2, %v3741_v56  ;;  %v3606_v54 = vsel %vm379_vm2, %v3231_v34, -inf  ;;  %v3605_v5 = vsel %vm379_vm2, %v3230_v55, -inf }
 0x204   : > { %v3607_v21 = vmax.f32 %v3605_v5, %v3606_v54  ;;  %v3052_v53 = vpop.permute.xlu1 %3051  ;;  %v3022_v20 = vpop.permute.xlu0 %3021 }
 0x205   : > { %v3234_v24 = vadd.f32 %v3052_v53, %v5543_v42  ;;  %v3228_v29 = vadd.f32 %v6020_v8, %v3022_v20 }
 0x207   : > { %v3595_v26 = vsel %vm379_vm2, %v3228_v29, -inf  ;;  %v3618_v15 = vsel %vm379_vm2, %v3234_v24, -inf  ;;  %v6023_v29 = vld [vmem:[#allocation69_spill] sm:$0xff] }
 0x208   : > { %v3596_v52 = vmax.f32 %v3594_v49, %v3595_v26  ;;  %v3007_v30 = vpop.permute.xlu1 %3006  ;;  %v3056_v14 = vpop.permute.xlu0 %3055 }
 0x209   : > { %v3225_v28 = vadd.f32 %v6021_v50, %v3007_v30  ;;  %v3235_v60 = vadd.f32 %v3056_v14, %v5551_v33 }
 0x20a   : > { %v3752_v38 = vld [vmem:[#allocation2] sm:$0xff] }
 0x20b   : > { %v3763_v3 = vadd.f32 %v5647_v18, %v3752_v38  ;;  %v3584_v19 = vsel %vm379_vm2, %v3225_v28, -inf  ;;  %v3619_v42 = vsel %vm379_vm2, %v3235_v60, -inf }
 0x20c   : > { %v3585_v16 = vmax.f32 %v3583_v61, %v3584_v19  ;;  %v3620_v62 = vmax.f32 %v3618_v15, %v3619_v42  ;;  %v3071_v27 = vpop.permute.xlu1 %3070  ;;  %v2988_v41 = vpop.permute.xlu0 %2987 }
 0x20d   : > { %v3767_v25 = vmax.f32 %v3763_v3, 0.0  ;;  %v3238_v35 = vadd.f32 %v3071_v27, %v5564_v11  ;;  %v3221_v49 = vadd.f32 %v6022_v48, %v2988_v41 }
 0x20e   : > { %v3586_v58 = vrot.slane %v3585_v16, 4 }
 0x20f   : > { %3771 = vst.msk [vmem:[%s5661_s7] sm:$0xff] %vm379_vm2, %v3767_v25  ;;  %v3571_v33 = vsel %vm379_vm2, %v3221_v49, -inf }
 0x210   : > { %v3587_v18 = vmax.f32 %v3585_v16, %v3586_v58  ;;  %v3572_v23 = vmax.f32 %v3570_v0, %v3571_v33  ;;  %v3060_v40 = vpop.permute.xlu1 %3059  ;;  %v3041_v45 = vpop.permute.xlu0 %3040 }
 0x211   : > { %v3236_v7 = vadd.f32 %v5539_v22, %v3060_v40  ;;  %v3232_v47 = vadd.f32 %v5518_v2, %v3041_v45  ;;  %v3631_v2 = vsel %vm379_vm2, %v3238_v35, -inf }
 0x212   : > { %v3588_v43 = vrot.slane %v3587_v18, 2  ;;  %v3573_v39 = vrot.slane %v3572_v23, 4 }
 0x213   : > { %v3621_v17 = vsel %vm379_vm2, %v3236_v7, -inf  ;;  %v3608_v11 = vsel %vm379_vm2, %v3232_v47, -inf }
 0x214   : > { %v3589_v59 = vmax.f32 %v3587_v18, %v3588_v43  ;;  %v3574_v37 = vmax.f32 %v3572_v23, %v3573_v39  ;;  %v5771_v61 = vmax.f32 %v3620_v62, %v3621_v17  ;;  %v3609_v51 = vmax.f32 %v3607_v21, %v3608_v11  ;;  %v3094_v46 = vpop.permute.xlu1 %3093  ;;  %v3075_v56 = vpop.permute.xlu0 %3074 }
 0x215   : > { %v3243_v0 = vadd.f32 %v3094_v46, %v5593_v6  ;;  %v3239_v34 = vadd.f32 %v3075_v56, %v5572_v32 }
 0x216   : > { %v3575_v22 = vrot.slane %v3574_v37, 2  ;;  %v3590_v54 = vrot.slane %v3589_v59, 1 }
 0x217   : > { %v3632_v55 = vsel %vm379_vm2, %v3239_v34, -inf  ;;  %v3645_v42 = vsel %vm379_vm2, %v3243_v0, -inf }
 0x218   : > { %v3576_v5 = vmax.f32 %v3574_v37, %v3575_v22  ;;  %v3633_v53 = vmax.f32 %v3631_v2, %v3632_v55  ;;  %v3079_v20 = vpop.permute.xlu1 %3078  ;;  %v3026_v24 = vpop.permute.xlu0 %3025  ;;  %v3591_v32 = vmax.f32 %v3589_v59, %v3590_v54 }
 0x219   : > { %v3240_v8 = vadd.f32 %v5560_v12, %v3079_v20  ;;  %v3229_v21 = vadd.f32 %v6023_v29, %v3026_v24 }
 0x21a   : > { %v3577_v26 = vrot.slane %v3576_v5, 1 }
 0x21b   : > { %v3634_v30 = vsel %vm379_vm2, %v3240_v8, -inf  ;;  %v3597_v6 = vsel %vm379_vm2, %v3229_v21, -inf }
 0x21c   : > { %v3578_v14 = vmax.f32 %v3576_v5, %v3577_v26  ;;  %v3635_v50 = vmax.f32 %v3633_v53, %v3634_v30  ;;  %v3598_v28 = vmax.f32 %v3596_v52, %v3597_v6  ;;  %v3113_v60 = vpop.permute.xlu1 %3112  ;;  %v3090_v38 = vpop.permute.xlu0 %3089  ;;  %v6024_v53 = vld [vmem:[#allocation31_spill] sm:$0xff]  ;;  %v6025_v30 = vld [vmem:[#allocation29_spill] sm:$0xff] }
 0x21d   : > { %v3247_v3 = vadd.f32 %v3113_v60, %v5613_v44  ;;  %v3242_v15 = vadd.f32 %v3090_v38, %v5585_v10 }
 0x21e   : > { %v3730_v19 = vsel %vm3702_vm7, %v3591_v32, %v3578_v14  ;;  %v3599_v12 = vrot.slane %v3598_v28, 4 }
 0x21f   : > { %v3644_v16 = vsel %vm379_vm2, %v3242_v15, -inf }
 0x220   : > { %v3600_v62 = vmax.f32 %v3598_v28, %v3599_v12  ;;  %v3646_v27 = vmax.f32 %v3644_v16, %v3645_v42  ;;  %v3098_v41 = vpop.permute.xlu1 %3097  ;;  %v3045_v25 = vpop.permute.xlu0 %3044  ;;  %v6026_v12 = vld [vmem:[#allocation30_spill] sm:$0xff] }
 0x221   : > { %v3244_v35 = vadd.f32 %v5581_v1, %v3098_v41  ;;  %v3233_v52 = vadd.f32 %v5526_v31, %v3045_v25  ;;  %v3658_v1 = vsel %vm379_vm2, %v3247_v3, -inf  ;;  %v6028_v41 = vld [vmem:[#allocation35_spill] sm:$0xff] }
 0x222   : > { %v3601_v48 = vrot.slane %v3600_v62, 2 }
 0x223   : > { %v3647_v44 = vsel %vm379_vm2, %v3244_v35, -inf  ;;  %v3610_v10 = vsel %vm379_vm2, %v3233_v52, -inf }
 0x224   : > { %v3602_v49 = vmax.f32 %v3600_v62, %v3601_v48  ;;  %v5790_v58 = vmax.f32 %v3646_v27, %v3647_v44  ;;  %v3611_v33 = vmax.f32 %v3609_v51, %v3610_v10  ;;  %v3117_v18 = vpop.permute.xlu1 %3116  ;;  %v3109_v23 = vpop.permute.xlu0 %3108 }
 0x225   : > { %v3248_v40 = vadd.f32 %v5600_v4, %v3117_v18  ;;  %v3246_v45 = vadd.f32 %v3109_v23, %v5604_v36  ;;  %v6029_v18 = vld [vmem:[#allocation33_spill] sm:$0xff] }
 0x226   : > { %v3603_v7 = vrot.slane %v3602_v49, 1  ;;  %v3612_v47 = vrot.slane %v3611_v33, 4 }
 0x227   : > { %v3657_v31 = vsel %vm379_vm2, %v3246_v45, -inf  ;;  %v3660_v37 = vsel %vm379_vm2, %v3248_v40, -inf }
 0x228   : > { %v3604_v43 = vmax.f32 %v3602_v49, %v3603_v7  ;;  %v3613_v39 = vmax.f32 %v3611_v33, %v3612_v47  ;;  %v3659_v17 = vmax.f32 %v3657_v31, %v3658_v1  ;;  %v3064_v11 = vpop.permute.xlu0 %3063  ;;  %v2828_v59 = vpop.permute.xlu1 %2827 }
 0x229   : > { %v3237_v51 = vadd.f32 %v5547_v13, %v3064_v11  ;;  %v3187_v20 = vadd.f32 %v2828_v59, %v6024_v53  ;;  %v6030_v59 = vld [vmem:[#allocation34_spill] sm:$0xff]  ;;  %v6033_v53 = vld [vmem:[#allocation37_spill] sm:$0xff] }
 0x22a   : > { %v3731_v46 = vsel %vm3704_vm8, %v3604_v43, %v3730_v19  ;;  %v3614_v4 = vrot.slane %v3613_v39, 2  ;;  %v5799_v56 = vmax.f32 %v3659_v17, %v3660_v37 }
 0x22b   : > { %v3623_v36 = vsel %vm379_vm2, %v3237_v51, -inf  ;;  %v3463_v28 = vsel %vm379_vm2, %v3187_v20, -inf  ;;  %v6031_v51 = vld [vmem:[#allocation32_spill] sm:$0xff] }
 0x22c   : > { %v3615_v0 = vmax.f32 %v3613_v39, %v3614_v4  ;;  %v3624_v34 = vmax.f32 %v5771_v61, %v3623_v36  ;;  %v3083_v22 = vpop.permute.xlu0 %3082  ;;  %v2836_v2 = vpop.permute.xlu1 %2835 }
 0x22d   : > { %v3241_v55 = vadd.f32 %v5568_v57, %v3083_v22  ;;  %v3189_v42 = vadd.f32 %v6026_v12, %v2836_v2 }
 0x22e   : > { %v3616_v54 = vrot.slane %v3615_v0, 1  ;;  %v3625_v5 = vrot.slane %v3624_v34, 4 }
 0x22f   : > { %v3636_v13 = vsel %vm379_vm2, %v3241_v55, -inf  ;;  %v3467_v33 = vsel %vm379_vm2, %v3189_v42, -inf }
 0x230   : > { %v3617_v24 = vmax.f32 %v3615_v0, %v3616_v54  ;;  %v3626_v8 = vmax.f32 %v3624_v34, %v3625_v5  ;;  %v3637_v29 = vmax.f32 %v3635_v50, %v3636_v13  ;;  %v2847_v21 = vpop.permute.xlu1 %2846  ;;  %v2824_v26 = vpop.permute.xlu0 %2823  ;;  %v6027_v50 = vld [vmem:[#allocation28_spill] sm:$0xff]  ;;  %v6032_v0 = vld [vmem:[#allocation39_spill] sm:$0xff] }
 0x231   : > { %v3186_v6 = vadd.f32 %v2824_v26, %v6025_v30  ;;  %v3191_v25 = vadd.f32 %v2847_v21, %v6028_v41  ;;  %v6038_v41 = vld [vmem:[#allocation41_spill] sm:$0xff] }
 0x232   : > { %v3732_v32 = vsel %vm3706_vm9, %v3617_v24, %v3731_v46  ;;  %v3627_v61 = vrot.slane %v3626_v8, 2  ;;  %v3638_v14 = vrot.slane %v3637_v29, 4 }
 0x233   : > { %v3462_v57 = vsel %vm379_vm2, %v3186_v6, -inf  ;;  %v3476_v47 = vsel %vm379_vm2, %v3191_v25, -inf }
 0x234   : > { %v3628_v60 = vmax.f32 %v3626_v8, %v3627_v61  ;;  %v3639_v38 = vmax.f32 %v3637_v29, %v3638_v14  ;;  %v3464_v3 = vmax.f32 %v3462_v57, %v3463_v28  ;;  %v2855_v15 = vpop.permute.xlu1 %2854  ;;  %v2832_v19 = vpop.permute.xlu0 %2831  ;;  %v6035_v14 = vld [vmem:[#allocation36_spill] sm:$0xff] }
 0x235   : > { %v3188_v16 = vadd.f32 %v6027_v50, %v2832_v19  ;;  %v3193_v37 = vadd.f32 %v6030_v59, %v2855_v15 }
 0x236   : > { %v3629_v62 = vrot.slane %v3628_v60, 1  ;;  %v3640_v27 = vrot.slane %v3639_v38, 2 }
 0x237   : > { %v3465_v35 = vsel %vm379_vm2, %v3188_v16, -inf  ;;  %v3480_v5 = vsel %vm379_vm2, %v3193_v37, -inf  ;;  %v6041_v37 = vld [vmem:[#allocation51_spill] sm:$0xff] }
 0x238   : > { %v3630_v52 = vmax.f32 %v3628_v60, %v3629_v62  ;;  %v3641_v48 = vmax.f32 %v3639_v38, %v3640_v27  ;;  %v3466_v44 = vmax.f32 %v3464_v3, %v3465_v35  ;;  %v2866_v10 = vpop.permute.xlu1 %2865  ;;  %v2843_v49 = vpop.permute.xlu0 %2842  ;;  %v6036_v38 = vld [vmem:[#allocation43_spill] sm:$0xff]  ;;  %v6037_v62 = vld [vmem:[#allocation40_spill] sm:$0xff] }
 0x239   : > { %v3190_v23 = vadd.f32 %v2843_v49, %v6029_v18  ;;  %v3195_v34 = vadd.f32 %v2866_v10, %v6032_v0  ;;  %v6039_v10 = vld [vmem:[#allocation47_spill] sm:$0xff] }
 0x23a   : > { %v3733_v40 = vsel %vm3708_vm10, %v3630_v52, %v3732_v32  ;;  %v3642_v45 = vrot.slane %v3641_v48, 1  ;;  %v3468_v7 = vmax.f32 %v3466_v44, %v3467_v33  ;;  %v6034_v32 = vld [vmem:[#allocation38_spill] sm:$0xff] }
 0x23b   : > { %v3475_v1 = vsel %vm379_vm2, %v3190_v23, -inf  ;;  %v3489_v8 = vsel %vm379_vm2, %v3195_v34, -inf }
 0x23c   : > { %v3643_v31 = vmax.f32 %v3641_v48, %v3642_v45  ;;  %v3469_v43 = vrot.slane %v3468_v7, 4  ;;  %v3477_v39 = vmax.f32 %v3475_v1, %v3476_v47  ;;  %v2874_v17 = vpop.permute.xlu1 %2873  ;;  %v2851_v11 = vpop.permute.xlu0 %2850  ;;  %v6040_v1 = vld [vmem:[#allocation45_spill] sm:$0xff] }
 0x23d   : > { %v3192_v46 = vadd.f32 %v6031_v51, %v2851_v11  ;;  %v3197_v61 = vadd.f32 %v6034_v32, %v2874_v17  ;;  %v6044_v32 = vld [vmem:[#allocation55_spill] sm:$0xff] }
 0x23e   : > { %v5822_v4 = vsel %vm3710_vm11, %v3643_v31, %v3733_v40  ;;  %v3470_v36 = vmax.f32 %v3468_v7, %v3469_v43 }
 0x23f   : > { %v3478_v22 = vsel %vm379_vm2, %v3192_v46, -inf  ;;  %v3493_v16 = vsel %vm379_vm2, %v3197_v61, -inf }
 0x240   : > { %v3479_v2 = vmax.f32 %v3477_v39, %v3478_v22  ;;  %v2885_v55 = vpop.permute.xlu1 %2884  ;;  %v2862_v54 = vpop.permute.xlu0 %2861  ;;  %v3471_v13 = vrot.slane %v3470_v36, 2 }
 0x241   : > { %v3194_v20 = vadd.f32 %v2862_v54, %v6033_v53  ;;  %v3199_v3 = vadd.f32 %v2885_v55, %v6036_v38  ;;  %v6042_v55 = vld [vmem:[#allocation44_spill] sm:$0xff] }
 0x242   : > { %v3481_v24 = vmax.f32 %v3479_v2, %v3480_v5  ;;  %v3472_v57 = vmax.f32 %v3470_v36, %v3471_v13  ;;  %v6043_v5 = vld [vmem:[#allocation49_spill] sm:$0xff] }
 0x243   : > { %v3488_v29 = vsel %vm379_vm2, %v3194_v20, -inf  ;;  %v3502_v44 = vsel %vm379_vm2, %v3199_v3, -inf }
 0x244   : > { %v3482_v21 = vrot.slane %v3481_v24, 4  ;;  %v3490_v26 = vmax.f32 %v3488_v29, %v3489_v8  ;;  %v2904_v30 = vpop.permute.xlu1 %2903  ;;  %v2870_v6 = vpop.permute.xlu0 %2869  ;;  %v3473_v35 = vrot.slane %v3472_v57, 1 }
 0x245   : > { %v3196_v28 = vadd.f32 %v6035_v14, %v2870_v6  ;;  %v3203_v49 = vadd.f32 %v2904_v30, %v6039_v10  ;;  %v6045_v14 = vld [vmem:[#allocation53_spill] sm:$0xff] }
 0x246   : > { %v3483_v60 = vmax.f32 %v3481_v24, %v3482_v21  ;;  %v3474_v43 = vmax.f32 %v3472_v57, %v3473_v35 }
 0x247   : > { %v3491_v15 = vsel %vm379_vm2, %v3196_v28, -inf  ;;  %v3515_v59 = vsel %vm379_vm2, %v3203_v49, -inf  ;;  %v6049_v49 = vld [vmem:[#allocation57_spill] sm:$0xff] }
 0x248   : > { %v3484_v19 = vrot.slane %v3483_v60, 2  ;;  %v3492_v12 = vmax.f32 %v3490_v26, %v3491_v15  ;;  %v2889_v42 = vpop.permute.xlu1 %2888  ;;  %v2881_v50 = vpop.permute.xlu0 %2880 }
 0x249   : > { %v3200_v27 = vadd.f32 %v6037_v62, %v2889_v42  ;;  %v3198_v25 = vadd.f32 %v2881_v50, %v6038_v41  ;;  %v6046_v42 = vld [vmem:[#allocation48_spill] sm:$0xff] }
 0x24a   : > { %v3485_v52 = vmax.f32 %v3483_v60, %v3484_v19  ;;  %v3494_v48 = vmax.f32 %v3492_v12, %v3493_v16  ;;  %v6047_v16 = vld [vmem:[#allocation42_spill] sm:$0xff] }
 0x24b   : > { %v3501_v33 = vsel %vm379_vm2, %v3198_v25, -inf  ;;  %v3504_v47 = vsel %vm379_vm2, %v3200_v27, -inf }
 0x24c   : > { %v3486_v18 = vrot.slane %v3485_v52, 1  ;;  %v3495_v23 = vrot.slane %v3494_v48, 4  ;;  %v3503_v40 = vmax.f32 %v3501_v33, %v3502_v44  ;;  %v2923_v45 = vpop.permute.xlu1 %2922  ;;  %v2900_v7 = vpop.permute.xlu0 %2899  ;;  %v6048_v44 = vld [vmem:[#allocation59_spill] sm:$0xff] }
 0x24d   : > { %v3202_v31 = vadd.f32 %v2900_v7, %v6040_v1  ;;  %v3207_v51 = vadd.f32 %v2923_v45, %v6041_v37 }
 0x24e   : > { %v3487_v39 = vmax.f32 %v3485_v52, %v3486_v18  ;;  %v3496_v17 = vmax.f32 %v3494_v48, %v3495_v23  ;;  %v3505_v11 = vmax.f32 %v3503_v40, %v3504_v47 }
 0x24f   : > { %v3514_v46 = vsel %vm379_vm2, %v3202_v31, -inf  ;;  %v3528_v13 = vsel %vm379_vm2, %v3207_v51, -inf  ;;  %v6050_v31 = vld [vmem:[#allocation52_spill] sm:$0xff] }
 0x250   : > { %v3723_v36 = vsel %vm3702_vm7, %v3487_v39, %v3474_v43  ;;  %v3497_v0 = vrot.slane %v3496_v17, 2  ;;  %v3516_v34 = vmax.f32 %v3514_v46, %v3515_v59  ;;  %v2908_v22 = vpop.permute.xlu1 %2907  ;;  %v2919_v2 = vpop.permute.xlu0 %2918  ;;  %v6051_v39 = vld [vmem:[#allocation46_spill] sm:$0xff] }
 0x251   : > { %v3204_v54 = vadd.f32 %v6042_v55, %v2908_v22  ;;  %v3206_v53 = vadd.f32 %v2919_v2, %v6043_v5  ;;  %v6052_v22 = vld [vmem:[#allocation56_spill] sm:$0xff]  ;;  %v6053_v55 = vld [vmem:[#allocation50_spill] sm:$0xff] }
 0x252   : > { %v3498_v20 = vmax.f32 %v3496_v17, %v3497_v0 }
 0x253   : > { %v3517_v24 = vsel %vm379_vm2, %v3204_v54, -inf  ;;  %v3527_v8 = vsel %vm379_vm2, %v3206_v53, -inf }
 0x254   : > { %v3499_v29 = vrot.slane %v3498_v20, 1  ;;  %v3518_v21 = vmax.f32 %v3516_v34, %v3517_v24  ;;  %v3529_v26 = vmax.f32 %v3527_v8, %v3528_v13  ;;  %v2942_v30 = vpop.permute.xlu1 %2941  ;;  %v2938_v6 = vpop.permute.xlu0 %2937 }
 0x255   : > { %v3211_v61 = vadd.f32 %v2942_v30, %v6044_v32  ;;  %v3210_v28 = vadd.f32 %v2938_v6, %v6045_v14  ;;  %v6054_v32 = vld [vmem:[#allocation54_spill] sm:$0xff] }
 0x256   : > { %v3500_v57 = vmax.f32 %v3498_v20, %v3499_v29 }
 0x257   : > { %v3541_v60 = vsel %vm379_vm2, %v3211_v61, -inf  ;;  %v3540_v38 = vsel %vm379_vm2, %v3210_v28, -inf }
 0x258   : > { %v3724_v3 = vsel %vm3704_vm8, %v3500_v57, %v3723_v36  ;;  %v3542_v15 = vmax.f32 %v3540_v38, %v3541_v60  ;;  %v2927_v19 = vpop.permute.xlu1 %2926  ;;  %v2893_v12 = vpop.permute.xlu0 %2892 }
 0x259   : > { %v3208_v50 = vadd.f32 %v6046_v42, %v2927_v19  ;;  %v3201_v62 = vadd.f32 %v6047_v16, %v2893_v12 }
 0x25b   : > { %v3530_v27 = vsel %vm379_vm2, %v3208_v50, -inf  ;;  %v3506_v41 = vsel %vm379_vm2, %v3201_v62, -inf }
 0x25c   : > { %v3531_v25 = vmax.f32 %v3529_v26, %v3530_v27  ;;  %v3507_v35 = vmax.f32 %v3505_v11, %v3506_v41  ;;  %v2961_v52 = vpop.permute.xlu1 %2960  ;;  %v2957_v48 = vpop.permute.xlu0 %2956 }
 0x25d   : > { %v3215_v10 = vadd.f32 %v2961_v52, %v6048_v44  ;;  %v3214_v33 = vadd.f32 %v2957_v48, %v6049_v49 }
 0x25e   : > { %v3508_v18 = vrot.slane %v3507_v35, 4 }
 0x25f   : > { %v3554_v23 = vsel %vm379_vm2, %v3215_v10, -inf  ;;  %v3553_v40 = vsel %vm379_vm2, %v3214_v33, -inf }
 0x260   : > { %v3509_v45 = vmax.f32 %v3507_v35, %v3508_v18  ;;  %v3555_v7 = vmax.f32 %v3553_v40, %v3554_v23  ;;  %v2946_v47 = vpop.permute.xlu1 %2945  ;;  %v2912_v1 = vpop.permute.xlu0 %2911 }
 0x261   : > { %v3212_v43 = vadd.f32 %v6050_v31, %v2946_v47  ;;  %v3205_v17 = vadd.f32 %v6051_v39, %v2912_v1 }
 0x262   : > { %v3510_v11 = vrot.slane %v3509_v45, 2 }
 0x263   : > { %v3543_v59 = vsel %vm379_vm2, %v3212_v43, -inf  ;;  %v3519_v37 = vsel %vm379_vm2, %v3205_v17, -inf }
 0x264   : > { %v3511_v51 = vmax.f32 %v3509_v45, %v3510_v11  ;;  %v3544_v46 = vmax.f32 %v3542_v15, %v3543_v59  ;;  %v3520_v36 = vmax.f32 %v3518_v21, %v3519_v37  ;;  %v2965_v0 = vpop.permute.xlu1 %2964  ;;  %v2931_v34 = vpop.permute.xlu0 %2930 }
 0x265   : > { %v3216_v2 = vadd.f32 %v6052_v22, %v2965_v0  ;;  %v3209_v54 = vadd.f32 %v6053_v55, %v2931_v34 }
 0x266   : > { %v3512_v5 = vrot.slane %v3511_v51, 1  ;;  %v3521_v53 = vrot.slane %v3520_v36, 4 }
 0x267   : > { %v3556_v20 = vsel %vm379_vm2, %v3216_v2, -inf  ;;  %v3532_v13 = vsel %vm379_vm2, %v3209_v54, -inf }
 0x268   : > { %v3513_v24 = vmax.f32 %v3511_v51, %v3512_v5  ;;  %v3522_v8 = vmax.f32 %v3520_v36, %v3521_v53  ;;  %v3557_v29 = vmax.f32 %v3555_v7, %v3556_v20  ;;  %v3533_v26 = vmax.f32 %v3531_v25, %v3532_v13  ;;  %v3102_v30 = vpop.permute.xlu1 %3101  ;;  %v2950_v6 = vpop.permute.xlu0 %2949  ;;  %v3253_v5 = vld [vmem:[#allocation2 + $0x18] sm:$0xff]  ;;  %v3252_v20 = vld [vmem:[#allocation2 + $0x10] sm:$0xff] }
 0x269   : > { %v3245_v21 = vadd.f32 %v5589_v63, %v3102_v30  ;;  %v3213_v61 = vadd.f32 %v6054_v32, %v2950_v6  ;;  %v6055_v63 = vld [vmem:[#allocation58_spill] sm:$0xff]  ;;  %v4408_v6 = vld [vmem:[%s5913_s5] ss:$0 sm:$0xff] }
 0x26a   : > { %v3725_v14 = vsel %vm3706_vm9, %v3513_v24, %v3724_v3  ;;  %v3523_v28 = vrot.slane %v3522_v8, 2  ;;  %v3534_v57 = vrot.slane %v3533_v26, 4 }
 0x26b   : > { %v3649_v60 = vsel %vm379_vm2, %v3245_v21, -inf  ;;  %v3545_v38 = vsel %vm379_vm2, %v3213_v61, -inf }
 0x26c   : > { %v3524_v15 = vmax.f32 %v3522_v8, %v3523_v28  ;;  %v3535_v19 = vmax.f32 %v3533_v26, %v3534_v57  ;;  %v3650_v12 = vmax.f32 %v5790_v58, %v3649_v60  ;;  %v3546_v42 = vmax.f32 %v3544_v46, %v3545_v38  ;;  %v3121_v50 = vpop.permute.xlu1 %3120  ;;  %v2969_v16 = vpop.permute.xlu0 %2968 }
 0x26d   : > { %v3249_v62 = vadd.f32 %v5607_v9, %v3121_v50  ;;  %v3217_v27 = vadd.f32 %v6055_v63, %v2969_v16 }
 0x26e   : > { %v3525_v41 = vrot.slane %v3524_v15, 1  ;;  %v3536_v25 = vrot.slane %v3535_v19, 2  ;;  %v3651_v3 = vrot.slane %v3650_v12, 4  ;;  %v3547_v35 = vrot.slane %v3546_v42, 4 }
 0x26f   : > { %v3662_v52 = vsel %vm379_vm2, %v3249_v62, -inf  ;;  %v3558_v48 = vsel %vm379_vm2, %v3217_v27, -inf }
 0x270   : > { %v3526_v44 = vmax.f32 %v3524_v15, %v3525_v41  ;;  %v3537_v10 = vmax.f32 %v3535_v19, %v3536_v25  ;;  %v3652_v49 = vmax.f32 %v3650_v12, %v3651_v3  ;;  %v3548_v33 = vmax.f32 %v3546_v42, %v3547_v35 }
 0x271   : > { %v3663_v58 = vmax.f32 %v5799_v56, %v3662_v52  ;;  %v3559_v18 = vmax.f32 %v3557_v29, %v3558_v48 }
 0x272   : > { %v3726_v23 = vsel %vm3708_vm10, %v3526_v44, %v3725_v14  ;;  %v3538_v9 = vrot.slane %v3537_v10, 1  ;;  %v3653_v40 = vrot.slane %v3652_v49, 2  ;;  %v3549_v45 = vrot.slane %v3548_v33, 2 }
 0x273   : > { %v3664_v7 = vrot.slane %v3663_v58, 4  ;;  %v3560_v47 = vrot.slane %v3559_v18, 4 }
 0x274   : > { %v3539_v1 = vmax.f32 %v3537_v10, %v3538_v9  ;;  %v3654_v31 = vmax.f32 %v3652_v49, %v3653_v40  ;;  %v3550_v43 = vmax.f32 %v3548_v33, %v3549_v45 }
 0x275   : > { %v3665_v39 = vmax.f32 %v3663_v58, %v3664_v7  ;;  %v3561_v17 = vmax.f32 %v3559_v18, %v3560_v47 }
 0x276   : > { %v3727_v11 = vsel %vm3710_vm11, %v3539_v1, %v3726_v23  ;;  %v3655_v59 = vrot.slane %v3654_v31, 1  ;;  %v3551_v37 = vrot.slane %v3550_v43, 1 }
 0x277   : > { %v3666_v51 = vrot.slane %v3665_v39, 2  ;;  %v3562_v46 = vrot.slane %v3561_v17, 2 }
 0x278   : > { %v3656_v56 = vmax.f32 %v3654_v31, %v3655_v59  ;;  %v3552_v36 = vmax.f32 %v3550_v43, %v3551_v37 }
 0x279   : > { %v3667_v0 = vmax.f32 %v3665_v39, %v3666_v51  ;;  %v3563_v34 = vmax.f32 %v3561_v17, %v3562_v46 }
 0x27a   : > { %v3735_v22 = vsel %vm3712_vm12, %v3656_v56, %v5822_v4  ;;  %v3728_v2 = vsel %vm3712_vm12, %v3552_v36, %v3727_v11 }
 0x27b   : > { %v3668_v55 = vrot.slane %v3667_v0, 1  ;;  %v3564_v54 = vrot.slane %v3563_v34, 1 }
 0x27d   : > { %v3669_v53 = vmax.f32 %v3667_v0, %v3668_v55  ;;  %v3565_v13 = vmax.f32 %v3563_v34, %v3564_v54 }
 0x27f   : > { %v3736_v24 = vsel %vm3714_vm13, %v3669_v53, %v3735_v22  ;;  %v3729_v8 = vsel %vm3714_vm13, %v3565_v13, %v3728_v2 }
 0x280   : > { %v3744_v29 = vmax.f32 %v3253_v5, %v3736_v24  ;;  %v3743_v26 = vmax.f32 %v3252_v20, %v3729_v8 }
 0x282   : > { %3748 = vst.msk [vmem:[#allocation2 + $0x18] sm:$0xff] %vm379_vm2, %v3744_v29  ;;  %3747 = vst.msk [vmem:[#allocation2 + $0x10] sm:$0xff] %vm379_vm2, %v3743_v26 }
 0x289   : > { %v3755_v4 = vld [vmem:[#allocation2 + $0x18] sm:$0xff]  ;;  %v3754_v30 = vld [vmem:[#allocation2 + $0x10] sm:$0xff] }
 0x28a   : > { %v3766_v21 = vadd.f32 %v4408_v6, %v3755_v4  ;;  %v3765_v32 = vadd.f32 %v4408_v6, %v3754_v30 }
 0x28c   : > { %v3770_v61 = vmax.f32 %v3766_v21, 0.0  ;;  %v3769_v14 = vmax.f32 %v3765_v32, 0.0 }
 0x28e   : > { %3774 = vst.msk [vmem:[%s5661_s7 + $0x18] sm:$0xff] %vm379_vm2, %v3770_v61  ;;  %3773 = vst.msk [vmem:[%s5661_s7 + $0x10] sm:$0xff] %vm379_vm2, %v3769_v14 }
 0x28f PF: > { %s16_s23 = sadd.s32 1, %s4431_s23   ;;  %s6056_s21 = smov %s4427_s22 }
 0x290   : > { %p13_p5 = scmp.ge.s32.totalorder %s16_s23, 4   ;;  %s6057_s22 = smov %s6059_s24 }
 0x292   :  { %15 = sbr.rel (!%p13_p5) target bundleno = 2 (0x2), region = 93 }

// kernel: forward.6
= control target key start
LH: loop header
LB: loop body
LE: loop exit
PB: predicated region body
PF: predicated region fallthrough
CT: control target
= control target key end

     0   :  { %s1414_s21 = smov 0   ;;  %s1416_s22 = smov 0   ;;  %s1607_s0 = inlined_call_operand.vmem [shape: f32[2,4,5], index: 0, kind: input, shape index: {}]   ;;  %s1608_s1 = inlined_call_operand.vmem [shape: bf16[2,4,256], index: 1, kind: input, shape index: {}]   ;;  %s1609_s2 = inlined_call_operand.vmem [shape: f32[2,4,5], index: 2, kind: input, shape index: {}]   ;;  %s1610_s3 = inlined_call_operand.vmem [shape: bf16[2,4,256], index: 3, kind: input, shape index: {}]   ;;  %s1611_s4 = inlined_call_operand.vmem [shape: bf16[256,256], index: 4, kind: input, shape index: {}]   ;;  %s1612_s5 = inlined_call_operand.vmem [shape: f32[1,256], index: 5, kind: input, shape index: {}]   ;;  %s1613_s6 = inlined_call_operand.vmem [shape: f32[2,4,256], index: 6, kind: output, shape index: {}]  }
   0x1   :  { %s1418_s23 = smov 0  }
   0x2 LB: > { %s35_s24 = sadd.s32 1, %s1367_s22  ;;  %p1213_p0 = scmp.ge.s32.totalorder %s1371_s23, 1  ;;  %s1371_s23 = sphi %s1418_s23, %s16_s23   ;;  %s1367_s22 = sphi %s1416_s22, %s1615_s22   ;;  %s1363_s21 = sphi %s1414_s21, %s1614_s21  }
   0x3   : > { %p37_p1 = scmp.ge.s32.totalorder %s35_s24, 2  ;;  %p272_p2 = scmp.lt.s32.totalorder %s1371_s23, 3 }
   0x5   : > { %s1617_s24 = smov (%p37_p1, %s35_s24), 0  ;;  %p273_p3 = pnand %p1213_p0, %p272_p2 }
   0x6   : > { %p326_p4 = scmp.lt.s32.totalorder (!%p273_p3), %s1363_s21, 1  ;;  %v473_v0 = vlaneseq (!%p273_p3)  ;;  %v1373_v1 = vmov (!%p273_p3), 0.0   ;;  %vm1374_vm0 = vmmov (!%p273_p3), 0   ;;  %v1301_v2 = vld [vmem:[%s1611_s4 + $0x4] ss:$8 sps:$4 sm:$0xff] (!%p273_p3)   ;;  %vm370_vm1 = vcmask (!%p273_p3), 39936  }
   0x7   : > { %276 = sbr.rel (%p273_p3) target bundleno = 391 (0x187), region = 44  ;;  %1266 = vmatprep.subr.mxu0 (!%p273_p3), %v1373_v1  ;;  %1268 = vmatprep.mubr.msk.f32.mxu0 (!%p273_p3), %vm1374_vm0, %v1373_v1  ;;  %v1303_v3 = vld [vmem:[%s1611_s4] ss:$8 sps:$4 sm:$0xff] (!%p273_p3)   ;;  %v1304_v5 = vld [vmem:[%s1611_s4 + $0x14] ss:$8 sps:$4 sm:$0xff] (!%p273_p3)   ;;  %vm965_vm3 = vcmask (!%p273_p3), 1043456  }
   0x8   : > { %v1440_v4 = vshrl.u32 (!%p273_p3), %v473_v0, 7  ;;  %829 = vmatprep.subr.bf16.mxu1 (!%p273_p3), %v1301_v2  ;;  %v1306_v6 = vld [vmem:[%s1611_s4 + $0x10] ss:$8 sps:$4 sm:$0xff] (!%p273_p3)   ;;  %v1307_v7 = vld [vmem:[%s1611_s4 + $0x24] ss:$8 sps:$4 sm:$0xff] (!%p273_p3)   ;;  %vm1035_vm4 = vcmask (!%p273_p3), 1041409  }
   0x9   : > { %830 = vmatpush1.bf16.msra.mxu1 (!%p273_p3), %v1303_v3  ;;  %v1375_v12 = vmov (!%p273_p3), 1983009808   ;;  %v1309_v18 = vld [vmem:[%s1611_s4 + $0x20] ss:$8 sps:$4 sm:$0xff] (!%p273_p3)   ;;  %v1310_v24 = vld [vmem:[%s1611_s4 + $0x34] ss:$8 sps:$4 sm:$0xff] (!%p273_p3)  }
   0xa   : > { %v1463_v8 = vsub.s32 (!%p273_p3), 0, %v1440_v4  ;;  %v1466_v9 = vsub.s32 (!%p273_p3), 1, %v1440_v4  ;;  %831 = vmatprep.subr.bf16.mxu1 (!%p273_p3), %v1304_v5  ;;  %v571_v13 = vunpack.c.l.s4 (!%p273_p3), %v1375_v12  ;;  %v1312_v31 = vld [vmem:[%s1611_s4 + $0x30] ss:$8 sps:$4 sm:$0xff] (!%p273_p3)   ;;  %v1313_v37 = vld [vmem:[%s1611_s4 + $0x44] ss:$8 sps:$4 sm:$0xff] (!%p273_p3)  }
   0xb   : > { %v1315_v49 = vld [vmem:[%s1611_s4 + $0x40] ss:$8 sps:$4 sm:$0xff] (!%p273_p3)   ;;  %v1316_v53 = vld [vmem:[%s1611_s4 + $0x54] ss:$8 sps:$4 sm:$0xff] (!%p273_p3)   ;;  %v1318_v61 = vld [vmem:[%s1611_s4 + $0x50] ss:$8 sps:$4 sm:$0xff] (!%p273_p3)  }
   0xc   : > { %v572_v19 = vunpack.c.0.s8 (!%p273_p3), %v571_v13  ;;  %v1319_v0 = vld [vmem:[%s1611_s4 + $0x64] ss:$8 sps:$4 sm:$0xff] (!%p273_p3)   ;;  %v1376_v5 = vmov (!%p273_p3), 0   ;;  %v1322_v13 = vld [vmem:[%s1611_s4 + $0x74] ss:$8 sps:$4 sm:$0xff] (!%p273_p3)   ;;  %vm1037_vm5 = vcmask (!%p273_p3), 1045509  }
   0xd   : > { %832 = vmatpush1.bf16.msra.mxu1 (!%p273_p3), %v1306_v6  ;;  %vm1040_vm6 = vcmask (!%p273_p3), 1042434   ;;  %vm1042_vm7 = vcmask (!%p273_p3), 1046534   ;;  %vm1045_vm8 = vcmask (!%p273_p3), 1043459   ;;  %vm1047_vm9 = vcmask (!%p273_p3), 1047559  }
   0xe   : > { %s1619_s21 = smov (!%p326_p4, %s1363_s21), 1  ;;  %833 = vmatprep.subr.bf16.mxu1 %v1307_v7  ;;  %v575_v34 = vsub.s32 %v572_v19, %v1440_v4  ;;  %v1325_v19 = vld [vmem:[%s1611_s4 + $0x84] ss:$8 sps:$4 sm:$0xff]  }
   0xf   : > { %s1446_s7 = sshll.u32 %s1619_s21, 2 }
  0x10   : > { %s341_s14 = scalar_lea.vmem %s1608_s1, %s1446_s7  ;;  %s345_s17 = scalar_lea.vmem %s1609_s2, %s1446_s7 }
  0x11   : > { %v369_v10 = vld [vmem:[%s345_s17] sm:$0xf]  ;;  %s332_s20 = scalar_lea.vmem %s1607_s0, %s1446_s7  ;;  %s350_s8 = scalar_lea.vmem %s1610_s3, %s1446_s7  ;;  %834 = vmatpush1.bf16.msra.mxu1 %v1309_v18  ;;  %v1324_v18 = vld [vmem:[%s1611_s4 + $0x70] ss:$8 sps:$4 sm:$0xff]  }
  0x12   : > { %v1224_v11 = vld.sshfl [vmem:[%s341_s14] sm:$0x33 pattern:$0x75316420]  ;;  %1267 = vmatpush3.xpose.msk.msra.mxu0 %vm370_vm1, %v369_v10  ;;  %835 = vmatprep.subr.bf16.mxu1 %v1310_v24  ;;  %v1330_v24 = vld [vmem:[%s1611_s4 + $0x90] ss:$8 sps:$4 sm:$0xff]  }
  0x13   : > { %v464_v14 = vcombine.high %v1224_v11, %v1224_v11  ;;  %v466_v15 = vunpack.i.h.s16 %v1224_v11  ;;  %v1225_v16 = vpack.i.b16 %v1224_v11, %v1224_v11  ;;  %v367_v17 = vld [vmem:[%s332_s20] sm:$0xf]  ;;  %s1263_s20 = sshll.u32 %s1619_s21, 3 }
  0x14   : > { %v454_v44 = vld [vmem:[%s350_s8] sm:$0xf]  ;;  %s359_s27 = scalar_lea.vmem %s1613_s6, %s1263_s20 }
  0x15   : > { %v468_v20 = vunpack.i.h.s16 %v464_v14  ;;  %v470_v21 = vpack.i.b16 %v466_v15, %v466_v15  ;;  %v1226_v22 = vpack.i.b16 %v464_v14, %v464_v14  ;;  %v476_v23 = vrot.slane %v1225_v16, %v1463_v8  ;;  %1269 = vmatmul.mubr.msk.f32.vlgmr.msra.gmra.mrb[0].mxu0 %vm370_vm1, %v367_v17  ;;  %836 = vmatpush1.bf16.msra.mxu1 %v1312_v31  ;;  %v1321_v11 = vld [vmem:[%s1611_s4 + $0x60] ss:$8 sps:$4 sm:$0xff]   ;;  %v1340_v31 = vld [vmem:[%s1611_s4 + $0xd4] ss:$8 sps:$4 sm:$0xff]  }
  0x16   : > { %v480_v25 = vrot.slane %v1225_v16, %v1466_v9  ;;  %837 = vmatprep.subr.bf16.mxu1 %v1313_v37 }
  0x17   : > { %v472_v26 = vpack.i.b16 %v468_v20, %v468_v20  ;;  %v484_v27 = vrot.slane %v470_v21, %v1463_v8  ;;  %v488_v28 = vrot.slane %v470_v21, %v1466_v9  ;;  %v506_v29 = vpack.i.b16 %v476_v23, %v476_v23  ;;  %v1328_v23 = vld [vmem:[%s1611_s4 + $0x94] ss:$8 sps:$4 sm:$0xff]  }
  0x18   : > { %v513_v30 = vpack.i.b16 %v480_v25, %v480_v25  ;;  %v492_v32 = vrot.slane %v1226_v22, %v1463_v8  ;;  %v496_v33 = vrot.slane %v1226_v22, %v1466_v9  ;;  %v1327_v22 = vld [vmem:[%s1611_s4 + $0x80] ss:$8 sps:$4 sm:$0xff]   ;;  %v1331_v25 = vld [vmem:[%s1611_s4 + $0xa4] ss:$8 sps:$4 sm:$0xff]  }
  0x19   : > { %v520_v35 = vpack.i.b16 %v484_v27, %v484_v27  ;;  %v527_v36 = vpack.i.b16 %v488_v28, %v488_v28  ;;  %v500_v38 = vrot.slane %v472_v26, %v1463_v8  ;;  %v504_v39 = vrot.slane %v472_v26, %v1466_v9  ;;  %838 = vmatpush1.bf16.msra.mxu1 %v1315_v49  ;;  %v1333_v26 = vld [vmem:[%s1611_s4 + $0xa0] ss:$8 sps:$4 sm:$0xff]   ;;  %v1334_v27 = vld [vmem:[%s1611_s4 + $0xb4] ss:$8 sps:$4 sm:$0xff]   ;;  %v1336_v28 = vld [vmem:[%s1611_s4 + $0xb0] ss:$8 sps:$4 sm:$0xff]  }
  0x1a   : > { %v511_v40 = vrot.slane %v506_v29, %v1463_v8  ;;  %v518_v41 = vrot.slane %v513_v30, %v1463_v8  ;;  %v534_v42 = vpack.i.b16 %v492_v32, %v492_v32  ;;  %v541_v43 = vpack.i.b16 %v496_v33, %v496_v33  ;;  %839 = vmatprep.subr.bf16.mxu1 %v1316_v53  ;;  %v1337_v29 = vld [vmem:[%s1611_s4 + $0xc4] ss:$8 sps:$4 sm:$0xff]   ;;  %v1339_v30 = vld [vmem:[%s1611_s4 + $0xc0] ss:$8 sps:$4 sm:$0xff]   ;;  %v1342_v32 = vld [vmem:[%s1611_s4 + $0xd0] ss:$8 sps:$4 sm:$0xff]  }
  0x1b   : > { %v525_v45 = vrot.slane %v520_v35, %v1463_v8  ;;  %v532_v46 = vrot.slane %v527_v36, %v1463_v8  ;;  %v548_v47 = vpack.i.b16 %v500_v38, %v500_v38  ;;  %v555_v48 = vpack.i.b16 %v504_v39, %v504_v39  ;;  %v1343_v33 = vld [vmem:[%s1611_s4 + $0xe4] ss:$8 sps:$4 sm:$0xff]   ;;  %v1346_v35 = vld [vmem:[%s1611_s4 + $0xf4] ss:$8 sps:$4 sm:$0xff]   ;;  %v1348_v36 = vld [vmem:[%s1611_s4 + $0xf0] ss:$8 sps:$4 sm:$0xff]  }
  0x1c   : > { %v539_v50 = vrot.slane %v534_v42, %v1463_v8  ;;  %v546_v51 = vrot.slane %v541_v43, %v1463_v8  ;;  %v569_v52 = vcombine.low %v511_v40, %v518_v41  ;;  %v900_v38 = vsub.s32 2, %v1440_v4 }
  0x1d   : > { %v553_v54 = vrot.slane %v548_v47, %v1463_v8  ;;  %v560_v55 = vrot.slane %v555_v48, %v1463_v8  ;;  %v577_v56 = vcombine.low %v525_v45, %v532_v46  ;;  %840 = vmatpush1.bf16.msra.mxu1 %v1318_v61  ;;  %v1377_v41 = vmov -1e+30  }
  0x1e   : > { %v576_v57 = vrot.slane %v569_v52, %v575_v34  ;;  %v585_v58 = vcombine.low %v539_v50, %v546_v51  ;;  %841 = vmatprep.subr.bf16.mxu1 %v1319_v0  ;;  %v907_v45 = vsub.s32 3, %v1440_v4 }
  0x1f   : > { %v584_v59 = vrot.slane %v577_v56, %v575_v34  ;;  %v593_v60 = vcombine.low %v553_v54, %v560_v55  ;;  %v1378_v56 = vmov 839922192  }
  0x20   : > { %v592_v62 = vrot.slane %v585_v58, %v575_v34  ;;  %v605_v63 = vsub.bf16 %v454_v44, %v576_v57  ;;  %v917_v57 = vunpack.c.l.s4 %v1378_v56 }
  0x21   : > { %v600_v1 = vrot.slane %v593_v60, %v575_v34  ;;  %v606_v2 = vsub.bf16 %v454_v44, %v584_v59  ;;  %842 = vmatpush1.bf16.msra.mxu1 %v1321_v11 }
  0x22   : > { %v607_v3 = vsub.bf16 %v454_v44, %v592_v62  ;;  %v609_v6 = vmax.bf16 %v1376_v5, %v605_v63  ;;  %843 = vmatprep.subr.bf16.mxu1 %v1322_v13  ;;  %v918_v58 = vunpack.c.0.s8 %v917_v57 }
  0x23   : > { %v608_v7 = vsub.bf16 %v454_v44, %v600_v1  ;;  %v610_v10 = vmax.bf16 %v1376_v5, %v606_v2 }
  0x24   : > { %v611_v12 = vmax.bf16 %v1376_v5, %v607_v3  ;;  %v921_v59 = vsub.s32 %v918_v58, %v1440_v4 }
  0x25   : > { %v612_v14 = vmax.bf16 %v1376_v5, %v608_v7  ;;  %v649_v15 = vcombine.low %v609_v6, %v610_v10  ;;  %844 = vmatpush1.bf16.msra.mxu1 %v1324_v18 }
  0x26   : > { %845 = vmatprep.subr.bf16.mxu1 %v1325_v19 }
  0x27   : > { %v650_v16 = vcombine.low %v611_v12, %v612_v14  ;;  %v657_v17 = vrot.slane %v649_v15, %v575_v34 }
  0x29   : > { %v664_v20 = vrot.slane %v650_v16, %v575_v34  ;;  %846 = vmatpush1.bf16.msra.mxu1 %v1327_v22  ;;  %v1345_v34 = vld [vmem:[%s1611_s4 + $0xe0] ss:$8 sps:$4 sm:$0xff]  }
  0x2a   : > { %847 = vmatprep.subr.bf16.mxu1 %v1328_v23 }
  0x2b   : > { %v666_v21 = vcombine.high %v657_v17, %v664_v20  ;;  %v665_v37 = vcombine.low %v657_v17, %v664_v20 }
  0x2d   : > { %861 = vmatprep.mubr.bf16.mxu1 %v666_v21  ;;  %848 = vmatpush1.bf16.msra.mxu1 %v1330_v24 }
  0x2e   : > { %849 = vmatprep.subr.bf16.mxu1 %v1331_v25 }
  0x31   : > { %850 = vmatpush1.bf16.msra.mxu1 %v1333_v26 }
  0x32   : > { %851 = vmatprep.subr.bf16.mxu1 %v1334_v27 }
  0x35   : > { %852 = vmatpush1.bf16.msra.mxu1 %v1336_v28 }
  0x36   : > { %853 = vmatprep.subr.bf16.mxu1 %v1337_v29 }
  0x39   : > { %854 = vmatpush1.bf16.msra.mxu1 %v1339_v30 }
  0x3a   : > { %855 = vmatprep.subr.bf16.mxu1 %v1340_v31 }
  0x3d   : > { %856 = vmatpush1.bf16.msra.mxu1 %v1342_v32 }
  0x3e   : > { %857 = vmatprep.subr.bf16.mxu1 %v1343_v33 }
  0x41   : > { %858 = vmatpush1.bf16.msra.mxu1 %v1345_v34 }
  0x42   : > { %859 = vmatprep.subr.bf16.mxu1 %v1346_v35 }
  0x45   : > { %860 = vmatpush1.bf16.msra.mxu1 %v1348_v36 }
  0x48   : > { %862 = vmatmul.mubr.bf16.vlgmr.msra.gmra.mrb[0].mxu1 %v665_v37 }
  0xe8   : > { %v443_v39 = vpop.f32.mrb[0].mxu0 }
  0xe9   : > { %vm447_vm2 = vcmp.le.f32.partialorder %v443_v39, 1.0  ;;  %v1270_v40 = vpop.f32.mrb[1].mxu0 }
  0xea   : > { %v448_v42 = vsel %vm447_vm2, 0.0, %v1377_v41 }
  0xeb   : > { %v901_v43 = vrot.slane %v448_v42, %v900_v38  ;;  %v894_v44 = vrot.slane %v448_v42, %v1466_v9  ;;  %v908_v46 = vrot.slane %v448_v42, %v907_v45  ;;  %v887_v47 = vrot.slane %v448_v42, %v1463_v8 }
  0xed   : > { %903 = vbcast.lane.b32.xlu1 %v901_v43, 256  ;;  %896 = vbcast.lane.b32.xlu0 %v894_v44, 256 }
  0xf1   : > { %910 = vbcast.lane.b32.xlu1 %v908_v46, 256  ;;  %889 = vbcast.lane.b32.xlu0 %v887_v47, 256 }
 0x11b   : > { %v863_v48 = vpop.f32.mrb[0].mxu1 }
 0x11c   : > { %v865_v49 = vpop.f32.mrb[1].mxu1 }
 0x11d   : > { %v876_v50 = vcombine.low %v863_v48, %v865_v49  ;;  %v877_v51 = vcombine.high %v863_v48, %v865_v49  ;;  %v867_v52 = vpop.f32.mrb[2].mxu1 }
 0x11e   : > { %v869_v53 = vpop.f32.mrb[3].mxu1 }
 0x11f   : > { %v878_v54 = vcombine.low %v867_v52, %v869_v53  ;;  %v879_v55 = vcombine.high %v867_v52, %v869_v53 }
 0x15f   : > { %v904_v60 = vpop.permute.xlu1 %903  ;;  %v897_v61 = vpop.permute.xlu0 %896 }
 0x160   : > { %v936_v62 = vrot.slane %v904_v60, %v921_v59  ;;  %v929_v63 = vrot.slane %v897_v61, %v921_v59 }
 0x162   : > { %v950_v0 = vadd.f32 %v936_v62, %v878_v54  ;;  %v949_v1 = vadd.f32 %v929_v63, %v877_v51 }
 0x163   : > { %v911_v2 = vpop.permute.xlu1 %910  ;;  %v890_v3 = vpop.permute.xlu0 %889 }
 0x164   : > { %v959_v5 = vcombine.high %v950_v0, %v950_v0  ;;  %v994_v6 = vsel %vm965_vm3, %v950_v0, -inf  ;;  %v958_v7 = vcombine.high %v949_v1, %v949_v1  ;;  %v980_v10 = vsel %vm965_vm3, %v949_v1, -inf }
 0x165   : > { %v995_v11 = vrot.slane %v994_v6, 4  ;;  %v981_v12 = vrot.slane %v980_v10, 4  ;;  %v943_v13 = vrot.slane %v911_v2, %v921_v59  ;;  %v922_v14 = vrot.slane %v890_v3, %v921_v59  ;;  %v1056_v2 = vld [vmem:[%s1612_s5] sm:$0x3] }
 0x166   : > { %v1001_v4 = vsel %vm965_vm3, %v959_v5, -inf  ;;  %v987_v15 = vsel %vm965_vm3, %v958_v7, -inf }
 0x167   : > { %v996_v16 = vmax.f32 %v994_v6, %v995_v11  ;;  %v1002_v17 = vrot.slane %v1001_v4, 4  ;;  %v982_v18 = vmax.f32 %v980_v10, %v981_v12  ;;  %v988_v19 = vrot.slane %v987_v15, 4 }
 0x168   : > { %v951_v20 = vadd.f32 %v943_v13, %v879_v55  ;;  %v948_v21 = vadd.f32 %v922_v14, %v876_v50  ;;  %v1061_v12 = vrot.slane %v1056_v2, %v1463_v8 }
 0x169   : > { %v997_v22 = vrot.slane %v996_v16, 2  ;;  %v1003_v23 = vmax.f32 %v1001_v4, %v1002_v17  ;;  %v983_v24 = vrot.slane %v982_v18, 2  ;;  %v989_v25 = vmax.f32 %v987_v15, %v988_v19 }
 0x16a   : > { %v960_v26 = vcombine.high %v951_v20, %v951_v20  ;;  %v1008_v27 = vsel %vm965_vm3, %v951_v20, -inf  ;;  %v957_v28 = vcombine.high %v948_v21, %v948_v21  ;;  %v966_v29 = vsel %vm965_vm3, %v948_v21, -inf }
 0x16b   : > { %v1004_v30 = vrot.slane %v1003_v23, 2  ;;  %v984_v31 = vmax.f32 %v982_v18, %v983_v24  ;;  %v990_v32 = vrot.slane %v989_v25, 2  ;;  %v1009_v33 = vrot.slane %v1008_v27, 4 }
 0x16c   : > { %v1015_v34 = vsel %vm965_vm3, %v960_v26, -inf  ;;  %v967_v35 = vrot.slane %v966_v29, 4  ;;  %v973_v36 = vsel %vm965_vm3, %v957_v28, -inf  ;;  %v998_v37 = vmax.f32 %v996_v16, %v997_v22 }
 0x16d   : > { %v1005_v38 = vmax.f32 %v1003_v23, %v1004_v30  ;;  %v991_v39 = vmax.f32 %v989_v25, %v990_v32  ;;  %v1010_v40 = vmax.f32 %v1008_v27, %v1009_v33  ;;  %v1016_v41 = vrot.slane %v1015_v34, 4 }
 0x16e   : > { %v968_v42 = vmax.f32 %v966_v29, %v967_v35  ;;  %v974_v43 = vrot.slane %v973_v36, 4  ;;  %v985_v45 = vrot.slane %v984_v31, 1  ;;  %v999_v51 = vrot.slane %v998_v37, 1 }
 0x16f   : > { %v1006_v44 = vrot.slane %v1005_v38, 1  ;;  %v992_v46 = vrot.slane %v991_v39, 1  ;;  %v1011_v47 = vrot.slane %v1010_v40, 2  ;;  %v1017_v48 = vmax.f32 %v1015_v34, %v1016_v41 }
 0x170   : > { %v969_v49 = vrot.slane %v968_v42, 2  ;;  %v975_v50 = vmax.f32 %v973_v36, %v974_v43  ;;  %v986_v58 = vmax.f32 %v984_v31, %v985_v45  ;;  %v1000_v63 = vmax.f32 %v998_v37, %v999_v51 }
 0x171   : > { %v993_v52 = vmax.f32 %v991_v39, %v992_v46  ;;  %v1012_v53 = vmax.f32 %v1010_v40, %v1011_v47  ;;  %v1018_v54 = vrot.slane %v1017_v48, 2  ;;  %v1007_v57 = vmax.f32 %v1005_v38, %v1006_v44 }
 0x172   : > { %v970_v55 = vmax.f32 %v968_v42, %v969_v49  ;;  %v976_v56 = vrot.slane %v975_v50, 2  ;;  %v1065_v4 = vrot.slane %v1056_v2, %v1466_v9 }
 0x173   : > { %v1013_v59 = vrot.slane %v1012_v53, 1  ;;  %v1019_v60 = vmax.f32 %v1017_v48, %v1018_v54  ;;  %v1031_v0 = vcombine.low %v986_v58, %v993_v52  ;;  %v1032_v5 = vcombine.low %v1000_v63, %v1007_v57 }
 0x174   : > { %v971_v61 = vrot.slane %v970_v55, 1  ;;  %v977_v62 = vmax.f32 %v975_v50, %v976_v56  ;;  %v1066_v20 = vcombine.low %v1061_v12, %v1065_v4 }
 0x175   : > { %v1020_v1 = vrot.slane %v1019_v60, 1  ;;  %v1014_v6 = vmax.f32 %v1012_v53, %v1013_v59  ;;  %v1034_v13 = vrot.slane %v1031_v0, 7  ;;  %v1039_v16 = vrot.slane %v1032_v5, 6 }
 0x176   : > { %v978_v3 = vrot.slane %v977_v62, 1  ;;  %v972_v10 = vmax.f32 %v970_v55, %v971_v61 }
 0x177   : > { %v1021_v7 = vmax.f32 %v1019_v60, %v1020_v1 }
 0x178   : > { %v979_v11 = vmax.f32 %v977_v62, %v978_v3 }
 0x179   : > { %v1033_v14 = vcombine.low %v1014_v6, %v1021_v7 }
 0x17a   : > { %v1030_v15 = vcombine.low %v972_v10, %v979_v11 }
 0x17b   : > { %v1044_v19 = vrot.slane %v1033_v14, 5 }
 0x17c   : > { %v1036_v17 = vsel %vm1035_vm4, %v1034_v13, %v1030_v15 }
 0x17d   : > { %v1038_v18 = vsel %vm1037_vm5, %v1034_v13, %v1036_v17 }
 0x17e   : > { %v1041_v21 = vsel %vm1040_vm6, %v1039_v16, %v1038_v18 }
 0x17f   : > { %v1043_v22 = vsel %vm1042_vm7, %v1039_v16, %v1041_v21 }
 0x180   : > { %v1046_v23 = vsel %vm1045_vm8, %v1044_v19, %v1043_v22 }
 0x181   : > { %v1048_v8 = vsel %vm1047_vm9, %v1044_v19, %v1046_v23 }
 0x182   : > { %v1068_v24 = vadd.f32 %v1066_v20, %v1048_v8 }
 0x184   : > { %v1069_v9 = vmax.f32 %v1068_v24, 0.0 }
 0x186   : > { %1070 = vst [vmem:[%s359_s27] sm:$0xff] %v1069_v9 }
 0x187 PF: > { %s16_s23 = sadd.s32 1, %s1371_s23   ;;  %s1614_s21 = smov %s1367_s22 }
 0x188   : > { %p13_p5 = scmp.ge.s32.totalorder %s16_s23, 4   ;;  %s1615_s22 = smov %s1617_s24 }
 0x18a   :  { %15 = sbr.rel (!%p13_p5) target bundleno = 2 (0x2), region = 93 }

// kernel: forward.7
= control target key start
LH: loop header
LB: loop body
LE: loop exit
PB: predicated region body
PF: predicated region fallthrough
CT: control target
= control target key end

     0   :  { %vm35_vm0 = vcmask 1043456   ;;  %vm144_vm1 = vcmask 1041409   ;;  %s1302_s0 = inlined_call_operand.vmem [shape: f32[2,4,256], index: 0, kind: input, shape index: {}]   ;;  %s1303_s1 = inlined_call_operand.vmem [shape: f32[256,256], index: 1, kind: input, shape index: {}]   ;;  %s1304_s2 = inlined_call_operand.vmem [shape: f32[1,256], index: 2, kind: input, shape index: {}]   ;;  %s1305_s3 = inlined_call_operand.vmem [shape: f32[256,256], index: 3, kind: input, shape index: {}]   ;;  %s1306_s4 = inlined_call_operand.vmem [shape: f32[1,256], index: 4, kind: input, shape index: {}]   ;;  %s1307_s5 = inlined_call_operand.vmem [shape: f32[256,10], index: 5, kind: input, shape index: {}]   ;;  %s1308_s6 = inlined_call_operand.vmem [shape: f32[1,10], index: 6, kind: input, shape index: {}]   ;;  %s1309_s7 = inlined_call_operand.hbm [shape: f32[2,10], index: 7, kind: output, shape index: {}]  }
   0x1   :  { %v65_v0 = vld [vmem:[%s1303_s1 + $0x8] sm:$0xff]  ;;  %v67_v1 = vld [vmem:[%s1303_s1 + $0x18] sm:$0xff]  ;;  %v64_v2 = vld [vmem:[%s1303_s1] sm:$0xff] }
   0x2   :  { %v544_v3 = vpack.c.bf16 %v67_v1, %v65_v0  ;;  %v66_v4 = vld [vmem:[%s1303_s1 + $0x10] sm:$0xff]  ;;  %v69_v5 = vld [vmem:[%s1303_s1 + $0x28] sm:$0xff]  ;;  %v71_v6 = vld [vmem:[%s1303_s1 + $0x38] sm:$0xff] }
   0x3   :  { %v546_v7 = vpack.c.bf16 %v66_v4, %v64_v2  ;;  %v548_v8 = vpack.c.bf16 %v71_v6, %v69_v5  ;;  %v68_v9 = vld [vmem:[%s1303_s1 + $0x20] sm:$0xff]  ;;  %v70_v10 = vld [vmem:[%s1303_s1 + $0x30] sm:$0xff]  ;;  %v73_v11 = vld [vmem:[%s1303_s1 + $0x48] sm:$0xff] }
   0x4   :  { %545 = vmatprep.subr.bf16.mxu0 %v544_v3  ;;  %v75_v12 = vld [vmem:[%s1303_s1 + $0x58] sm:$0xff]  ;;  %v550_v13 = vpack.c.bf16 %v70_v10, %v68_v9  ;;  %v72_v15 = vld [vmem:[%s1303_s1 + $0x40] sm:$0xff]  ;;  %v74_v16 = vld [vmem:[%s1303_s1 + $0x50] sm:$0xff] }
   0x5   :  { %547 = vmatpush1.bf16.msra.mxu0 %v546_v7  ;;  %v552_v14 = vpack.c.bf16 %v75_v12, %v73_v11  ;;  %v77_v17 = vld [vmem:[%s1303_s1 + $0x68] sm:$0xff]  ;;  %v79_v18 = vld [vmem:[%s1303_s1 + $0x78] sm:$0xff]  ;;  %v554_v19 = vpack.c.bf16 %v74_v16, %v72_v15  ;;  %v76_v21 = vld [vmem:[%s1303_s1 + $0x60] sm:$0xff] }
   0x6   :  { %549 = vmatprep.subr.bf16.mxu0 %v548_v8  ;;  %v556_v20 = vpack.c.bf16 %v79_v18, %v77_v17  ;;  %v78_v22 = vld [vmem:[%s1303_s1 + $0x70] sm:$0xff]  ;;  %v81_v23 = vld [vmem:[%s1303_s1 + $0x88] sm:$0xff]  ;;  %v83_v24 = vld [vmem:[%s1303_s1 + $0x98] sm:$0xff] }
   0x7   :  { %v558_v25 = vpack.c.bf16 %v78_v22, %v76_v21  ;;  %v560_v26 = vpack.c.bf16 %v83_v24, %v81_v23  ;;  %v80_v27 = vld [vmem:[%s1303_s1 + $0x80] sm:$0xff]  ;;  %v82_v28 = vld [vmem:[%s1303_s1 + $0x90] sm:$0xff]  ;;  %v85_v29 = vld [vmem:[%s1303_s1 + $0xa8] sm:$0xff] }
   0x8   :  { %v87_v30 = vld [vmem:[%s1303_s1 + $0xb8] sm:$0xff]  ;;  %v562_v31 = vpack.c.bf16 %v82_v28, %v80_v27  ;;  %v84_v33 = vld [vmem:[%s1303_s1 + $0xa0] sm:$0xff]  ;;  %v86_v34 = vld [vmem:[%s1303_s1 + $0xb0] sm:$0xff] }
   0x9   :  { %551 = vmatpush1.bf16.msra.mxu0 %v550_v13  ;;  %v564_v32 = vpack.c.bf16 %v87_v30, %v85_v29  ;;  %v89_v35 = vld [vmem:[%s1303_s1 + $0xc8] sm:$0xff]  ;;  %v91_v36 = vld [vmem:[%s1303_s1 + $0xd8] sm:$0xff]  ;;  %v566_v37 = vpack.c.bf16 %v86_v34, %v84_v33  ;;  %v88_v38 = vld [vmem:[%s1303_s1 + $0xc0] sm:$0xff] }
   0xa   :  { %553 = vmatprep.subr.bf16.mxu0 %v552_v14  ;;  %v90_v39 = vld [vmem:[%s1303_s1 + $0xd0] sm:$0xff]  ;;  %v93_v40 = vld [vmem:[%s1303_s1 + $0xe8] sm:$0xff]  ;;  %v568_v41 = vpack.c.bf16 %v91_v36, %v89_v35  ;;  %v95_v42 = vld [vmem:[%s1303_s1 + $0xf8] sm:$0xff] }
   0xb   :  { %v869_v43 = vld [vmem:[%s1302_s0] sm:$0xff]  ;;  %v874_v44 = vld [vmem:[%s1302_s0 + $0x8] sm:$0xff]  ;;  %v225_v48 = vld [vmem:[%s1305_s3 + $0x18] sm:$0xff]  ;;  %v570_v54 = vpack.c.bf16 %v90_v39, %v88_v38  ;;  %v572_v61 = vpack.c.bf16 %v95_v42, %v93_v40 }
   0xc   :  { %v31_v45 = vcombine.high %v869_v43, %v869_v43  ;;  %v32_v46 = vcombine.high %v874_v44, %v874_v44  ;;  %v223_v47 = vld [vmem:[%s1305_s3 + $0x8] sm:$0xff]  ;;  %v222_v49 = vld [vmem:[%s1305_s3] sm:$0xff]  ;;  %v224_v51 = vld [vmem:[%s1305_s3 + $0x10] sm:$0xff] }
   0xd   :  { %555 = vmatpush1.bf16.msra.mxu0 %v554_v19  ;;  %v608_v50 = vpack.c.bf16 %v225_v48, %v223_v47  ;;  %v227_v52 = vld [vmem:[%s1305_s3 + $0x28] sm:$0xff]  ;;  %v229_v53 = vld [vmem:[%s1305_s3 + $0x38] sm:$0xff]  ;;  %v610_v57 = vpack.c.bf16 %v224_v51, %v222_v49  ;;  %v226_v58 = vld [vmem:[%s1305_s3 + $0x20] sm:$0xff] }
   0xe   :  { %557 = vmatprep.subr.bf16.mxu0 %v556_v20  ;;  %v43_v55 = vsel %vm35_vm0, %v31_v45, -inf  ;;  %v57_v56 = vsel %vm35_vm0, %v32_v46, -inf  ;;  %v228_v59 = vld [vmem:[%s1305_s3 + $0x30] sm:$0xff]  ;;  %v231_v60 = vld [vmem:[%s1305_s3 + $0x48] sm:$0xff]  ;;  %v92_v62 = vld [vmem:[%s1303_s1 + $0xe0] sm:$0xff]  ;;  %v612_v2 = vpack.c.bf16 %v229_v53, %v227_v52  ;;  %v36_v53 = vsel %vm35_vm0, %v869_v43, -inf }
   0xf   :  { %v94_v63 = vld [vmem:[%s1303_s1 + $0xf0] sm:$0xff]  ;;  %v44_v0 = vrot.slane %v43_v55, 4  ;;  %v58_v1 = vrot.slane %v57_v56, 4  ;;  %609 = vmatprep.subr.bf16.mxu1 %v608_v50  ;;  %v233_v3 = vld [vmem:[%s1305_s3 + $0x58] sm:$0xff]  ;;  %v97_v4 = vld [vmem:[%s1303_s1 + $0x108] sm:$0xff]  ;;  %v614_v6 = vpack.c.bf16 %v228_v59, %v226_v58 }
  0x10   :  { %v99_v5 = vld [vmem:[%s1303_s1 + $0x118] sm:$0xff]  ;;  %611 = vmatpush1.bf16.msra.mxu1 %v610_v57  ;;  %v616_v9 = vpack.c.bf16 %v233_v3, %v231_v60  ;;  %v230_v10 = vld [vmem:[%s1305_s3 + $0x40] sm:$0xff]  ;;  %v232_v11 = vld [vmem:[%s1305_s3 + $0x50] sm:$0xff]  ;;  %v574_v12 = vpack.c.bf16 %v94_v63, %v92_v62  ;;  %v37_v60 = vrot.slane %v36_v53, 4 }
  0x11   :  { %559 = vmatpush1.bf16.msra.mxu0 %v558_v25  ;;  %v45_v7 = vmax.f32 %v43_v55, %v44_v0  ;;  %v59_v8 = vmax.f32 %v57_v56, %v58_v1  ;;  %613 = vmatprep.subr.bf16.mxu1 %v612_v2  ;;  %v235_v13 = vld [vmem:[%s1305_s3 + $0x68] sm:$0xff]  ;;  %v237_v14 = vld [vmem:[%s1305_s3 + $0x78] sm:$0xff]  ;;  %v576_v15 = vpack.c.bf16 %v99_v5, %v97_v4  ;;  %v96_v16 = vld [vmem:[%s1303_s1 + $0x100] sm:$0xff] }
  0x12   :  { %561 = vmatprep.subr.bf16.mxu0 %v560_v26  ;;  %v98_v17 = vld [vmem:[%s1303_s1 + $0x110] sm:$0xff]  ;;  %v101_v20 = vld [vmem:[%s1303_s1 + $0x128] sm:$0xff]  ;;  %v103_v21 = vld [vmem:[%s1303_s1 + $0x138] sm:$0xff]  ;;  %v618_v22 = vpack.c.bf16 %v232_v11, %v230_v10  ;;  %v620_v25 = vpack.c.bf16 %v237_v14, %v235_v13 }
  0x13   :  { %v46_v18 = vrot.slane %v45_v7, 2  ;;  %v60_v19 = vrot.slane %v59_v8, 2  ;;  %v234_v26 = vld [vmem:[%s1305_s3 + $0x60] sm:$0xff]  ;;  %v236_v27 = vld [vmem:[%s1305_s3 + $0x70] sm:$0xff]  ;;  %v578_v28 = vpack.c.bf16 %v98_v17, %v96_v16  ;;  %v239_v29 = vld [vmem:[%s1305_s3 + $0x88] sm:$0xff] }
  0x14   :  { %615 = vmatpush1.bf16.msra.mxu1 %v614_v6  ;;  %v241_v30 = vld [vmem:[%s1305_s3 + $0x98] sm:$0xff]  ;;  %v102_v33 = vld [vmem:[%s1303_s1 + $0x130] sm:$0xff]  ;;  %v105_v36 = vld [vmem:[%s1303_s1 + $0x148] sm:$0xff]  ;;  %v622_v38 = vpack.c.bf16 %v236_v27, %v234_v26 }
  0x15   :  { %563 = vmatpush1.bf16.msra.mxu0 %v562_v31  ;;  %v47_v23 = vmax.f32 %v45_v7, %v46_v18  ;;  %v61_v24 = vmax.f32 %v59_v8, %v60_v19  ;;  %617 = vmatprep.subr.bf16.mxu1 %v616_v9  ;;  %v580_v31 = vpack.c.bf16 %v103_v21, %v101_v20  ;;  %v238_v42 = vld [vmem:[%s1305_s3 + $0x80] sm:$0xff]  ;;  %v240_v45 = vld [vmem:[%s1305_s3 + $0x90] sm:$0xff]  ;;  %v243_v47 = vld [vmem:[%s1305_s3 + $0xa8] sm:$0xff] }
  0x16   :  { %565 = vmatprep.subr.bf16.mxu0 %v564_v32  ;;  %v100_v32 = vld [vmem:[%s1303_s1 + $0x120] sm:$0xff]  ;;  %v245_v48 = vld [vmem:[%s1305_s3 + $0xb8] sm:$0xff]  ;;  %v106_v51 = vld [vmem:[%s1303_s1 + $0x150] sm:$0xff]  ;;  %v626_v57 = vpack.c.bf16 %v240_v45, %v238_v42 }
  0x17   :  { %v48_v34 = vrot.slane %v47_v23, 1  ;;  %v62_v35 = vrot.slane %v61_v24, 1  ;;  %v582_v46 = vpack.c.bf16 %v102_v33, %v100_v32  ;;  %v104_v50 = vld [vmem:[%s1303_s1 + $0x140] sm:$0xff]  ;;  %v109_v55 = vld [vmem:[%s1303_s1 + $0x168] sm:$0xff]  ;;  %v111_v56 = vld [vmem:[%s1303_s1 + $0x178] sm:$0xff]  ;;  %v628_v58 = vpack.c.bf16 %v245_v48, %v243_v47 }
  0x18   :  { %619 = vmatpush1.bf16.msra.mxu1 %v618_v22  ;;  %v242_v43 = vld [vmem:[%s1305_s3 + $0xa0] sm:$0xff]  ;;  %v586_v59 = vpack.c.bf16 %v106_v51, %v104_v50  ;;  %v247_v62 = vld [vmem:[%s1305_s3 + $0xc8] sm:$0xff]  ;;  %v249_v63 = vld [vmem:[%s1305_s3 + $0xd8] sm:$0xff]  ;;  %v588_v0 = vpack.c.bf16 %v111_v56, %v109_v55 }
  0x19   :  { %567 = vmatpush1.bf16.msra.mxu0 %v566_v37  ;;  %v107_v37 = vld [vmem:[%s1303_s1 + $0x158] sm:$0xff]  ;;  %v49_v39 = vmax.f32 %v47_v23, %v48_v34  ;;  %v63_v40 = vmax.f32 %v61_v24, %v62_v35  ;;  %621 = vmatprep.subr.bf16.mxu1 %v620_v25  ;;  %v108_v1 = vld [vmem:[%s1303_s1 + $0x160] sm:$0xff]  ;;  %v110_v2 = vld [vmem:[%s1303_s1 + $0x170] sm:$0xff] }
  0x1a   :  { %569 = vmatprep.subr.bf16.mxu0 %v568_v41  ;;  %v624_v41 = vpack.c.bf16 %v241_v30, %v239_v29  ;;  %v584_v49 = vpack.c.bf16 %v107_v37, %v105_v36 }
  0x1b   :  { %v146_v52 = vsel %vm144_vm1, %v63_v40, %v49_v39 }
  0x1c   :  { %213 = vmatprep.mubr.f32.mxu0 %v146_v52  ;;  %623 = vmatpush1.bf16.msra.mxu1 %v622_v38 }
  0x1d   :  { %571 = vmatpush1.bf16.msra.mxu0 %v570_v54  ;;  %v50_v54 = vsel %vm35_vm0, %v874_v44, -inf  ;;  %625 = vmatprep.subr.bf16.mxu1 %v624_v41  ;;  %v244_v44 = vld [vmem:[%s1305_s3 + $0xb0] sm:$0xff] }
  0x1e   :  { %573 = vmatprep.subr.bf16.mxu0 %v572_v61  ;;  %v51_v61 = vrot.slane %v50_v54, 4 }
  0x21   :  { %575 = vmatpush1.bf16.msra.mxu0 %v574_v12 }
  0x22   :  { %577 = vmatprep.subr.bf16.mxu0 %v576_v15 }
  0x25   :  { %579 = vmatpush1.bf16.msra.mxu0 %v578_v28 }
  0x26   :  { %581 = vmatprep.subr.bf16.mxu0 %v580_v31 }
  0x29   :  { %583 = vmatpush1.bf16.msra.mxu0 %v582_v46 }
  0x2a   :  { %585 = vmatprep.subr.bf16.mxu0 %v584_v49 }
  0x2b   :  { %12 = vsyncpa [#allocation3], 0  ;;  %v113_v3 = vld [vmem:[%s1303_s1 + $0x188] sm:$0xff]  ;;  %v115_v4 = vld [vmem:[%s1303_s1 + $0x198] sm:$0xff]  ;;  %627 = vmatpush1.bf16.msra.mxu1 %v626_v57  ;;  %v630_v5 = vpack.c.bf16 %v244_v44, %v242_v43  ;;  %v632_v6 = vpack.c.bf16 %v249_v63, %v247_v62  ;;  %v590_v9 = vpack.c.bf16 %v110_v2, %v108_v1  ;;  %v38_v10 = vmax.f32 %v36_v53, %v37_v60 }
  0x2c   :  { %629 = vmatprep.subr.bf16.mxu1 %v628_v58  ;;  %v246_v7 = vld [vmem:[%s1305_s3 + $0xc0] sm:$0xff]  ;;  %v248_v8 = vld [vmem:[%s1305_s3 + $0xd0] sm:$0xff]  ;;  %v52_v11 = vmax.f32 %v50_v54, %v51_v61  ;;  %v251_v12 = vld [vmem:[%s1305_s3 + $0xe8] sm:$0xff]  ;;  %v592_v14 = vpack.c.bf16 %v115_v4, %v113_v3  ;;  %vm480_vm2 = vcmask 74752  }
  0x2d   :  { %587 = vmatpush1.bf16.msra.mxu0 %v586_v59  ;;  %v253_v13 = vld [vmem:[%s1305_s3 + $0xf8] sm:$0xff]  ;;  %v112_v15 = vld [vmem:[%s1303_s1 + $0x180] sm:$0xff]  ;;  %v114_v16 = vld [vmem:[%s1303_s1 + $0x190] sm:$0xff]  ;;  %v634_v19 = vpack.c.bf16 %v248_v8, %v246_v7  ;;  %v39_v24 = vrot.slane %v38_v10, 2 }
  0x2e   :  { %589 = vmatprep.subr.bf16.mxu0 %v588_v0  ;;  %v117_v17 = vld [vmem:[%s1303_s1 + $0x1a8] sm:$0xff]  ;;  %v119_v18 = vld [vmem:[%s1303_s1 + $0x1b8] sm:$0xff]  ;;  %v636_v20 = vpack.c.bf16 %v253_v13, %v251_v12  ;;  %v250_v21 = vld [vmem:[%s1305_s3 + $0xe0] sm:$0xff]  ;;  %v594_v23 = vpack.c.bf16 %v114_v16, %v112_v15  ;;  %v53_v25 = vrot.slane %v52_v11, 2 }
  0x2f   :  { %631 = vmatpush1.bf16.msra.mxu1 %v630_v5  ;;  %v252_v22 = vld [vmem:[%s1305_s3 + $0xf0] sm:$0xff]  ;;  %v255_v26 = vld [vmem:[%s1305_s3 + $0x108] sm:$0xff]  ;;  %v257_v27 = vld [vmem:[%s1305_s3 + $0x118] sm:$0xff]  ;;  %v596_v28 = vpack.c.bf16 %v119_v18, %v117_v17  ;;  %v40_v38 = vmax.f32 %v38_v10, %v39_v24 }
  0x30   :  { %633 = vmatprep.subr.bf16.mxu1 %v632_v6  ;;  %v116_v29 = vld [vmem:[%s1303_s1 + $0x1a0] sm:$0xff]  ;;  %v118_v30 = vld [vmem:[%s1303_s1 + $0x1b0] sm:$0xff]  ;;  %v121_v31 = vld [vmem:[%s1303_s1 + $0x1c8] sm:$0xff]  ;;  %v638_v33 = vpack.c.bf16 %v252_v22, %v250_v21  ;;  %v640_v34 = vpack.c.bf16 %v257_v27, %v255_v26  ;;  %v54_v39 = vmax.f32 %v52_v11, %v53_v25 }
  0x31   :  { %591 = vmatpush1.bf16.msra.mxu0 %v590_v9  ;;  %v123_v32 = vld [vmem:[%s1303_s1 + $0x1d8] sm:$0xff]  ;;  %v254_v35 = vld [vmem:[%s1305_s3 + $0x100] sm:$0xff]  ;;  %v256_v36 = vld [vmem:[%s1305_s3 + $0x110] sm:$0xff]  ;;  %v598_v37 = vpack.c.bf16 %v118_v30, %v116_v29  ;;  %v41_v54 = vrot.slane %v40_v38, 1 }
  0x32   :  { %593 = vmatprep.subr.bf16.mxu0 %v592_v14  ;;  %v259_v40 = vld [vmem:[%s1305_s3 + $0x128] sm:$0xff]  ;;  %v261_v41 = vld [vmem:[%s1305_s3 + $0x138] sm:$0xff]  ;;  %v600_v42 = vpack.c.bf16 %v123_v32, %v121_v31  ;;  %v120_v45 = vld [vmem:[%s1303_s1 + $0x1c0] sm:$0xff]  ;;  %v642_v49 = vpack.c.bf16 %v256_v36, %v254_v35  ;;  %v55_v55 = vrot.slane %v54_v39, 1 }
  0x33   :  { %635 = vmatpush1.bf16.msra.mxu1 %v634_v19  ;;  %v122_v46 = vld [vmem:[%s1303_s1 + $0x1d0] sm:$0xff]  ;;  %v125_v47 = vld [vmem:[%s1303_s1 + $0x1e8] sm:$0xff]  ;;  %v127_v48 = vld [vmem:[%s1303_s1 + $0x1f8] sm:$0xff]  ;;  %v644_v50 = vpack.c.bf16 %v261_v41, %v259_v40  ;;  %v42_v0 = vmax.f32 %v40_v38, %v41_v54 }
  0x34   :  { %637 = vmatprep.subr.bf16.mxu1 %v636_v20  ;;  %v258_v51 = vld [vmem:[%s1305_s3 + $0x120] sm:$0xff]  ;;  %v260_v52 = vld [vmem:[%s1305_s3 + $0x130] sm:$0xff]  ;;  %v602_v53 = vpack.c.bf16 %v122_v46, %v120_v45  ;;  %v263_v56 = vld [vmem:[%s1305_s3 + $0x148] sm:$0xff]  ;;  %v604_v58 = vpack.c.bf16 %v127_v48, %v125_v47  ;;  %v56_v1 = vmax.f32 %v54_v39, %v55_v55 }
  0x35   :  { %595 = vmatpush1.bf16.msra.mxu0 %v594_v23  ;;  %v265_v57 = vld [vmem:[%s1305_s3 + $0x158] sm:$0xff]  ;;  %v124_v43 = vld [vmem:[%s1303_s1 + $0x1e0] sm:$0xff]  ;;  %v126_v44 = vld [vmem:[%s1303_s1 + $0x1f0] sm:$0xff]  ;;  %v646_v59 = vpack.c.bf16 %v260_v52, %v258_v51 }
  0x36   :  { %597 = vmatprep.subr.bf16.mxu0 %v596_v28  ;;  %v648_v60 = vpack.c.bf16 %v265_v57, %v263_v56  ;;  %v262_v61 = vld [vmem:[%s1305_s3 + $0x140] sm:$0xff]  ;;  %v264_v62 = vld [vmem:[%s1305_s3 + $0x150] sm:$0xff]  ;;  %v606_v63 = vpack.c.bf16 %v126_v44, %v124_v43  ;;  %v267_v2 = vld [vmem:[%s1305_s3 + $0x168] sm:$0xff]  ;;  %v145_v8 = vsel %vm144_vm1, %v56_v1, %v42_v0 }
  0x37   :  { %639 = vmatpush1.bf16.msra.mxu1 %v638_v33  ;;  %v269_v3 = vld [vmem:[%s1305_s3 + $0x178] sm:$0xff]  ;;  %v650_v4 = vpack.c.bf16 %v264_v62, %v262_v61  ;;  %v266_v6 = vld [vmem:[%s1305_s3 + $0x160] sm:$0xff]  ;;  %v268_v7 = vld [vmem:[%s1305_s3 + $0x170] sm:$0xff] }
  0x38   :  { %641 = vmatprep.subr.bf16.mxu1 %v640_v34  ;;  %v652_v5 = vpack.c.bf16 %v269_v3, %v267_v2  ;;  %v271_v9 = vld [vmem:[%s1305_s3 + $0x188] sm:$0xff]  ;;  %v273_v10 = vld [vmem:[%s1305_s3 + $0x198] sm:$0xff]  ;;  %v654_v11 = vpack.c.bf16 %v268_v7, %v266_v6  ;;  %v270_v13 = vld [vmem:[%s1305_s3 + $0x180] sm:$0xff] }
  0x39   :  { %599 = vmatpush1.bf16.msra.mxu0 %v598_v37  ;;  %v656_v12 = vpack.c.bf16 %v273_v10, %v271_v9  ;;  %v272_v14 = vld [vmem:[%s1305_s3 + $0x190] sm:$0xff]  ;;  %v275_v15 = vld [vmem:[%s1305_s3 + $0x1a8] sm:$0xff]  ;;  %v277_v16 = vld [vmem:[%s1305_s3 + $0x1b8] sm:$0xff]  ;;  %v130_v9 = vlaneseq }
  0x3a   :  { %601 = vmatprep.subr.bf16.mxu0 %v600_v42  ;;  %v658_v17 = vpack.c.bf16 %v272_v14, %v270_v13  ;;  %v660_v18 = vpack.c.bf16 %v277_v16, %v275_v15  ;;  %v274_v19 = vld [vmem:[%s1305_s3 + $0x1a0] sm:$0xff]  ;;  %v276_v20 = vld [vmem:[%s1305_s3 + $0x1b0] sm:$0xff]  ;;  %v279_v21 = vld [vmem:[%s1305_s3 + $0x1c8] sm:$0xff] }
  0x3b   :  { %643 = vmatpush1.bf16.msra.mxu1 %v642_v49  ;;  %v281_v22 = vld [vmem:[%s1305_s3 + $0x1d8] sm:$0xff]  ;;  %v662_v23 = vpack.c.bf16 %v276_v20, %v274_v19  ;;  %v278_v25 = vld [vmem:[%s1305_s3 + $0x1c0] sm:$0xff]  ;;  %v280_v26 = vld [vmem:[%s1305_s3 + $0x1d0] sm:$0xff]  ;;  %v131_v10 = vshrl.u32 %v130_v9, 7 }
  0x3c   :  { %645 = vmatprep.subr.bf16.mxu1 %v644_v50  ;;  %v664_v24 = vpack.c.bf16 %v281_v22, %v279_v21  ;;  %v666_v27 = vpack.c.bf16 %v280_v26, %v278_v25  ;;  %v283_v28 = vld [vmem:[%s1305_s3 + $0x1e8] sm:$0xff]  ;;  %v285_v29 = vld [vmem:[%s1305_s3 + $0x1f8] sm:$0xff]  ;;  %v282_v31 = vld [vmem:[%s1305_s3 + $0x1e0] sm:$0xff] }
  0x3d   :  { %603 = vmatpush1.bf16.msra.mxu0 %v602_v53  ;;  %v668_v30 = vpack.c.bf16 %v285_v29, %v283_v28  ;;  %v284_v32 = vld [vmem:[%s1305_s3 + $0x1f0] sm:$0xff]  ;;  %v387_v34 = vld [vmem:[%s1307_s5 + $0x80] sm:$0xff]  ;;  %v388_v35 = vld [vmem:[%s1307_s5 + $0x88] sm:$0xff]  ;;  %v136_v13 = vsub.s32 1, %v131_v10 }
  0x3e   :  { %605 = vmatprep.subr.bf16.mxu0 %v604_v58  ;;  %v670_v33 = vpack.c.bf16 %v284_v32, %v282_v31  ;;  %v371_v36 = vld [vmem:[%s1307_s5] sm:$0xff]  ;;  %v672_v37 = vpack.c.bf16 %v388_v35, %v387_v34  ;;  %v372_v38 = vld [vmem:[%s1307_s5 + $0x8] sm:$0xff]  ;;  %v389_v39 = vld [vmem:[%s1307_s5 + $0x90] sm:$0xff] }
  0x3f   :  { %647 = vmatpush1.bf16.msra.mxu1 %v646_v59  ;;  %v390_v40 = vld [vmem:[%s1307_s5 + $0x98] sm:$0xff]  ;;  %v674_v41 = vpack.c.bf16 %v372_v38, %v371_v36  ;;  %v373_v45 = vld [vmem:[%s1307_s5 + $0x10] sm:$0xff]  ;;  %v391_v47 = vld [vmem:[%s1307_s5 + $0xa0] sm:$0xff] }
  0x40   :  { %649 = vmatprep.subr.bf16.mxu1 %v648_v60  ;;  %v676_v42 = vpack.c.bf16 %v390_v40, %v389_v39  ;;  %v374_v46 = vld [vmem:[%s1307_s5 + $0x18] sm:$0xff]  ;;  %v392_v48 = vld [vmem:[%s1307_s5 + $0xa8] sm:$0xff]  ;;  %v375_v51 = vld [vmem:[%s1307_s5 + $0x20] sm:$0xff] }
  0x41   :  { %607 = vmatpush1.bf16.msra.mxu0 %v606_v63  ;;  %v678_v49 = vpack.c.bf16 %v374_v46, %v373_v45  ;;  %v680_v50 = vpack.c.bf16 %v392_v48, %v391_v47  ;;  %v376_v52 = vld [vmem:[%s1307_s5 + $0x28] sm:$0xff]  ;;  %v393_v53 = vld [vmem:[%s1307_s5 + $0xb0] sm:$0xff]  ;;  %v394_v54 = vld [vmem:[%s1307_s5 + $0xb8] sm:$0xff] }
  0x42   :  { %673 = vmatprep.subr.bf16.mxu0 %v672_v37  ;;  %v682_v55 = vpack.c.bf16 %v376_v52, %v375_v51  ;;  %v684_v56 = vpack.c.bf16 %v394_v54, %v393_v53  ;;  %v377_v57 = vld [vmem:[%s1307_s5 + $0x30] sm:$0xff]  ;;  %v378_v58 = vld [vmem:[%s1307_s5 + $0x38] sm:$0xff]  ;;  %v395_v43 = vld [vmem:[%s1307_s5 + $0xc0] sm:$0xff] }
  0x43   :  { %651 = vmatpush1.bf16.msra.mxu1 %v650_v4  ;;  %v396_v44 = vld [vmem:[%s1307_s5 + $0xc8] sm:$0xff]  ;;  %v686_v59 = vpack.c.bf16 %v378_v58, %v377_v57  ;;  %v379_v61 = vld [vmem:[%s1307_s5 + $0x40] sm:$0xff]  ;;  %v397_v63 = vld [vmem:[%s1307_s5 + $0xd0] sm:$0xff] }
  0x44   :  { %214 = vmatmul.mubr.f32.vlgmr.msra.gmra.mrb[0].mxu0 %v145_v8  ;;  %653 = vmatprep.subr.bf16.mxu1 %v652_v5  ;;  %v688_v60 = vpack.c.bf16 %v396_v44, %v395_v43  ;;  %v380_v62 = vld [vmem:[%s1307_s5 + $0x48] sm:$0xff]  ;;  %v398_v0 = vld [vmem:[%s1307_s5 + $0xd8] sm:$0xff]  ;;  %v381_v3 = vld [vmem:[%s1307_s5 + $0x50] sm:$0xff] }
  0x45   :  { %675 = vmatpush3.bf16.msra.mxu0 %v674_v41  ;;  %v690_v1 = vpack.c.bf16 %v380_v62, %v379_v61  ;;  %v692_v2 = vpack.c.bf16 %v398_v0, %v397_v63  ;;  %v382_v4 = vld [vmem:[%s1307_s5 + $0x58] sm:$0xff]  ;;  %v399_v5 = vld [vmem:[%s1307_s5 + $0xe0] sm:$0xff]  ;;  %v400_v6 = vld [vmem:[%s1307_s5 + $0xe8] sm:$0xff] }
  0x46   :  { %677 = vmatprep.subr.bf16.mxu0 %v676_v42  ;;  %v694_v7 = vpack.c.bf16 %v382_v4, %v381_v3  ;;  %v696_v8 = vpack.c.bf16 %v400_v6, %v399_v5  ;;  %v383_v22 = vld [vmem:[%s1307_s5 + $0x60] sm:$0xff]  ;;  %v401_v25 = vld [vmem:[%s1307_s5 + $0xf0] sm:$0xff]  ;;  %v402_v26 = vld [vmem:[%s1307_s5 + $0xf8] sm:$0xff] }
  0x47   :  { %655 = vmatpush1.bf16.msra.mxu1 %v654_v11  ;;  %v132_v11 = vsub.s32 0, %v131_v10  ;;  %v385_v28 = vld [vmem:[%s1307_s5 + $0x70] sm:$0xff]  ;;  %v386_v29 = vld [vmem:[%s1307_s5 + $0x78] sm:$0xff]  ;;  %v286_v31 = vld [vmem:[%s1306_s4] sm:$0x3]  ;;  %s735_s4 = smov [#allocation2]  }
  0x48   :  { %657 = vmatprep.subr.bf16.mxu1 %v656_v12  ;;  %v128_v12 = vld [vmem:[%s1304_s2] sm:$0x3]  ;;  %s500_s11 = sshll.u32 %s735_s4, 4  ;;  %s501_s11 = int_to_ptr.vmem [resolvable:$true] %s500_s11 }
  0x49   :  { %679 = vmatpush3.bf16.msra.mxu0 %v678_v49  ;;  %v133_v14 = vrot.slane %v128_v12, %v132_v11  ;;  %v137_v15 = vrot.slane %v128_v12, %v136_v13  ;;  %v291_v32 = vrot.slane %v286_v31, %v132_v11  ;;  %v508_v42 = vld [vmem:[%s1308_s6] ss:$0 sm:$0xff]  ;;  %s711_s6 = scalar_lea.vmem %s501_s11, 32  ;;  %p716_p1 = scmp.lt.s32.totalorder %s501_s11, %s501_s11 }
  0x4a   :  { %681 = vmatprep.subr.bf16.mxu0 %v680_v50  ;;  %p712_p0 = scmp.ne.s32.totalorder %s501_s11, %s711_s6  ;;  %p717_p2 = scmp.lt.s32.totalorder %s711_s6, %s711_s6 }
  0x4b   :  { %659 = vmatpush1.bf16.msra.mxu1 %v658_v17 }
  0x4c   :  { %661 = vmatprep.subr.bf16.mxu1 %v660_v18  ;;  %p718_p3 = por %p717_p2, %p716_p1 }
  0x4d   :  { %683 = vmatpush3.bf16.msra.mxu0 %v682_v55 }
  0x4e   :  { %685 = vmatprep.subr.bf16.mxu0 %v684_v56  ;;  %p719_p4 = pnand %p718_p3, %p712_p0 }
  0x4f   :  { %663 = vmatpush1.bf16.msra.mxu1 %v662_v23  ;;  %v384_v23 = vld [vmem:[%s1307_s5 + $0x68] sm:$0xff] }
  0x50   :  { %665 = vmatprep.subr.bf16.mxu1 %v664_v24  ;;  %v698_v24 = vpack.c.bf16 %v384_v23, %v383_v22 }
  0x51   :  { %687 = vmatpush3.bf16.msra.mxu0 %v686_v59 }
  0x52   :  { %689 = vmatprep.subr.bf16.mxu0 %v688_v60 }
  0x53   :  { %667 = vmatpush1.bf16.msra.mxu1 %v666_v27  ;;  %v700_v27 = vpack.c.bf16 %v402_v26, %v401_v25 }
  0x54   :  { %669 = vmatprep.subr.bf16.mxu1 %v668_v30  ;;  %v702_v30 = vpack.c.bf16 %v386_v29, %v385_v28 }
  0x55   :  { %691 = vmatpush3.bf16.msra.mxu0 %v690_v1 }
  0x56   :  { %693 = vmatprep.subr.bf16.mxu0 %v692_v2 }
  0x57   :  { %671 = vmatpush1.bf16.msra.mxu1 %v670_v33  ;;  %v295_v33 = vrot.slane %v286_v31, %v136_v13 }
  0x59   :  { %695 = vmatpush3.bf16.msra.mxu0 %v694_v7 }
  0x5a   :  { %697 = vmatprep.subr.bf16.mxu0 %v696_v8 }
  0x5d   :  { %699 = vmatpush3.bf16.msra.mxu0 %v698_v24 }
  0x5e   :  { %701 = vmatprep.subr.bf16.mxu0 %v700_v27 }
  0x61   :  { %703 = vmatpush3.bf16.msra.mxu0 %v702_v30 }
 0x117   :  { %v215_v16 = vpop.f32.mrb[0].mxu0 }
 0x118   :  { %v216_v17 = vadd.f32 %v215_v16, %v133_v14  ;;  %v217_v18 = vpop.f32.mrb[1].mxu0 }
 0x119   :  { %v218_v19 = vadd.f32 %v217_v18, %v137_v15 }
 0x11a   :  { %v220_v21 = vmax.f32 %v216_v17, 0.0 }
 0x11b   :  { %v221_v20 = vmax.f32 %v218_v19, 0.0 }
 0x11d   :  { %362 = vmatprep.mubr.f32.mxu1 %v221_v20 }
 0x11e   :  { %363 = vmatmul.mubr.f32.vlgmr.msra.gmra.mrb[0].mxu1 %v220_v21 }
 0x1f1   :  { %v364_v34 = vpop.f32.mrb[0].mxu1 }
 0x1f2   :  { %v365_v35 = vadd.f32 %v364_v34, %v291_v32  ;;  %v366_v36 = vpop.f32.mrb[1].mxu1 }
 0x1f3   :  { %v367_v37 = vadd.f32 %v366_v36, %v295_v33 }
 0x1f4   :  { %v369_v39 = vmax.f32 %v365_v35, 0.0 }
 0x1f5   :  { %v370_v38 = vmax.f32 %v367_v37, 0.0 }
 0x1f7   :  { %474 = vmatprep.mubr.f32.mxu0 %v370_v38 }
 0x1f8   :  { %475 = vmatmul.mubr.f32.vlgmr.msra.gmra.mrb[2].mxu0 %v369_v39 }
 0x2cb   :  { %v541_v40 = vpop.f32.mrb[2].mxu0 }
 0x2cc   :  { %v542_v41 = vpop.f32.mrb[3].mxu0 }
 0x2cd   :  { %v543_v45 = vadd.f32 %v542_v41, %v541_v40 }
 0x2cf   :  { %v477_v46 = vadd.f32 %v543_v45, %v508_v42 }
 0x2d1   :  { %v481_v47 = vsel %vm480_vm2, %v477_v46, -inf }
 0x2d2   :  { %482 = vmax.xlane.f32.xlu0 %v481_v47 }
 0x35f   :  { %v483_v48 = vpop.xlane.xlu0 %482 }
 0x360   :  { %v484_v49 = vsub.f32 %v477_v46, %v483_v48 }
 0x362   :  { %v485_v50 = vmul.f32 1.442695, %v484_v49 }
 0x364   :  { %707 = vpow2.f32 %v485_v50 }
 0x36e   :  { %v708_v51 = vpop.eup %707 }
 0x36f   :  { %v487_v52 = vsel %vm480_vm2, %v708_v51, 0.0 }
 0x370   :  { %488 = vadd.xlane.f32.xlu0 %v487_v52 }
 0x3fd   :  { %v489_v53 = vpop.xlane.xlu0 %488 }
 0x3fe   :  { %709 = vlog2.f32 %v489_v53 }
 0x408   :  { %v710_v54 = vpop.eup %709 }
 0x409   :  { %v491_v55 = vmul.f32 0.6931472, %v710_v54 }
 0x40b   :  { %v492_v56 = vsub.f32 %v484_v49, %v491_v55 }
 0x40d   :  { %493 = vst.msk [vmem:[#allocation2] sm:$0x3] %vm480_vm2, %v492_v56 }
 0x40e   :  { %722 = shalt.err (!%p719_p4)
}
 0x40f   :  { %s723_s14 = scalar_lea.hbm %s1309_s7, 32 }
 0x410   :  { %p724_p5 = scmp.ne.s32.totalorder %s1309_s7, %s723_s14  ;;  %p727_p6 = scmp.lt.u32.totalorder %s723_s14, %s1309_s7 }
 0x412   :  { %p729_p7 = pnand %p727_p6, %p724_p5 }
 0x414   :  { %732 = shalt.err (!%p729_p7)
}
 0x415   :  { %503 = dma.vmem_to_hbm [thread:$0]  %s501_s11, 32, %s1309_s7, [#allocation3]  }
 0x416   :  { %733 = dma.done.wait [#allocation3], 32  }
 0x417   :  { %734 = vsyncadd [#allocation3], 4294967264 }
 0x418   :  { %507 = vsyncpa [#allocation3], 1 }

</bundles_post_ra>
